<compile_context>
chip_gen: v7x
topology: tpu7x:2x2x1
jax: 0.10.0
libtpu: 0.0.40
codegen_flags: <defaults>
</compile_context>

<pallas_src>
import functools

import jax
import jax.numpy as jnp
import numpy as np
from jax import lax
from jax.experimental import pallas as pl
from jax.experimental.pallas import tpu as pltpu

NEG_SLOPE = 0.01   # nn.LeakyReLU default negative_slope
LN_EPS = 1e-5      # nn.LayerNorm default eps
SUBLANES = 8       # f32 sublane count


def _vmem_spec():
    # whole-array block resident in VMEM (all operands here are tiny)
    return pl.BlockSpec(memory_space=pltpu.MemorySpace.VMEM)


def _leaky_relu(v):
    return jnp.where(v > 0, v, NEG_SLOPE * v)


# -----------------------------------------------------------------------------
# Single fused kernel: conv stack + LSTM stack + output head
# -----------------------------------------------------------------------------
def _fused_cnn_lstm_kernel(*refs, seq_len, ksize, pad, hidden, num_layers,
                           head_depth, batch_pad):
    T, K, P, H, Bp = seq_len, ksize, pad, hidden, batch_pad
    f32 = jnp.float32
    bf16 = jnp.bfloat16
    it = iter(refs)

    # ---- inputs --------------------------------------------------------------
    x_ref = next(it)                                   # (T*Bp, Cin) time-major flat
    w1_ref, b1_ref = next(it), next(it)                # (K, Cin, C1), (1, C1)
    w2_ref, b2_ref = next(it), next(it)                # (K, C1, C2), (1, C2)
    lstm = []
    for l in range(num_layers):
        if l == 0:
            # (Cin, 4H) bf16, (C2, 4H) bf16, (H, 4H) bf16, (1, 4H) f32
            lstm.append((next(it), next(it), next(it), next(it)))
        else:
            # (H, 4H) bf16, (H, 4H) bf16, (1, 4H) f32
            lstm.append((next(it), next(it), next(it)))
    h0_ref, c0_ref = next(it), next(it)                # (L, Bp, H) each
    head = [(next(it), next(it), next(it), next(it))   # w, b, gamma, beta
            for _ in range(head_depth)]
    wlast_ref, blast_ref = next(it), next(it)          # (Flast, O), (1, O)

    # ---- outputs -------------------------------------------------------------
    out_ref = next(it)                                 # (Bp, O)
    h_out_ref = next(it)                               # (L, Bp, H)
    c_out_ref = next(it)                               # (L, Bp, H)

    # ---- scratch (VMEM) ------------------------------------------------------
    xp_sc = next(it)        # ((T+2P)*Bp, Cin)  zero-padded input
    c1p_sc = next(it)       # ((T+2P)*Bp, C1)   zero-padded conv1 output
    gates_sc = next(it)     # (T*Bp, 4H)        pre-projected gates (+bias)
    y_sc = next(it)         # (T*Bp, H)         inter-layer hidden sequence

    Cin = x_ref.shape[1]
    C1 = w1_ref.shape[2]
    C2 = w2_ref.shape[2]

    # ================= CNN: conv1 -> LeakyReLU -> conv2 -> LeakyReLU ==========
    # zero only the pad rows at both ends (rest is overwritten below)
    xp_sc[0:P * Bp, :] = jnp.zeros((P * Bp, Cin), f32)
    xp_sc[(P + T) * Bp:(T + 2 * P) * Bp, :] = jnp.zeros((P * Bp, Cin), f32)
    xp_sc[P * Bp:(P + T) * Bp, :] = x_ref[...]

    acc1 = jnp.zeros((T * Bp, C1), f32)
    for j in range(K):                                 # static tap unroll
        acc1 = acc1 + jnp.dot(xp_sc[j * Bp:(j + T) * Bp, :], w1_ref[j],
                              preferred_element_type=f32)
    h1 = _leaky_relu(acc1 + b1_ref[...])               # (T*Bp, C1)

    c1p_sc[0:P * Bp, :] = jnp.zeros((P * Bp, C1), f32)
    c1p_sc[(P + T) * Bp:(T + 2 * P) * Bp, :] = jnp.zeros((P * Bp, C1), f32)
    c1p_sc[P * Bp:(P + T) * Bp, :] = h1

    acc2 = jnp.zeros((T * Bp, C2), f32)
    for j in range(K):
        acc2 = acc2 + jnp.dot(c1p_sc[j * Bp:(j + T) * Bp, :], w2_ref[j],
                              preferred_element_type=f32)
    x_conv = _leaky_relu(acc2 + b2_ref[...])           # (T*Bp, C2)

    # ================= LSTM stack (torch gate order i, f, g, o) ===============
    hT = None
    for l in range(num_layers):
        # ---- hoisted input projection + bias (one flattened matmul per layer)
        if l == 0:
            wx_ref, wc_ref, whh_ref, bg_ref = lstm[0]
            # cat(x, x_conv) @ W_ih^T == x @ Wx + x_conv @ Wc (concat folded)
            gates_sc[...] = (
                jnp.dot(x_ref[...].astype(bf16), wx_ref[...],
                        preferred_element_type=f32)
                + jnp.dot(x_conv.astype(bf16), wc_ref[...],
                          preferred_element_type=f32)
                + bg_ref[...])
        else:
            wih_ref, whh_ref, bg_ref = lstm[l]
            gates_sc[...] = (
                jnp.dot(y_sc[...].astype(bf16), wih_ref[...],
                        preferred_element_type=f32)
                + bg_ref[...])

        whh = whh_ref[...]                  # hoisted (H, 4H) bf16 load
        write_y = l + 1 < num_layers        # last layer's y sequence is dead

        def step(t, carry, whh=whh, write_y=write_y):
            h, c = carry                    # f32 vreg carries, no VMEM round-trip
            row = pl.multiple_of(t * Bp, Bp)
            g = gates_sc[pl.ds(row, Bp), :] + jnp.dot(
                h.astype(bf16), whh, preferred_element_type=f32)   # (Bp, 4H)
            # 2 full-width tanh EUP pushes instead of 4 per-gate activations
            sig = 0.5 * jnp.tanh(0.5 * g) + 0.5     # == sigmoid(g)
            th = jnp.tanh(g)
            i_g = sig[:, 0 * H:1 * H]
            f_g = sig[:, 1 * H:2 * H]
            o_g = sig[:, 3 * H:4 * H]
            g_g = th[:, 2 * H:3 * H]
            c_new = f_g * c + i_g * g_g
            h_new = o_g * jnp.tanh(c_new)
            if write_y:
                y_sc[pl.ds(row, Bp), :] = h_new
            return (h_new, c_new)

        # unroll=True is fine at small T; switch to partial unroll at large T.
        hT, cT = lax.fori_loop(0, T, step, (h0_ref[l], c0_ref[l]), unroll=True)
        h_out_ref[l] = hT
        c_out_ref[l] = cT

    # ================= output head (fused, only final tiny store) =============
    out = hT                                           # == h[-1], (Bp, H)
    for i in range(head_depth):
        w_ref, b_ref, gam_ref, beta_ref = head[i]
        z = jnp.dot(out, w_ref[...], preferred_element_type=f32) + b_ref[...]
        mean = jnp.mean(z, axis=-1, keepdims=True)
        var = jnp.mean(jnp.square(z - mean), axis=-1, keepdims=True)
        zh = (z - mean) * lax.rsqrt(var + LN_EPS) * gam_ref[...] + beta_ref[...]
        out = _leaky_relu(zh)
    out_ref[...] = (jnp.dot(out, wlast_ref[...], preferred_element_type=f32)
                    + blast_ref[...]).astype(out_ref.dtype)


# -----------------------------------------------------------------------------
# Wrapper: weight re-layout + batch padding + single pallas_call
# -----------------------------------------------------------------------------
def cnn_lstm_forward(params, x, h0, c0):
    # x: (B, T, input_size); h0/c0: (L, B, H)
    B, T, Cin = x.shape
    L, _, H = h0.shape
    C1, _, K = params["conv1_w"].shape
    C2 = params["conv2_w"].shape[0]
    assert K % 2 == 1, "even conv kernel sizes are not supported (padding semantics)"
    pad = (K - 1) // 2
    O = params["last_w"].shape[0]
    head_depth = len(params["head"])
    f32 = jnp.float32
    bf16 = jnp.bfloat16
    Bp = ((B + SUBLANES - 1) // SUBLANES) * SUBLANES   # pad batch to sublane count

    def conv_taps(w):  # torch (Cout, Cin, K) -> tap-major (K, Cin, Cout)
        return jnp.transpose(w, (2, 1, 0)).astype(f32)

    # time-major, batch-padded, flattened input: row index = t*Bp + b
    x_tm = jnp.transpose(x, (1, 0, 2)).astype(f32)                    # (T, B, Cin)
    x_flat = jnp.zeros((T, Bp, Cin), f32).at[:, :B, :].set(x_tm).reshape(T * Bp, Cin)
    h0p = jnp.zeros((L, Bp, H), f32).at[:, :B, :].set(h0.astype(f32))
    c0p = jnp.zeros((L, Bp, H), f32).at[:, :B, :].set(c0.astype(f32))

    args = [
        x_flat,
        conv_taps(params["conv1_w"]), params["conv1_b"].reshape(1, C1).astype(f32),
        conv_taps(params["conv2_w"]), params["conv2_b"].reshape(1, C2).astype(f32),
    ]
    for l, lp in enumerate(params["lstm"]):
        wih = lp["w_ih"].astype(f32)                      # (4H, Din)
        bias = (lp["b_ih"] + lp["b_hh"]).reshape(1, 4 * H).astype(f32)
        whh = lp["w_hh"].astype(f32).T.astype(bf16)       # (H, 4H) bf16
        if l == 0:
            # split W_ih over the cat(x, x_conv) feature layout: x first, conv after
            args += [wih[:, :Cin].T.astype(bf16), wih[:, Cin:].T.astype(bf16),
                     whh, bias]
        else:
            args += [wih.T.astype(bf16), whh, bias]
    args += [h0p, c0p]
    for hp in params["head"]:
        fout = hp["w"].shape[0]
        args += [hp["w"].astype(f32).T, hp["b"].reshape(1, fout).astype(f32),
                 hp["gamma"].reshape(1, fout).astype(f32),
                 hp["beta"].reshape(1, fout).astype(f32)]
    args += [params["last_w"].astype(f32).T, params["last_b"].reshape(1, O).astype(f32)]

    kernel = functools.partial(
        _fused_cnn_lstm_kernel, seq_len=T, ksize=K, pad=pad, hidden=H,
        num_layers=L, head_depth=head_depth, batch_pad=Bp)

    out, h, c = pl.pallas_call(
        kernel,
        out_shape=(jax.ShapeDtypeStruct((Bp, O), f32),
                   jax.ShapeDtypeStruct((L, Bp, H), f32),
                   jax.ShapeDtypeStruct((L, Bp, H), f32)),
        in_specs=[_vmem_spec()] * len(args),
        out_specs=(_vmem_spec(), _vmem_spec(), _vmem_spec()),
        scratch_shapes=[
            pltpu.VMEM(((T + 2 * pad) * Bp, Cin), f32),   # padded input (flat)
            pltpu.VMEM(((T + 2 * pad) * Bp, C1), f32),    # padded conv1 out (flat)
            pltpu.VMEM((T * Bp, 4 * H), f32),             # pre-projected gates
            pltpu.VMEM((T * Bp, H), f32),                 # inter-layer hidden seq
        ],
    )(*args)
    # slice padded batch rows back; out.unsqueeze(1), (h, c)
    return out[:B, None, :], (h[:, :B], c[:, :B])


# -----------------------------------------------------------------------------
# Parameter construction (deterministic, torch-shaped tensors)
# -----------------------------------------------------------------------------
def init_params(key, *, input_size, hidden_size, output_size, lstm_hidden_layers,
                output_depth=4, output_size_decay=0.5,
                conv1_filters=32, conv2_filters=64, conv_kernel_size=3):
    keys = iter(jax.random.split(key, 64))

    def nrm(shape, scale=0.1):
        return scale * jax.random.normal(next(keys), shape, jnp.float32)

    K = conv_kernel_size
    H = hidden_size
    p = {
        "conv1_w": nrm((conv1_filters, input_size, K)),
        "conv1_b": nrm((conv1_filters,)),
        "conv2_w": nrm((conv2_filters, conv1_filters, K)),
        "conv2_b": nrm((conv2_filters,)),
        "lstm": [],
        "head": [],
    }
    lstm_in = conv2_filters + input_size
    for l in range(lstm_hidden_layers):
        din = lstm_in if l == 0 else H
        p["lstm"].append(dict(w_ih=nrm((4 * H, din)), w_hh=nrm((4 * H, H)),
                              b_ih=nrm((4 * H,)), b_hh=nrm((4 * H,))))
    for i in range(int(output_depth)):
        fin = int(hidden_size * output_size_decay ** i)
        fout = int(hidden_size * output_size_decay ** (i + 1))
        p["head"].append(dict(w=nrm((fout, fin)), b=nrm((fout,)),
                              gamma=jnp.ones((fout,), jnp.float32),
                              beta=jnp.zeros((fout,), jnp.float32)))
    fin_last = int(hidden_size * output_size_decay ** int(output_depth))
    p["last_w"] = nrm((output_size, fin_last))
    p["last_b"] = nrm((output_size,))
    return p


# -----------------------------------------------------------------------------
# Pure-JAX f32 reference (independent conv via lax.conv, LSTM via lax.scan)
# -----------------------------------------------------------------------------
def reference_forward(params, x, h0, c0):
    def lrelu(v):
        return jnp.where(v > 0, v, NEG_SLOPE * v)

    def conv(v, w, b):
        pad = (w.shape[-1] - 1) // 2
        vt = jnp.transpose(v, (0, 2, 1))
        out = lax.conv_general_dilated(vt, w, (1,), [(pad, pad)],
                                       dimension_numbers=("NCH", "OIH", "NCH"))
        out = out + b[None, :, None]
        return jnp.transpose(lrelu(out), (0, 2, 1))

    xc = conv(x, params["conv1_w"], params["conv1_b"])
    xc = conv(xc, params["conv2_w"], params["conv2_b"])
    seq = jnp.concatenate([x, xc], axis=2)

    H = h0.shape[-1]
    h_f, c_f = [], []
    for l, lp in enumerate(params["lstm"]):
        wih, whh = lp["w_ih"], lp["w_hh"]
        bias = lp["b_ih"] + lp["b_hh"]

        def step(carry, x_t):
            h, c = carry
            g = x_t @ wih.T + h @ whh.T + bias
            i = jax.nn.sigmoid(g[:, :H])
            f = jax.nn.sigmoid(g[:, H:2 * H])
            gg = jnp.tanh(g[:, 2 * H:3 * H])
            o = jax.nn.sigmoid(g[:, 3 * H:])
            c2 = f * c + i * gg
            h2 = o * jnp.tanh(c2)
            return (h2, c2), h2

        (hT, cT), ys = lax.scan(step, (h0[l], c0[l]), jnp.transpose(seq, (1, 0, 2)))
        seq = jnp.transpose(ys, (1, 0, 2))
        h_f.append(hT)
        c_f.append(cT)
    h = jnp.stack(h_f)
    c = jnp.stack(c_f)

    out = h[-1]
    for hp in params["head"]:
        z = out @ hp["w"].T + hp["b"]
        m = z.mean(-1, keepdims=True)
        v = ((z - m) ** 2).mean(-1, keepdims=True)
        z = (z - m) / jnp.sqrt(v + LN_EPS) * hp["gamma"] + hp["beta"]
        out = lrelu(z)
    out = out @ params["last_w"].T + params["last_b"]
    return out[:, None, :], (h, c)


if __name__ == "__main__":
    B, T = 2, 8
    input_size, hidden_size, output_size = 4, 32, 3
    lstm_hidden_layers = 2

    key = jax.random.PRNGKey(0)
    k_param, k_x = jax.random.split(key)
    params = init_params(k_param, input_size=input_size, hidden_size=hidden_size,
                         output_size=output_size,
                         lstm_hidden_layers=lstm_hidden_layers)
    x = jax.random.normal(k_x, (B, T, input_size), jnp.float32)
    # state_connected=True with h=c=None -> zeros(L, B, H)
    h0 = jnp.zeros((lstm_hidden_layers, B, hidden_size), jnp.float32)
    c0 = jnp.zeros((lstm_hidden_layers, B, hidden_size), jnp.float32)

    out, (h, c) = jax.jit(cnn_lstm_forward)(params, x, h0, c0)
    jax.block_until_ready((out, h, c))

    ref_out, (ref_h, ref_c) = reference_forward(params, x, h0, c0)
    # tolerance loosened vs. the pure-f32 version: LSTM matmul operands are bf16
    np.testing.assert_allclose(np.asarray(out), np.asarray(ref_out), rtol=2e-2, atol=2e-2)
    np.testing.assert_allclose(np.asarray(h), np.asarray(ref_h), rtol=2e-2, atol=2e-2)
    np.testing.assert_allclose(np.asarray(c), np.asarray(ref_c), rtol=2e-2, atol=2e-2)
    assert out.shape == (B, 1, output_size)
    assert h.shape == (lstm_hidden_layers, B, hidden_size)
    assert c.shape == (lstm_hidden_layers, B, hidden_size)

    print("KERNEL_OK")
</pallas_src>

<mosaic_0001>
module attributes {stable_mosaic.version = 11 : i64} {
  func.func @_fused_cnn_lstm_kernel(%arg0: memref<64x4xf32, #tpu.memory_space<vmem>>, %arg1: memref<3x4x32xf32, #tpu.memory_space<vmem>>, %arg2: memref<1x32xf32, #tpu.memory_space<vmem>>, %arg3: memref<3x32x64xf32, #tpu.memory_space<vmem>>, %arg4: memref<1x64xf32, #tpu.memory_space<vmem>>, %arg5: memref<4x128xbf16, #tpu.memory_space<vmem>>, %arg6: memref<64x128xbf16, #tpu.memory_space<vmem>>, %arg7: memref<32x128xbf16, #tpu.memory_space<vmem>>, %arg8: memref<1x128xf32, #tpu.memory_space<vmem>>, %arg9: memref<32x128xbf16, #tpu.memory_space<vmem>>, %arg10: memref<32x128xbf16, #tpu.memory_space<vmem>>, %arg11: memref<1x128xf32, #tpu.memory_space<vmem>>, %arg12: memref<2x8x32xf32, #tpu.memory_space<vmem>>, %arg13: memref<2x8x32xf32, #tpu.memory_space<vmem>>, %arg14: memref<32x16xf32, #tpu.memory_space<vmem>>, %arg15: memref<1x16xf32, #tpu.memory_space<vmem>>, %arg16: memref<1x16xf32, #tpu.memory_space<vmem>>, %arg17: memref<1x16xf32, #tpu.memory_space<vmem>>, %arg18: memref<16x8xf32, #tpu.memory_space<vmem>>, %arg19: memref<1x8xf32, #tpu.memory_space<vmem>>, %arg20: memref<1x8xf32, #tpu.memory_space<vmem>>, %arg21: memref<1x8xf32, #tpu.memory_space<vmem>>, %arg22: memref<8x4xf32, #tpu.memory_space<vmem>>, %arg23: memref<1x4xf32, #tpu.memory_space<vmem>>, %arg24: memref<1x4xf32, #tpu.memory_space<vmem>>, %arg25: memref<1x4xf32, #tpu.memory_space<vmem>>, %arg26: memref<4x2xf32, #tpu.memory_space<vmem>>, %arg27: memref<1x2xf32, #tpu.memory_space<vmem>>, %arg28: memref<1x2xf32, #tpu.memory_space<vmem>>, %arg29: memref<1x2xf32, #tpu.memory_space<vmem>>, %arg30: memref<2x3xf32, #tpu.memory_space<vmem>>, %arg31: memref<1x3xf32, #tpu.memory_space<vmem>>, %arg32: memref<8x3xf32, #tpu.memory_space<vmem>>, %arg33: memref<2x8x32xf32, #tpu.memory_space<vmem>>, %arg34: memref<2x8x32xf32, #tpu.memory_space<vmem>>, %arg35: memref<80x4xf32, #tpu.memory_space<vmem>>, %arg36: memref<80x32xf32, #tpu.memory_space<vmem>>, %arg37: memref<64x128xf32, #tpu.memory_space<vmem>>, %arg38: memref<64x32xf32, #tpu.memory_space<vmem>>) attributes {dimension_semantics = [], scalar_prefetch = 0 : i64, scratch_operands = 4 : i64, tpu.core_type = #tpu.core_type<tc>} {
    %cst = arith.constant 0.000000e+00 : f32
    %0 = vector.broadcast %cst : f32 to vector<8x4xf32>
    %c0 = arith.constant 0 : index
    %c0_0 = arith.constant 0 : index
    %1 = vector.load %arg35[%c0, %c0_0] : memref<80x4xf32, #tpu.memory_space<vmem>>, vector<8x4xf32>
    tpu.vector_store %arg35[%c0, %c0_0], %0 {strides = array<i32>} : memref<80x4xf32, #tpu.memory_space<vmem>>, vector<8x4xf32>,
    %cst_1 = arith.constant 0.000000e+00 : f32
    %2 = vector.broadcast %cst_1 : f32 to vector<8x4xf32>
    %c72 = arith.constant 72 : index
    %c0_2 = arith.constant 0 : index
    %3 = vector.load %arg35[%c72, %c0_2] : memref<80x4xf32, #tpu.memory_space<vmem>>, vector<8x4xf32>
    tpu.vector_store %arg35[%c72, %c0_2], %2 {strides = array<i32>} : memref<80x4xf32, #tpu.memory_space<vmem>>, vector<8x4xf32>,
    %c0_3 = arith.constant 0 : index
    %c0_4 = arith.constant 0 : index
    %4 = vector.load %arg0[%c0_3, %c0_4] : memref<64x4xf32, #tpu.memory_space<vmem>>, vector<64x4xf32>
    %c8 = arith.constant 8 : index
    %c0_5 = arith.constant 0 : index
    %5 = vector.load %arg35[%c8, %c0_5] : memref<80x4xf32, #tpu.memory_space<vmem>>, vector<64x4xf32>
    tpu.vector_store %arg35[%c8, %c0_5], %4 {strides = array<i32>} : memref<80x4xf32, #tpu.memory_space<vmem>>, vector<64x4xf32>,
    %cst_6 = arith.constant 0.000000e+00 : f32
    %6 = vector.broadcast %cst_6 : f32 to vector<64x32xf32>
    %c0_7 = arith.constant 0 : index
    %c0_8 = arith.constant 0 : index
    %7 = vector.load %arg35[%c0_7, %c0_8] : memref<80x4xf32, #tpu.memory_space<vmem>>, vector<64x4xf32>
    %c0_9 = arith.constant 0 : index
    %c0_10 = arith.constant 0 : index
    %c0_11 = arith.constant 0 : index
    %8 = vector.load %arg1[%c0_9, %c0_10, %c0_11] : memref<3x4x32xf32, #tpu.memory_space<vmem>>, vector<1x4x32xf32>
    %9 = vector.shape_cast %8 : vector<1x4x32xf32> to vector<4x32xf32>
    %cst_12 = arith.constant dense<0.000000e+00> : vector<64x32xf32>
    %10 = tpu.matmul %7, %9, %cst_12 {dimension_numbers = #tpu.dot_dimension_numbers<[1], [0], [0], [1], [0, 0, 1, 1], [], []>} : vector<64x4xf32>, vector<4x32xf32>, vector<64x32xf32> -> vector<64x32xf32>
    %11 = arith.addf %6, %10 : vector<64x32xf32>
    %c8_13 = arith.constant 8 : index
    %c0_14 = arith.constant 0 : index
    %12 = vector.load %arg35[%c8_13, %c0_14] : memref<80x4xf32, #tpu.memory_space<vmem>>, vector<64x4xf32>
    %c1 = arith.constant 1 : index
    %c0_15 = arith.constant 0 : index
    %c0_16 = arith.constant 0 : index
    %13 = vector.load %arg1[%c1, %c0_15, %c0_16] : memref<3x4x32xf32, #tpu.memory_space<vmem>>, vector<1x4x32xf32>
    %14 = vector.shape_cast %13 : vector<1x4x32xf32> to vector<4x32xf32>
    %cst_17 = arith.constant dense<0.000000e+00> : vector<64x32xf32>
    %15 = tpu.matmul %12, %14, %cst_17 {dimension_numbers = #tpu.dot_dimension_numbers<[1], [0], [0], [1], [0, 0, 1, 1], [], []>} : vector<64x4xf32>, vector<4x32xf32>, vector<64x32xf32> -> vector<64x32xf32>
    %16 = arith.addf %11, %15 : vector<64x32xf32>
    %c16 = arith.constant 16 : index
    %c0_18 = arith.constant 0 : index
    %17 = vector.load %arg35[%c16, %c0_18] : memref<80x4xf32, #tpu.memory_space<vmem>>, vector<64x4xf32>
    %c2 = arith.constant 2 : index
    %c0_19 = arith.constant 0 : index
    %c0_20 = arith.constant 0 : index
    %18 = vector.load %arg1[%c2, %c0_19, %c0_20] : memref<3x4x32xf32, #tpu.memory_space<vmem>>, vector<1x4x32xf32>
    %19 = vector.shape_cast %18 : vector<1x4x32xf32> to vector<4x32xf32>
    %cst_21 = arith.constant dense<0.000000e+00> : vector<64x32xf32>
    %20 = tpu.matmul %17, %19, %cst_21 {dimension_numbers = #tpu.dot_dimension_numbers<[1], [0], [0], [1], [0, 0, 1, 1], [], []>} : vector<64x4xf32>, vector<4x32xf32>, vector<64x32xf32> -> vector<64x32xf32>
    %21 = arith.addf %16, %20 : vector<64x32xf32>
    %c0_22 = arith.constant 0 : index
    %c0_23 = arith.constant 0 : index
    %22 = vector.load %arg2[%c0_22, %c0_23] : memref<1x32xf32, #tpu.memory_space<vmem>>, vector<1x32xf32>
    %23 = vector.broadcast %22 : vector<1x32xf32> to vector<64x32xf32>
    %24 = arith.addf %21, %23 : vector<64x32xf32>
    %cst_24 = arith.constant 0.000000e+00 : f32
    %25 = vector.broadcast %cst_24 : f32 to vector<64x32xf32>
    %26 = arith.cmpf ogt, %24, %25 : vector<64x32xf32>
    %cst_25 = arith.constant 0.00999999977 : f32
    %27 = vector.broadcast %cst_25 : f32 to vector<64x32xf32>
    %28 = arith.mulf %27, %24 : vector<64x32xf32>
    %29 = arith.select %26, %24, %28 : vector<64x32xi1>, vector<64x32xf32>
    %cst_26 = arith.constant 0.000000e+00 : f32
    %30 = vector.broadcast %cst_26 : f32 to vector<8x32xf32>
    %c0_27 = arith.constant 0 : index
    %c0_28 = arith.constant 0 : index
    %31 = vector.load %arg36[%c0_27, %c0_28] : memref<80x32xf32, #tpu.memory_space<vmem>>, vector<8x32xf32>
    tpu.vector_store %arg36[%c0_27, %c0_28], %30 {strides = array<i32>} : memref<80x32xf32, #tpu.memory_space<vmem>>, vector<8x32xf32>,
    %cst_29 = arith.constant 0.000000e+00 : f32
    %32 = vector.broadcast %cst_29 : f32 to vector<8x32xf32>
    %c72_30 = arith.constant 72 : index
    %c0_31 = arith.constant 0 : index
    %33 = vector.load %arg36[%c72_30, %c0_31] : memref<80x32xf32, #tpu.memory_space<vmem>>, vector<8x32xf32>
    tpu.vector_store %arg36[%c72_30, %c0_31], %32 {strides = array<i32>} : memref<80x32xf32, #tpu.memory_space<vmem>>, vector<8x32xf32>,
    %c8_32 = arith.constant 8 : index
    %c0_33 = arith.constant 0 : index
    %34 = vector.load %arg36[%c8_32, %c0_33] : memref<80x32xf32, #tpu.memory_space<vmem>>, vector<64x32xf32>
    tpu.vector_store %arg36[%c8_32, %c0_33], %29 {strides = array<i32>} : memref<80x32xf32, #tpu.memory_space<vmem>>, vector<64x32xf32>,
    %cst_34 = arith.constant 0.000000e+00 : f32
    %35 = vector.broadcast %cst_34 : f32 to vector<64x64xf32>
    %c0_35 = arith.constant 0 : index
    %c0_36 = arith.constant 0 : index
    %36 = vector.load %arg36[%c0_35, %c0_36] : memref<80x32xf32, #tpu.memory_space<vmem>>, vector<64x32xf32>
    %c0_37 = arith.constant 0 : index
    %c0_38 = arith.constant 0 : index
    %c0_39 = arith.constant 0 : index
    %37 = vector.load %arg3[%c0_37, %c0_38, %c0_39] : memref<3x32x64xf32, #tpu.memory_space<vmem>>, vector<1x32x64xf32>
    %38 = vector.shape_cast %37 : vector<1x32x64xf32> to vector<32x64xf32>
    %cst_40 = arith.constant dense<0.000000e+00> : vector<64x64xf32>
    %39 = tpu.matmul %36, %38, %cst_40 {dimension_numbers = #tpu.dot_dimension_numbers<[1], [0], [0], [1], [0, 0, 1, 1], [], []>} : vector<64x32xf32>, vector<32x64xf32>, vector<64x64xf32> -> vector<64x64xf32>
    %40 = arith.addf %35, %39 : vector<64x64xf32>
    %c8_41 = arith.constant 8 : index
    %c0_42 = arith.constant 0 : index
    %41 = vector.load %arg36[%c8_41, %c0_42] : memref<80x32xf32, #tpu.memory_space<vmem>>, vector<64x32xf32>
    %c1_43 = arith.constant 1 : index
    %c0_44 = arith.constant 0 : index
    %c0_45 = arith.constant 0 : index
    %42 = vector.load %arg3[%c1_43, %c0_44, %c0_45] : memref<3x32x64xf32, #tpu.memory_space<vmem>>, vector<1x32x64xf32>
    %43 = vector.shape_cast %42 : vector<1x32x64xf32> to vector<32x64xf32>
    %cst_46 = arith.constant dense<0.000000e+00> : vector<64x64xf32>
    %44 = tpu.matmul %41, %43, %cst_46 {dimension_numbers = #tpu.dot_dimension_numbers<[1], [0], [0], [1], [0, 0, 1, 1], [], []>} : vector<64x32xf32>, vector<32x64xf32>, vector<64x64xf32> -> vector<64x64xf32>
    %45 = arith.addf %40, %44 : vector<64x64xf32>
    %c16_47 = arith.constant 16 : index
    %c0_48 = arith.constant 0 : index
    %46 = vector.load %arg36[%c16_47, %c0_48] : memref<80x32xf32, #tpu.memory_space<vmem>>, vector<64x32xf32>
    %c2_49 = arith.constant 2 : index
    %c0_50 = arith.constant 0 : index
    %c0_51 = arith.constant 0 : index
    %47 = vector.load %arg3[%c2_49, %c0_50, %c0_51] : memref<3x32x64xf32, #tpu.memory_space<vmem>>, vector<1x32x64xf32>
    %48 = vector.shape_cast %47 : vector<1x32x64xf32> to vector<32x64xf32>
    %cst_52 = arith.constant dense<0.000000e+00> : vector<64x64xf32>
    %49 = tpu.matmul %46, %48, %cst_52 {dimension_numbers = #tpu.dot_dimension_numbers<[1], [0], [0], [1], [0, 0, 1, 1], [], []>} : vector<64x32xf32>, vector<32x64xf32>, vector<64x64xf32> -> vector<64x64xf32>
    %50 = arith.addf %45, %49 : vector<64x64xf32>
    %c0_53 = arith.constant 0 : index
    %c0_54 = arith.constant 0 : index
    %51 = vector.load %arg4[%c0_53, %c0_54] : memref<1x64xf32, #tpu.memory_space<vmem>>, vector<1x64xf32>
    %52 = vector.broadcast %51 : vector<1x64xf32> to vector<64x64xf32>
    %53 = arith.addf %50, %52 : vector<64x64xf32>
    %cst_55 = arith.constant 0.000000e+00 : f32
    %54 = vector.broadcast %cst_55 : f32 to vector<64x64xf32>
    %55 = arith.cmpf ogt, %53, %54 : vector<64x64xf32>
    %cst_56 = arith.constant 0.00999999977 : f32
    %56 = vector.broadcast %cst_56 : f32 to vector<64x64xf32>
    %57 = arith.mulf %56, %53 : vector<64x64xf32>
    %58 = arith.select %55, %53, %57 : vector<64x64xi1>, vector<64x64xf32>
    %c0_57 = arith.constant 0 : index
    %c0_58 = arith.constant 0 : index
    %59 = vector.load %arg0[%c0_57, %c0_58] : memref<64x4xf32, #tpu.memory_space<vmem>>, vector<64x4xf32>
    %60 = arith.truncf %59 : vector<64x4xf32> to vector<64x4xbf16>
    %c0_59 = arith.constant 0 : index
    %c0_60 = arith.constant 0 : index
    %61 = vector.load %arg5[%c0_59, %c0_60] : memref<4x128xbf16, #tpu.memory_space<vmem>>, vector<4x128xbf16>
    %cst_61 = arith.constant dense<0.000000e+00> : vector<64x128xf32>
    %62 = tpu.matmul %60, %61, %cst_61 {dimension_numbers = #tpu.dot_dimension_numbers<[1], [0], [0], [1], [0, 0, 1, 1], [], []>} : vector<64x4xbf16>, vector<4x128xbf16>, vector<64x128xf32> -> vector<64x128xf32>
    %63 = arith.truncf %58 : vector<64x64xf32> to vector<64x64xbf16>
    %c0_62 = arith.constant 0 : index
    %c0_63 = arith.constant 0 : index
    %64 = vector.load %arg6[%c0_62, %c0_63] : memref<64x128xbf16, #tpu.memory_space<vmem>>, vector<64x128xbf16>
    %cst_64 = arith.constant dense<0.000000e+00> : vector<64x128xf32>
    %65 = tpu.matmul %63, %64, %cst_64 {dimension_numbers = #tpu.dot_dimension_numbers<[1], [0], [0], [1], [0, 0, 1, 1], [], []>} : vector<64x64xbf16>, vector<64x128xbf16>, vector<64x128xf32> -> vector<64x128xf32>
    %66 = arith.addf %62, %65 : vector<64x128xf32>
    %c0_65 = arith.constant 0 : index
    %c0_66 = arith.constant 0 : index
    %67 = vector.load %arg8[%c0_65, %c0_66] : memref<1x128xf32, #tpu.memory_space<vmem>>, vector<1x128xf32>
    %68 = vector.broadcast %67 : vector<1x128xf32> to vector<64x128xf32>
    %69 = arith.addf %66, %68 : vector<64x128xf32>
    %c0_67 = arith.constant 0 : index
    %c0_68 = arith.constant 0 : index
    %70 = vector.load %arg37[%c0_67, %c0_68] : memref<64x128xf32, #tpu.memory_space<vmem>>, vector<64x128xf32>
    tpu.vector_store %arg37[%c0_67, %c0_68], %69 {strides = array<i32>} : memref<64x128xf32, #tpu.memory_space<vmem>>, vector<64x128xf32>,
    %c0_69 = arith.constant 0 : index
    %c0_70 = arith.constant 0 : index
    %71 = vector.load %arg7[%c0_69, %c0_70] : memref<32x128xbf16, #tpu.memory_space<vmem>>, vector<32x128xbf16>
    %c0_71 = arith.constant 0 : index
    %c0_72 = arith.constant 0 : index
    %c0_73 = arith.constant 0 : index
    %72 = vector.load %arg12[%c0_71, %c0_72, %c0_73] : memref<2x8x32xf32, #tpu.memory_space<vmem>>, vector<1x8x32xf32>
    %73 = vector.shape_cast %72 : vector<1x8x32xf32> to vector<8x32xf32>
    %c0_74 = arith.constant 0 : index
    %c0_75 = arith.constant 0 : index
    %c0_76 = arith.constant 0 : index
    %74 = vector.load %arg13[%c0_74, %c0_75, %c0_76] : memref<2x8x32xf32, #tpu.memory_space<vmem>>, vector<1x8x32xf32>
    %75 = vector.shape_cast %74 : vector<1x8x32xf32> to vector<8x32xf32>
    %c0_i32 = arith.constant 0 : i32
    %c8_i32 = arith.constant 8 : i32
    %76 = arith.muli %c0_i32, %c8_i32 : i32
    %77 = tpu.assume_multiple %76, 8 : i32
    %78 = arith.index_cast %77 : i32 to index
    %c0_77 = arith.constant 0 : index
    %79 = vector.load %arg37[%78, %c0_77] : memref<64x128xf32, #tpu.memory_space<vmem>>, vector<8x128xf32>
    %80 = arith.truncf %73 : vector<8x32xf32> to vector<8x32xbf16>
    %cst_78 = arith.constant dense<0.000000e+00> : vector<8x128xf32>
    %81 = tpu.matmul %80, %71, %cst_78 {dimension_numbers = #tpu.dot_dimension_numbers<[1], [0], [0], [1], [0, 0, 1, 1], [], []>} : vector<8x32xbf16>, vector<32x128xbf16>, vector<8x128xf32> -> vector<8x128xf32>
    %82 = arith.addf %79, %81 : vector<8x128xf32>
    %cst_79 = arith.constant 5.000000e-01 : f32
    %83 = vector.broadcast %cst_79 : f32 to vector<8x128xf32>
    %84 = arith.mulf %83, %82 : vector<8x128xf32>
    %85 = math.tanh %84 : vector<8x128xf32>
    %cst_80 = arith.constant 5.000000e-01 : f32
    %86 = vector.broadcast %cst_80 : f32 to vector<8x128xf32>
    %87 = arith.mulf %86, %85 : vector<8x128xf32>
    %cst_81 = arith.constant 5.000000e-01 : f32
    %88 = vector.broadcast %cst_81 : f32 to vector<8x128xf32>
    %89 = arith.addf %87, %88 : vector<8x128xf32>
    %90 = math.tanh %82 : vector<8x128xf32>
    %91 = vector.extract_strided_slice %89 {offsets = [0, 0], sizes = [8, 32], strides = [1, 1]} : vector<8x128xf32> to vector<8x32xf32>
    %92 = vector.extract_strided_slice %89 {offsets = [0, 32], sizes = [8, 32], strides = [1, 1]} : vector<8x128xf32> to vector<8x32xf32>
    %93 = vector.extract_strided_slice %89 {offsets = [0, 96], sizes = [8, 32], strides = [1, 1]} : vector<8x128xf32> to vector<8x32xf32>
    %94 = vector.extract_strided_slice %90 {offsets = [0, 64], sizes = [8, 32], strides = [1, 1]} : vector<8x128xf32> to vector<8x32xf32>
    %95 = arith.mulf %92, %75 : vector<8x32xf32>
    %96 = arith.mulf %91, %94 : vector<8x32xf32>
    %97 = arith.addf %95, %96 : vector<8x32xf32>
    %98 = math.tanh %97 : vector<8x32xf32>
    %99 = arith.mulf %93, %98 : vector<8x32xf32>
    %100 = arith.index_cast %77 : i32 to index
    %c0_82 = arith.constant 0 : index
    %101 = vector.load %arg38[%100, %c0_82] : memref<64x32xf32, #tpu.memory_space<vmem>>, vector<8x32xf32>
    tpu.vector_store %arg38[%100, %c0_82], %99 {strides = array<i32>} : memref<64x32xf32, #tpu.memory_space<vmem>>, vector<8x32xf32>,
    %c1_i32 = arith.constant 1 : i32
    %c8_i32_83 = arith.constant 8 : i32
    %102 = arith.muli %c1_i32, %c8_i32_83 : i32
    %103 = tpu.assume_multiple %102, 8 : i32
    %104 = arith.index_cast %103 : i32 to index
    %c0_84 = arith.constant 0 : index
    %105 = vector.load %arg37[%104, %c0_84] : memref<64x128xf32, #tpu.memory_space<vmem>>, vector<8x128xf32>
    %106 = arith.truncf %99 : vector<8x32xf32> to vector<8x32xbf16>
    %cst_85 = arith.constant dense<0.000000e+00> : vector<8x128xf32>
    %107 = tpu.matmul %106, %71, %cst_85 {dimension_numbers = #tpu.dot_dimension_numbers<[1], [0], [0], [1], [0, 0, 1, 1], [], []>} : vector<8x32xbf16>, vector<32x128xbf16>, vector<8x128xf32> -> vector<8x128xf32>
    %108 = arith.addf %105, %107 : vector<8x128xf32>
    %cst_86 = arith.constant 5.000000e-01 : f32
    %109 = vector.broadcast %cst_86 : f32 to vector<8x128xf32>
    %110 = arith.mulf %109, %108 : vector<8x128xf32>
    %111 = math.tanh %110 : vector<8x128xf32>
    %cst_87 = arith.constant 5.000000e-01 : f32
    %112 = vector.broadcast %cst_87 : f32 to vector<8x128xf32>
    %113 = arith.mulf %112, %111 : vector<8x128xf32>
    %cst_88 = arith.constant 5.000000e-01 : f32
    %114 = vector.broadcast %cst_88 : f32 to vector<8x128xf32>
    %115 = arith.addf %113, %114 : vector<8x128xf32>
    %116 = math.tanh %108 : vector<8x128xf32>
    %117 = vector.extract_strided_slice %115 {offsets = [0, 0], sizes = [8, 32], strides = [1, 1]} : vector<8x128xf32> to vector<8x32xf32>
    %118 = vector.extract_strided_slice %115 {offsets = [0, 32], sizes = [8, 32], strides = [1, 1]} : vector<8x128xf32> to vector<8x32xf32>
    %119 = vector.extract_strided_slice %115 {offsets = [0, 96], sizes = [8, 32], strides = [1, 1]} : vector<8x128xf32> to vector<8x32xf32>
    %120 = vector.extract_strided_slice %116 {offsets = [0, 64], sizes = [8, 32], strides = [1, 1]} : vector<8x128xf32> to vector<8x32xf32>
    %121 = arith.mulf %118, %97 : vector<8x32xf32>
    %122 = arith.mulf %117, %120 : vector<8x32xf32>
    %123 = arith.addf %121, %122 : vector<8x32xf32>
    %124 = math.tanh %123 : vector<8x32xf32>
    %125 = arith.mulf %119, %124 : vector<8x32xf32>
    %126 = arith.index_cast %103 : i32 to index
    %c0_89 = arith.constant 0 : index
    %127 = vector.load %arg38[%126, %c0_89] : memref<64x32xf32, #tpu.memory_space<vmem>>, vector<8x32xf32>
    tpu.vector_store %arg38[%126, %c0_89], %125 {strides = array<i32>} : memref<64x32xf32, #tpu.memory_space<vmem>>, vector<8x32xf32>,
    %c2_i32 = arith.constant 2 : i32
    %c8_i32_90 = arith.constant 8 : i32
    %128 = arith.muli %c2_i32, %c8_i32_90 : i32
    %129 = tpu.assume_multiple %128, 8 : i32
    %130 = arith.index_cast %129 : i32 to index
    %c0_91 = arith.constant 0 : index
    %131 = vector.load %arg37[%130, %c0_91] : memref<64x128xf32, #tpu.memory_space<vmem>>, vector<8x128xf32>
    %132 = arith.truncf %125 : vector<8x32xf32> to vector<8x32xbf16>
    %cst_92 = arith.constant dense<0.000000e+00> : vector<8x128xf32>
    %133 = tpu.matmul %132, %71, %cst_92 {dimension_numbers = #tpu.dot_dimension_numbers<[1], [0], [0], [1], [0, 0, 1, 1], [], []>} : vector<8x32xbf16>, vector<32x128xbf16>, vector<8x128xf32> -> vector<8x128xf32>
    %134 = arith.addf %131, %133 : vector<8x128xf32>
    %cst_93 = arith.constant 5.000000e-01 : f32
    %135 = vector.broadcast %cst_93 : f32 to vector<8x128xf32>
    %136 = arith.mulf %135, %134 : vector<8x128xf32>
    %137 = math.tanh %136 : vector<8x128xf32>
    %cst_94 = arith.constant 5.000000e-01 : f32
    %138 = vector.broadcast %cst_94 : f32 to vector<8x128xf32>
    %139 = arith.mulf %138, %137 : vector<8x128xf32>
    %cst_95 = arith.constant 5.000000e-01 : f32
    %140 = vector.broadcast %cst_95 : f32 to vector<8x128xf32>
    %141 = arith.addf %139, %140 : vector<8x128xf32>
    %142 = math.tanh %134 : vector<8x128xf32>
    %143 = vector.extract_strided_slice %141 {offsets = [0, 0], sizes = [8, 32], strides = [1, 1]} : vector<8x128xf32> to vector<8x32xf32>
    %144 = vector.extract_strided_slice %141 {offsets = [0, 32], sizes = [8, 32], strides = [1, 1]} : vector<8x128xf32> to vector<8x32xf32>
    %145 = vector.extract_strided_slice %141 {offsets = [0, 96], sizes = [8, 32], strides = [1, 1]} : vector<8x128xf32> to vector<8x32xf32>
    %146 = vector.extract_strided_slice %142 {offsets = [0, 64], sizes = [8, 32], strides = [1, 1]} : vector<8x128xf32> to vector<8x32xf32>
    %147 = arith.mulf %144, %123 : vector<8x32xf32>
    %148 = arith.mulf %143, %146 : vector<8x32xf32>
    %149 = arith.addf %147, %148 : vector<8x32xf32>
    %150 = math.tanh %149 : vector<8x32xf32>
    %151 = arith.mulf %145, %150 : vector<8x32xf32>
    %152 = arith.index_cast %129 : i32 to index
    %c0_96 = arith.constant 0 : index
    %153 = vector.load %arg38[%152, %c0_96] : memref<64x32xf32, #tpu.memory_space<vmem>>, vector<8x32xf32>
    tpu.vector_store %arg38[%152, %c0_96], %151 {strides = array<i32>} : memref<64x32xf32, #tpu.memory_space<vmem>>, vector<8x32xf32>,
    %c3_i32 = arith.constant 3 : i32
    %c8_i32_97 = arith.constant 8 : i32
    %154 = arith.muli %c3_i32, %c8_i32_97 : i32
    %155 = tpu.assume_multiple %154, 8 : i32
    %156 = arith.index_cast %155 : i32 to index
    %c0_98 = arith.constant 0 : index
    %157 = vector.load %arg37[%156, %c0_98] : memref<64x128xf32, #tpu.memory_space<vmem>>, vector<8x128xf32>
    %158 = arith.truncf %151 : vector<8x32xf32> to vector<8x32xbf16>
    %cst_99 = arith.constant dense<0.000000e+00> : vector<8x128xf32>
    %159 = tpu.matmul %158, %71, %cst_99 {dimension_numbers = #tpu.dot_dimension_numbers<[1], [0], [0], [1], [0, 0, 1, 1], [], []>} : vector<8x32xbf16>, vector<32x128xbf16>, vector<8x128xf32> -> vector<8x128xf32>
    %160 = arith.addf %157, %159 : vector<8x128xf32>
    %cst_100 = arith.constant 5.000000e-01 : f32
    %161 = vector.broadcast %cst_100 : f32 to vector<8x128xf32>
    %162 = arith.mulf %161, %160 : vector<8x128xf32>
    %163 = math.tanh %162 : vector<8x128xf32>
    %cst_101 = arith.constant 5.000000e-01 : f32
    %164 = vector.broadcast %cst_101 : f32 to vector<8x128xf32>
    %165 = arith.mulf %164, %163 : vector<8x128xf32>
    %cst_102 = arith.constant 5.000000e-01 : f32
    %166 = vector.broadcast %cst_102 : f32 to vector<8x128xf32>
    %167 = arith.addf %165, %166 : vector<8x128xf32>
    %168 = math.tanh %160 : vector<8x128xf32>
    %169 = vector.extract_strided_slice %167 {offsets = [0, 0], sizes = [8, 32], strides = [1, 1]} : vector<8x128xf32> to vector<8x32xf32>
    %170 = vector.extract_strided_slice %167 {offsets = [0, 32], sizes = [8, 32], strides = [1, 1]} : vector<8x128xf32> to vector<8x32xf32>
    %171 = vector.extract_strided_slice %167 {offsets = [0, 96], sizes = [8, 32], strides = [1, 1]} : vector<8x128xf32> to vector<8x32xf32>
    %172 = vector.extract_strided_slice %168 {offsets = [0, 64], sizes = [8, 32], strides = [1, 1]} : vector<8x128xf32> to vector<8x32xf32>
    %173 = arith.mulf %170, %149 : vector<8x32xf32>
    %174 = arith.mulf %169, %172 : vector<8x32xf32>
    %175 = arith.addf %173, %174 : vector<8x32xf32>
    %176 = math.tanh %175 : vector<8x32xf32>
    %177 = arith.mulf %171, %176 : vector<8x32xf32>
    %178 = arith.index_cast %155 : i32 to index
    %c0_103 = arith.constant 0 : index
    %179 = vector.load %arg38[%178, %c0_103] : memref<64x32xf32, #tpu.memory_space<vmem>>, vector<8x32xf32>
    tpu.vector_store %arg38[%178, %c0_103], %177 {strides = array<i32>} : memref<64x32xf32, #tpu.memory_space<vmem>>, vector<8x32xf32>,
    %c4_i32 = arith.constant 4 : i32
    %c8_i32_104 = arith.constant 8 : i32
    %180 = arith.muli %c4_i32, %c8_i32_104 : i32
    %181 = tpu.assume_multiple %180, 8 : i32
    %182 = arith.index_cast %181 : i32 to index
    %c0_105 = arith.constant 0 : index
    %183 = vector.load %arg37[%182, %c0_105] : memref<64x128xf32, #tpu.memory_space<vmem>>, vector<8x128xf32>
    %184 = arith.truncf %177 : vector<8x32xf32> to vector<8x32xbf16>
    %cst_106 = arith.constant dense<0.000000e+00> : vector<8x128xf32>
    %185 = tpu.matmul %184, %71, %cst_106 {dimension_numbers = #tpu.dot_dimension_numbers<[1], [0], [0], [1], [0, 0, 1, 1], [], []>} : vector<8x32xbf16>, vector<32x128xbf16>, vector<8x128xf32> -> vector<8x128xf32>
    %186 = arith.addf %183, %185 : vector<8x128xf32>
    %cst_107 = arith.constant 5.000000e-01 : f32
    %187 = vector.broadcast %cst_107 : f32 to vector<8x128xf32>
    %188 = arith.mulf %187, %186 : vector<8x128xf32>
    %189 = math.tanh %188 : vector<8x128xf32>
    %cst_108 = arith.constant 5.000000e-01 : f32
    %190 = vector.broadcast %cst_108 : f32 to vector<8x128xf32>
    %191 = arith.mulf %190, %189 : vector<8x128xf32>
    %cst_109 = arith.constant 5.000000e-01 : f32
    %192 = vector.broadcast %cst_109 : f32 to vector<8x128xf32>
    %193 = arith.addf %191, %192 : vector<8x128xf32>
    %194 = math.tanh %186 : vector<8x128xf32>
    %195 = vector.extract_strided_slice %193 {offsets = [0, 0], sizes = [8, 32], strides = [1, 1]} : vector<8x128xf32> to vector<8x32xf32>
    %196 = vector.extract_strided_slice %193 {offsets = [0, 32], sizes = [8, 32], strides = [1, 1]} : vector<8x128xf32> to vector<8x32xf32>
    %197 = vector.extract_strided_slice %193 {offsets = [0, 96], sizes = [8, 32], strides = [1, 1]} : vector<8x128xf32> to vector<8x32xf32>
    %198 = vector.extract_strided_slice %194 {offsets = [0, 64], sizes = [8, 32], strides = [1, 1]} : vector<8x128xf32> to vector<8x32xf32>
    %199 = arith.mulf %196, %175 : vector<8x32xf32>
    %200 = arith.mulf %195, %198 : vector<8x32xf32>
    %201 = arith.addf %199, %200 : vector<8x32xf32>
    %202 = math.tanh %201 : vector<8x32xf32>
    %203 = arith.mulf %197, %202 : vector<8x32xf32>
    %204 = arith.index_cast %181 : i32 to index
    %c0_110 = arith.constant 0 : index
    %205 = vector.load %arg38[%204, %c0_110] : memref<64x32xf32, #tpu.memory_space<vmem>>, vector<8x32xf32>
    tpu.vector_store %arg38[%204, %c0_110], %203 {strides = array<i32>} : memref<64x32xf32, #tpu.memory_space<vmem>>, vector<8x32xf32>,
    %c5_i32 = arith.constant 5 : i32
    %c8_i32_111 = arith.constant 8 : i32
    %206 = arith.muli %c5_i32, %c8_i32_111 : i32
    %207 = tpu.assume_multiple %206, 8 : i32
    %208 = arith.index_cast %207 : i32 to index
    %c0_112 = arith.constant 0 : index
    %209 = vector.load %arg37[%208, %c0_112] : memref<64x128xf32, #tpu.memory_space<vmem>>, vector<8x128xf32>
    %210 = arith.truncf %203 : vector<8x32xf32> to vector<8x32xbf16>
    %cst_113 = arith.constant dense<0.000000e+00> : vector<8x128xf32>
    %211 = tpu.matmul %210, %71, %cst_113 {dimension_numbers = #tpu.dot_dimension_numbers<[1], [0], [0], [1], [0, 0, 1, 1], [], []>} : vector<8x32xbf16>, vector<32x128xbf16>, vector<8x128xf32> -> vector<8x128xf32>
    %212 = arith.addf %209, %211 : vector<8x128xf32>
    %cst_114 = arith.constant 5.000000e-01 : f32
    %213 = vector.broadcast %cst_114 : f32 to vector<8x128xf32>
    %214 = arith.mulf %213, %212 : vector<8x128xf32>
    %215 = math.tanh %214 : vector<8x128xf32>
    %cst_115 = arith.constant 5.000000e-01 : f32
    %216 = vector.broadcast %cst_115 : f32 to vector<8x128xf32>
    %217 = arith.mulf %216, %215 : vector<8x128xf32>
    %cst_116 = arith.constant 5.000000e-01 : f32
    %218 = vector.broadcast %cst_116 : f32 to vector<8x128xf32>
    %219 = arith.addf %217, %218 : vector<8x128xf32>
    %220 = math.tanh %212 : vector<8x128xf32>
    %221 = vector.extract_strided_slice %219 {offsets = [0, 0], sizes = [8, 32], strides = [1, 1]} : vector<8x128xf32> to vector<8x32xf32>
    %222 = vector.extract_strided_slice %219 {offsets = [0, 32], sizes = [8, 32], strides = [1, 1]} : vector<8x128xf32> to vector<8x32xf32>
    %223 = vector.extract_strided_slice %219 {offsets = [0, 96], sizes = [8, 32], strides = [1, 1]} : vector<8x128xf32> to vector<8x32xf32>
    %224 = vector.extract_strided_slice %220 {offsets = [0, 64], sizes = [8, 32], strides = [1, 1]} : vector<8x128xf32> to vector<8x32xf32>
    %225 = arith.mulf %222, %201 : vector<8x32xf32>
    %226 = arith.mulf %221, %224 : vector<8x32xf32>
    %227 = arith.addf %225, %226 : vector<8x32xf32>
    %228 = math.tanh %227 : vector<8x32xf32>
    %229 = arith.mulf %223, %228 : vector<8x32xf32>
    %230 = arith.index_cast %207 : i32 to index
    %c0_117 = arith.constant 0 : index
    %231 = vector.load %arg38[%230, %c0_117] : memref<64x32xf32, #tpu.memory_space<vmem>>, vector<8x32xf32>
    tpu.vector_store %arg38[%230, %c0_117], %229 {strides = array<i32>} : memref<64x32xf32, #tpu.memory_space<vmem>>, vector<8x32xf32>,
    %c6_i32 = arith.constant 6 : i32
    %c8_i32_118 = arith.constant 8 : i32
    %232 = arith.muli %c6_i32, %c8_i32_118 : i32
    %233 = tpu.assume_multiple %232, 8 : i32
    %234 = arith.index_cast %233 : i32 to index
    %c0_119 = arith.constant 0 : index
    %235 = vector.load %arg37[%234, %c0_119] : memref<64x128xf32, #tpu.memory_space<vmem>>, vector<8x128xf32>
    %236 = arith.truncf %229 : vector<8x32xf32> to vector<8x32xbf16>
    %cst_120 = arith.constant dense<0.000000e+00> : vector<8x128xf32>
    %237 = tpu.matmul %236, %71, %cst_120 {dimension_numbers = #tpu.dot_dimension_numbers<[1], [0], [0], [1], [0, 0, 1, 1], [], []>} : vector<8x32xbf16>, vector<32x128xbf16>, vector<8x128xf32> -> vector<8x128xf32>
    %238 = arith.addf %235, %237 : vector<8x128xf32>
    %cst_121 = arith.constant 5.000000e-01 : f32
    %239 = vector.broadcast %cst_121 : f32 to vector<8x128xf32>
    %240 = arith.mulf %239, %238 : vector<8x128xf32>
    %241 = math.tanh %240 : vector<8x128xf32>
    %cst_122 = arith.constant 5.000000e-01 : f32
    %242 = vector.broadcast %cst_122 : f32 to vector<8x128xf32>
    %243 = arith.mulf %242, %241 : vector<8x128xf32>
    %cst_123 = arith.constant 5.000000e-01 : f32
    %244 = vector.broadcast %cst_123 : f32 to vector<8x128xf32>
    %245 = arith.addf %243, %244 : vector<8x128xf32>
    %246 = math.tanh %238 : vector<8x128xf32>
    %247 = vector.extract_strided_slice %245 {offsets = [0, 0], sizes = [8, 32], strides = [1, 1]} : vector<8x128xf32> to vector<8x32xf32>
    %248 = vector.extract_strided_slice %245 {offsets = [0, 32], sizes = [8, 32], strides = [1, 1]} : vector<8x128xf32> to vector<8x32xf32>
    %249 = vector.extract_strided_slice %245 {offsets = [0, 96], sizes = [8, 32], strides = [1, 1]} : vector<8x128xf32> to vector<8x32xf32>
    %250 = vector.extract_strided_slice %246 {offsets = [0, 64], sizes = [8, 32], strides = [1, 1]} : vector<8x128xf32> to vector<8x32xf32>
    %251 = arith.mulf %248, %227 : vector<8x32xf32>
    %252 = arith.mulf %247, %250 : vector<8x32xf32>
    %253 = arith.addf %251, %252 : vector<8x32xf32>
    %254 = math.tanh %253 : vector<8x32xf32>
    %255 = arith.mulf %249, %254 : vector<8x32xf32>
    %256 = arith.index_cast %233 : i32 to index
    %c0_124 = arith.constant 0 : index
    %257 = vector.load %arg38[%256, %c0_124] : memref<64x32xf32, #tpu.memory_space<vmem>>, vector<8x32xf32>
    tpu.vector_store %arg38[%256, %c0_124], %255 {strides = array<i32>} : memref<64x32xf32, #tpu.memory_space<vmem>>, vector<8x32xf32>,
    %c7_i32 = arith.constant 7 : i32
    %c8_i32_125 = arith.constant 8 : i32
    %258 = arith.muli %c7_i32, %c8_i32_125 : i32
    %259 = tpu.assume_multiple %258, 8 : i32
    %260 = arith.index_cast %259 : i32 to index
    %c0_126 = arith.constant 0 : index
    %261 = vector.load %arg37[%260, %c0_126] : memref<64x128xf32, #tpu.memory_space<vmem>>, vector<8x128xf32>
    %262 = arith.truncf %255 : vector<8x32xf32> to vector<8x32xbf16>
    %cst_127 = arith.constant dense<0.000000e+00> : vector<8x128xf32>
    %263 = tpu.matmul %262, %71, %cst_127 {dimension_numbers = #tpu.dot_dimension_numbers<[1], [0], [0], [1], [0, 0, 1, 1], [], []>} : vector<8x32xbf16>, vector<32x128xbf16>, vector<8x128xf32> -> vector<8x128xf32>
    %264 = arith.addf %261, %263 : vector<8x128xf32>
    %cst_128 = arith.constant 5.000000e-01 : f32
    %265 = vector.broadcast %cst_128 : f32 to vector<8x128xf32>
    %266 = arith.mulf %265, %264 : vector<8x128xf32>
    %267 = math.tanh %266 : vector<8x128xf32>
    %cst_129 = arith.constant 5.000000e-01 : f32
    %268 = vector.broadcast %cst_129 : f32 to vector<8x128xf32>
    %269 = arith.mulf %268, %267 : vector<8x128xf32>
    %cst_130 = arith.constant 5.000000e-01 : f32
    %270 = vector.broadcast %cst_130 : f32 to vector<8x128xf32>
    %271 = arith.addf %269, %270 : vector<8x128xf32>
    %272 = math.tanh %264 : vector<8x128xf32>
    %273 = vector.extract_strided_slice %271 {offsets = [0, 0], sizes = [8, 32], strides = [1, 1]} : vector<8x128xf32> to vector<8x32xf32>
    %274 = vector.extract_strided_slice %271 {offsets = [0, 32], sizes = [8, 32], strides = [1, 1]} : vector<8x128xf32> to vector<8x32xf32>
    %275 = vector.extract_strided_slice %271 {offsets = [0, 96], sizes = [8, 32], strides = [1, 1]} : vector<8x128xf32> to vector<8x32xf32>
    %276 = vector.extract_strided_slice %272 {offsets = [0, 64], sizes = [8, 32], strides = [1, 1]} : vector<8x128xf32> to vector<8x32xf32>
    %277 = arith.mulf %274, %253 : vector<8x32xf32>
    %278 = arith.mulf %273, %276 : vector<8x32xf32>
    %279 = arith.addf %277, %278 : vector<8x32xf32>
    %280 = math.tanh %279 : vector<8x32xf32>
    %281 = arith.mulf %275, %280 : vector<8x32xf32>
    %282 = arith.index_cast %259 : i32 to index
    %c0_131 = arith.constant 0 : index
    %283 = vector.load %arg38[%282, %c0_131] : memref<64x32xf32, #tpu.memory_space<vmem>>, vector<8x32xf32>
    tpu.vector_store %arg38[%282, %c0_131], %281 {strides = array<i32>} : memref<64x32xf32, #tpu.memory_space<vmem>>, vector<8x32xf32>,
    %c8_i32_132 = arith.constant 8 : i32
    %c0_133 = arith.constant 0 : index
    %c0_134 = arith.constant 0 : index
    %c0_135 = arith.constant 0 : index
    %284 = vector.load %arg33[%c0_133, %c0_134, %c0_135] : memref<2x8x32xf32, #tpu.memory_space<vmem>>, vector<1x8x32xf32>
    %285 = vector.shape_cast %284 : vector<1x8x32xf32> to vector<8x32xf32>
    %286 = vector.shape_cast %281 : vector<8x32xf32> to vector<1x8x32xf32>
    tpu.vector_store %arg33[%c0_133, %c0_134, %c0_135], %286 {strides = array<i32>} : memref<2x8x32xf32, #tpu.memory_space<vmem>>, vector<1x8x32xf32>,
    %c0_136 = arith.constant 0 : index
    %c0_137 = arith.constant 0 : index
    %c0_138 = arith.constant 0 : index
    %287 = vector.load %arg34[%c0_136, %c0_137, %c0_138] : memref<2x8x32xf32, #tpu.memory_space<vmem>>, vector<1x8x32xf32>
    %288 = vector.shape_cast %287 : vector<1x8x32xf32> to vector<8x32xf32>
    %289 = vector.shape_cast %279 : vector<8x32xf32> to vector<1x8x32xf32>
    tpu.vector_store %arg34[%c0_136, %c0_137, %c0_138], %289 {strides = array<i32>} : memref<2x8x32xf32, #tpu.memory_space<vmem>>, vector<1x8x32xf32>,
    %c0_139 = arith.constant 0 : index
    %c0_140 = arith.constant 0 : index
    %290 = vector.load %arg38[%c0_139, %c0_140] : memref<64x32xf32, #tpu.memory_space<vmem>>, vector<64x32xf32>
    %291 = arith.truncf %290 : vector<64x32xf32> to vector<64x32xbf16>
    %c0_141 = arith.constant 0 : index
    %c0_142 = arith.constant 0 : index
    %292 = vector.load %arg9[%c0_141, %c0_142] : memref<32x128xbf16, #tpu.memory_space<vmem>>, vector<32x128xbf16>
    %cst_143 = arith.constant dense<0.000000e+00> : vector<64x128xf32>
    %293 = tpu.matmul %291, %292, %cst_143 {dimension_numbers = #tpu.dot_dimension_numbers<[1], [0], [0], [1], [0, 0, 1, 1], [], []>} : vector<64x32xbf16>, vector<32x128xbf16>, vector<64x128xf32> -> vector<64x128xf32>
    %c0_144 = arith.constant 0 : index
    %c0_145 = arith.constant 0 : index
    %294 = vector.load %arg11[%c0_144, %c0_145] : memref<1x128xf32, #tpu.memory_space<vmem>>, vector<1x128xf32>
    %295 = vector.broadcast %294 : vector<1x128xf32> to vector<64x128xf32>
    %296 = arith.addf %293, %295 : vector<64x128xf32>
    %c0_146 = arith.constant 0 : index
    %c0_147 = arith.constant 0 : index
    %297 = vector.load %arg37[%c0_146, %c0_147] : memref<64x128xf32, #tpu.memory_space<vmem>>, vector<64x128xf32>
    tpu.vector_store %arg37[%c0_146, %c0_147], %296 {strides = array<i32>} : memref<64x128xf32, #tpu.memory_space<vmem>>, vector<64x128xf32>,
    %c0_148 = arith.constant 0 : index
    %c0_149 = arith.constant 0 : index
    %298 = vector.load %arg10[%c0_148, %c0_149] : memref<32x128xbf16, #tpu.memory_space<vmem>>, vector<32x128xbf16>
    %c1_150 = arith.constant 1 : index
    %c0_151 = arith.constant 0 : index
    %c0_152 = arith.constant 0 : index
    %299 = vector.load %arg12[%c1_150, %c0_151, %c0_152] : memref<2x8x32xf32, #tpu.memory_space<vmem>>, vector<1x8x32xf32>
    %300 = vector.shape_cast %299 : vector<1x8x32xf32> to vector<8x32xf32>
    %c1_153 = arith.constant 1 : index
    %c0_154 = arith.constant 0 : index
    %c0_155 = arith.constant 0 : index
    %301 = vector.load %arg13[%c1_153, %c0_154, %c0_155] : memref<2x8x32xf32, #tpu.memory_space<vmem>>, vector<1x8x32xf32>
    %302 = vector.shape_cast %301 : vector<1x8x32xf32> to vector<8x32xf32>
    %c0_i32_156 = arith.constant 0 : i32
    %c8_i32_157 = arith.constant 8 : i32
    %303 = arith.muli %c0_i32_156, %c8_i32_157 : i32
    %304 = tpu.assume_multiple %303, 8 : i32
    %305 = arith.index_cast %304 : i32 to index
    %c0_158 = arith.constant 0 : index
    %306 = vector.load %arg37[%305, %c0_158] : memref<64x128xf32, #tpu.memory_space<vmem>>, vector<8x128xf32>
    %307 = arith.truncf %300 : vector<8x32xf32> to vector<8x32xbf16>
    %cst_159 = arith.constant dense<0.000000e+00> : vector<8x128xf32>
    %308 = tpu.matmul %307, %298, %cst_159 {dimension_numbers = #tpu.dot_dimension_numbers<[1], [0], [0], [1], [0, 0, 1, 1], [], []>} : vector<8x32xbf16>, vector<32x128xbf16>, vector<8x128xf32> -> vector<8x128xf32>
    %309 = arith.addf %306, %308 : vector<8x128xf32>
    %cst_160 = arith.constant 5.000000e-01 : f32
    %310 = vector.broadcast %cst_160 : f32 to vector<8x128xf32>
    %311 = arith.mulf %310, %309 : vector<8x128xf32>
    %312 = math.tanh %311 : vector<8x128xf32>
    %cst_161 = arith.constant 5.000000e-01 : f32
    %313 = vector.broadcast %cst_161 : f32 to vector<8x128xf32>
    %314 = arith.mulf %313, %312 : vector<8x128xf32>
    %cst_162 = arith.constant 5.000000e-01 : f32
    %315 = vector.broadcast %cst_162 : f32 to vector<8x128xf32>
    %316 = arith.addf %314, %315 : vector<8x128xf32>
    %317 = math.tanh %309 : vector<8x128xf32>
    %318 = vector.extract_strided_slice %316 {offsets = [0, 0], sizes = [8, 32], strides = [1, 1]} : vector<8x128xf32> to vector<8x32xf32>
    %319 = vector.extract_strided_slice %316 {offsets = [0, 32], sizes = [8, 32], strides = [1, 1]} : vector<8x128xf32> to vector<8x32xf32>
    %320 = vector.extract_strided_slice %316 {offsets = [0, 96], sizes = [8, 32], strides = [1, 1]} : vector<8x128xf32> to vector<8x32xf32>
    %321 = vector.extract_strided_slice %317 {offsets = [0, 64], sizes = [8, 32], strides = [1, 1]} : vector<8x128xf32> to vector<8x32xf32>
    %322 = arith.mulf %319, %302 : vector<8x32xf32>
    %323 = arith.mulf %318, %321 : vector<8x32xf32>
    %324 = arith.addf %322, %323 : vector<8x32xf32>
    %325 = math.tanh %324 : vector<8x32xf32>
    %326 = arith.mulf %320, %325 : vector<8x32xf32>
    %c1_i32_163 = arith.constant 1 : i32
    %c8_i32_164 = arith.constant 8 : i32
    %327 = arith.muli %c1_i32_163, %c8_i32_164 : i32
    %328 = tpu.assume_multiple %327, 8 : i32
    %329 = arith.index_cast %328 : i32 to index
    %c0_165 = arith.constant 0 : index
    %330 = vector.load %arg37[%329, %c0_165] : memref<64x128xf32, #tpu.memory_space<vmem>>, vector<8x128xf32>
    %331 = arith.truncf %326 : vector<8x32xf32> to vector<8x32xbf16>
    %cst_166 = arith.constant dense<0.000000e+00> : vector<8x128xf32>
    %332 = tpu.matmul %331, %298, %cst_166 {dimension_numbers = #tpu.dot_dimension_numbers<[1], [0], [0], [1], [0, 0, 1, 1], [], []>} : vector<8x32xbf16>, vector<32x128xbf16>, vector<8x128xf32> -> vector<8x128xf32>
    %333 = arith.addf %330, %332 : vector<8x128xf32>
    %cst_167 = arith.constant 5.000000e-01 : f32
    %334 = vector.broadcast %cst_167 : f32 to vector<8x128xf32>
    %335 = arith.mulf %334, %333 : vector<8x128xf32>
    %336 = math.tanh %335 : vector<8x128xf32>
    %cst_168 = arith.constant 5.000000e-01 : f32
    %337 = vector.broadcast %cst_168 : f32 to vector<8x128xf32>
    %338 = arith.mulf %337, %336 : vector<8x128xf32>
    %cst_169 = arith.constant 5.000000e-01 : f32
    %339 = vector.broadcast %cst_169 : f32 to vector<8x128xf32>
    %340 = arith.addf %338, %339 : vector<8x128xf32>
    %341 = math.tanh %333 : vector<8x128xf32>
    %342 = vector.extract_strided_slice %340 {offsets = [0, 0], sizes = [8, 32], strides = [1, 1]} : vector<8x128xf32> to vector<8x32xf32>
    %343 = vector.extract_strided_slice %340 {offsets = [0, 32], sizes = [8, 32], strides = [1, 1]} : vector<8x128xf32> to vector<8x32xf32>
    %344 = vector.extract_strided_slice %340 {offsets = [0, 96], sizes = [8, 32], strides = [1, 1]} : vector<8x128xf32> to vector<8x32xf32>
    %345 = vector.extract_strided_slice %341 {offsets = [0, 64], sizes = [8, 32], strides = [1, 1]} : vector<8x128xf32> to vector<8x32xf32>
    %346 = arith.mulf %343, %324 : vector<8x32xf32>
    %347 = arith.mulf %342, %345 : vector<8x32xf32>
    %348 = arith.addf %346, %347 : vector<8x32xf32>
    %349 = math.tanh %348 : vector<8x32xf32>
    %350 = arith.mulf %344, %349 : vector<8x32xf32>
    %c2_i32_170 = arith.constant 2 : i32
    %c8_i32_171 = arith.constant 8 : i32
    %351 = arith.muli %c2_i32_170, %c8_i32_171 : i32
    %352 = tpu.assume_multiple %351, 8 : i32
    %353 = arith.index_cast %352 : i32 to index
    %c0_172 = arith.constant 0 : index
    %354 = vector.load %arg37[%353, %c0_172] : memref<64x128xf32, #tpu.memory_space<vmem>>, vector<8x128xf32>
    %355 = arith.truncf %350 : vector<8x32xf32> to vector<8x32xbf16>
    %cst_173 = arith.constant dense<0.000000e+00> : vector<8x128xf32>
    %356 = tpu.matmul %355, %298, %cst_173 {dimension_numbers = #tpu.dot_dimension_numbers<[1], [0], [0], [1], [0, 0, 1, 1], [], []>} : vector<8x32xbf16>, vector<32x128xbf16>, vector<8x128xf32> -> vector<8x128xf32>
    %357 = arith.addf %354, %356 : vector<8x128xf32>
    %cst_174 = arith.constant 5.000000e-01 : f32
    %358 = vector.broadcast %cst_174 : f32 to vector<8x128xf32>
    %359 = arith.mulf %358, %357 : vector<8x128xf32>
    %360 = math.tanh %359 : vector<8x128xf32>
    %cst_175 = arith.constant 5.000000e-01 : f32
    %361 = vector.broadcast %cst_175 : f32 to vector<8x128xf32>
    %362 = arith.mulf %361, %360 : vector<8x128xf32>
    %cst_176 = arith.constant 5.000000e-01 : f32
    %363 = vector.broadcast %cst_176 : f32 to vector<8x128xf32>
    %364 = arith.addf %362, %363 : vector<8x128xf32>
    %365 = math.tanh %357 : vector<8x128xf32>
    %366 = vector.extract_strided_slice %364 {offsets = [0, 0], sizes = [8, 32], strides = [1, 1]} : vector<8x128xf32> to vector<8x32xf32>
    %367 = vector.extract_strided_slice %364 {offsets = [0, 32], sizes = [8, 32], strides = [1, 1]} : vector<8x128xf32> to vector<8x32xf32>
    %368 = vector.extract_strided_slice %364 {offsets = [0, 96], sizes = [8, 32], strides = [1, 1]} : vector<8x128xf32> to vector<8x32xf32>
    %369 = vector.extract_strided_slice %365 {offsets = [0, 64], sizes = [8, 32], strides = [1, 1]} : vector<8x128xf32> to vector<8x32xf32>
    %370 = arith.mulf %367, %348 : vector<8x32xf32>
    %371 = arith.mulf %366, %369 : vector<8x32xf32>
    %372 = arith.addf %370, %371 : vector<8x32xf32>
    %373 = math.tanh %372 : vector<8x32xf32>
    %374 = arith.mulf %368, %373 : vector<8x32xf32>
    %c3_i32_177 = arith.constant 3 : i32
    %c8_i32_178 = arith.constant 8 : i32
    %375 = arith.muli %c3_i32_177, %c8_i32_178 : i32
    %376 = tpu.assume_multiple %375, 8 : i32
    %377 = arith.index_cast %376 : i32 to index
    %c0_179 = arith.constant 0 : index
    %378 = vector.load %arg37[%377, %c0_179] : memref<64x128xf32, #tpu.memory_space<vmem>>, vector<8x128xf32>
    %379 = arith.truncf %374 : vector<8x32xf32> to vector<8x32xbf16>
    %cst_180 = arith.constant dense<0.000000e+00> : vector<8x128xf32>
    %380 = tpu.matmul %379, %298, %cst_180 {dimension_numbers = #tpu.dot_dimension_numbers<[1], [0], [0], [1], [0, 0, 1, 1], [], []>} : vector<8x32xbf16>, vector<32x128xbf16>, vector<8x128xf32> -> vector<8x128xf32>
    %381 = arith.addf %378, %380 : vector<8x128xf32>
    %cst_181 = arith.constant 5.000000e-01 : f32
    %382 = vector.broadcast %cst_181 : f32 to vector<8x128xf32>
    %383 = arith.mulf %382, %381 : vector<8x128xf32>
    %384 = math.tanh %383 : vector<8x128xf32>
    %cst_182 = arith.constant 5.000000e-01 : f32
    %385 = vector.broadcast %cst_182 : f32 to vector<8x128xf32>
    %386 = arith.mulf %385, %384 : vector<8x128xf32>
    %cst_183 = arith.constant 5.000000e-01 : f32
    %387 = vector.broadcast %cst_183 : f32 to vector<8x128xf32>
    %388 = arith.addf %386, %387 : vector<8x128xf32>
    %389 = math.tanh %381 : vector<8x128xf32>
    %390 = vector.extract_strided_slice %388 {offsets = [0, 0], sizes = [8, 32], strides = [1, 1]} : vector<8x128xf32> to vector<8x32xf32>
    %391 = vector.extract_strided_slice %388 {offsets = [0, 32], sizes = [8, 32], strides = [1, 1]} : vector<8x128xf32> to vector<8x32xf32>
    %392 = vector.extract_strided_slice %388 {offsets = [0, 96], sizes = [8, 32], strides = [1, 1]} : vector<8x128xf32> to vector<8x32xf32>
    %393 = vector.extract_strided_slice %389 {offsets = [0, 64], sizes = [8, 32], strides = [1, 1]} : vector<8x128xf32> to vector<8x32xf32>
    %394 = arith.mulf %391, %372 : vector<8x32xf32>
    %395 = arith.mulf %390, %393 : vector<8x32xf32>
    %396 = arith.addf %394, %395 : vector<8x32xf32>
    %397 = math.tanh %396 : vector<8x32xf32>
    %398 = arith.mulf %392, %397 : vector<8x32xf32>
    %c4_i32_184 = arith.constant 4 : i32
    %c8_i32_185 = arith.constant 8 : i32
    %399 = arith.muli %c4_i32_184, %c8_i32_185 : i32
    %400 = tpu.assume_multiple %399, 8 : i32
    %401 = arith.index_cast %400 : i32 to index
    %c0_186 = arith.constant 0 : index
    %402 = vector.load %arg37[%401, %c0_186] : memref<64x128xf32, #tpu.memory_space<vmem>>, vector<8x128xf32>
    %403 = arith.truncf %398 : vector<8x32xf32> to vector<8x32xbf16>
    %cst_187 = arith.constant dense<0.000000e+00> : vector<8x128xf32>
    %404 = tpu.matmul %403, %298, %cst_187 {dimension_numbers = #tpu.dot_dimension_numbers<[1], [0], [0], [1], [0, 0, 1, 1], [], []>} : vector<8x32xbf16>, vector<32x128xbf16>, vector<8x128xf32> -> vector<8x128xf32>
    %405 = arith.addf %402, %404 : vector<8x128xf32>
    %cst_188 = arith.constant 5.000000e-01 : f32
    %406 = vector.broadcast %cst_188 : f32 to vector<8x128xf32>
    %407 = arith.mulf %406, %405 : vector<8x128xf32>
    %408 = math.tanh %407 : vector<8x128xf32>
    %cst_189 = arith.constant 5.000000e-01 : f32
    %409 = vector.broadcast %cst_189 : f32 to vector<8x128xf32>
    %410 = arith.mulf %409, %408 : vector<8x128xf32>
    %cst_190 = arith.constant 5.000000e-01 : f32
    %411 = vector.broadcast %cst_190 : f32 to vector<8x128xf32>
    %412 = arith.addf %410, %411 : vector<8x128xf32>
    %413 = math.tanh %405 : vector<8x128xf32>
    %414 = vector.extract_strided_slice %412 {offsets = [0, 0], sizes = [8, 32], strides = [1, 1]} : vector<8x128xf32> to vector<8x32xf32>
    %415 = vector.extract_strided_slice %412 {offsets = [0, 32], sizes = [8, 32], strides = [1, 1]} : vector<8x128xf32> to vector<8x32xf32>
    %416 = vector.extract_strided_slice %412 {offsets = [0, 96], sizes = [8, 32], strides = [1, 1]} : vector<8x128xf32> to vector<8x32xf32>
    %417 = vector.extract_strided_slice %413 {offsets = [0, 64], sizes = [8, 32], strides = [1, 1]} : vector<8x128xf32> to vector<8x32xf32>
    %418 = arith.mulf %415, %396 : vector<8x32xf32>
    %419 = arith.mulf %414, %417 : vector<8x32xf32>
    %420 = arith.addf %418, %419 : vector<8x32xf32>
    %421 = math.tanh %420 : vector<8x32xf32>
    %422 = arith.mulf %416, %421 : vector<8x32xf32>
    %c5_i32_191 = arith.constant 5 : i32
    %c8_i32_192 = arith.constant 8 : i32
    %423 = arith.muli %c5_i32_191, %c8_i32_192 : i32
    %424 = tpu.assume_multiple %423, 8 : i32
    %425 = arith.index_cast %424 : i32 to index
    %c0_193 = arith.constant 0 : index
    %426 = vector.load %arg37[%425, %c0_193] : memref<64x128xf32, #tpu.memory_space<vmem>>, vector<8x128xf32>
    %427 = arith.truncf %422 : vector<8x32xf32> to vector<8x32xbf16>
    %cst_194 = arith.constant dense<0.000000e+00> : vector<8x128xf32>
    %428 = tpu.matmul %427, %298, %cst_194 {dimension_numbers = #tpu.dot_dimension_numbers<[1], [0], [0], [1], [0, 0, 1, 1], [], []>} : vector<8x32xbf16>, vector<32x128xbf16>, vector<8x128xf32> -> vector<8x128xf32>
    %429 = arith.addf %426, %428 : vector<8x128xf32>
    %cst_195 = arith.constant 5.000000e-01 : f32
    %430 = vector.broadcast %cst_195 : f32 to vector<8x128xf32>
    %431 = arith.mulf %430, %429 : vector<8x128xf32>
    %432 = math.tanh %431 : vector<8x128xf32>
    %cst_196 = arith.constant 5.000000e-01 : f32
    %433 = vector.broadcast %cst_196 : f32 to vector<8x128xf32>
    %434 = arith.mulf %433, %432 : vector<8x128xf32>
    %cst_197 = arith.constant 5.000000e-01 : f32
    %435 = vector.broadcast %cst_197 : f32 to vector<8x128xf32>
    %436 = arith.addf %434, %435 : vector<8x128xf32>
    %437 = math.tanh %429 : vector<8x128xf32>
    %438 = vector.extract_strided_slice %436 {offsets = [0, 0], sizes = [8, 32], strides = [1, 1]} : vector<8x128xf32> to vector<8x32xf32>
    %439 = vector.extract_strided_slice %436 {offsets = [0, 32], sizes = [8, 32], strides = [1, 1]} : vector<8x128xf32> to vector<8x32xf32>
    %440 = vector.extract_strided_slice %436 {offsets = [0, 96], sizes = [8, 32], strides = [1, 1]} : vector<8x128xf32> to vector<8x32xf32>
    %441 = vector.extract_strided_slice %437 {offsets = [0, 64], sizes = [8, 32], strides = [1, 1]} : vector<8x128xf32> to vector<8x32xf32>
    %442 = arith.mulf %439, %420 : vector<8x32xf32>
    %443 = arith.mulf %438, %441 : vector<8x32xf32>
    %444 = arith.addf %442, %443 : vector<8x32xf32>
    %445 = math.tanh %444 : vector<8x32xf32>
    %446 = arith.mulf %440, %445 : vector<8x32xf32>
    %c6_i32_198 = arith.constant 6 : i32
    %c8_i32_199 = arith.constant 8 : i32
    %447 = arith.muli %c6_i32_198, %c8_i32_199 : i32
    %448 = tpu.assume_multiple %447, 8 : i32
    %449 = arith.index_cast %448 : i32 to index
    %c0_200 = arith.constant 0 : index
    %450 = vector.load %arg37[%449, %c0_200] : memref<64x128xf32, #tpu.memory_space<vmem>>, vector<8x128xf32>
    %451 = arith.truncf %446 : vector<8x32xf32> to vector<8x32xbf16>
    %cst_201 = arith.constant dense<0.000000e+00> : vector<8x128xf32>
    %452 = tpu.matmul %451, %298, %cst_201 {dimension_numbers = #tpu.dot_dimension_numbers<[1], [0], [0], [1], [0, 0, 1, 1], [], []>} : vector<8x32xbf16>, vector<32x128xbf16>, vector<8x128xf32> -> vector<8x128xf32>
    %453 = arith.addf %450, %452 : vector<8x128xf32>
    %cst_202 = arith.constant 5.000000e-01 : f32
    %454 = vector.broadcast %cst_202 : f32 to vector<8x128xf32>
    %455 = arith.mulf %454, %453 : vector<8x128xf32>
    %456 = math.tanh %455 : vector<8x128xf32>
    %cst_203 = arith.constant 5.000000e-01 : f32
    %457 = vector.broadcast %cst_203 : f32 to vector<8x128xf32>
    %458 = arith.mulf %457, %456 : vector<8x128xf32>
    %cst_204 = arith.constant 5.000000e-01 : f32
    %459 = vector.broadcast %cst_204 : f32 to vector<8x128xf32>
    %460 = arith.addf %458, %459 : vector<8x128xf32>
    %461 = math.tanh %453 : vector<8x128xf32>
    %462 = vector.extract_strided_slice %460 {offsets = [0, 0], sizes = [8, 32], strides = [1, 1]} : vector<8x128xf32> to vector<8x32xf32>
    %463 = vector.extract_strided_slice %460 {offsets = [0, 32], sizes = [8, 32], strides = [1, 1]} : vector<8x128xf32> to vector<8x32xf32>
    %464 = vector.extract_strided_slice %460 {offsets = [0, 96], sizes = [8, 32], strides = [1, 1]} : vector<8x128xf32> to vector<8x32xf32>
    %465 = vector.extract_strided_slice %461 {offsets = [0, 64], sizes = [8, 32], strides = [1, 1]} : vector<8x128xf32> to vector<8x32xf32>
    %466 = arith.mulf %463, %444 : vector<8x32xf32>
    %467 = arith.mulf %462, %465 : vector<8x32xf32>
    %468 = arith.addf %466, %467 : vector<8x32xf32>
    %469 = math.tanh %468 : vector<8x32xf32>
    %470 = arith.mulf %464, %469 : vector<8x32xf32>
    %c7_i32_205 = arith.constant 7 : i32
    %c8_i32_206 = arith.constant 8 : i32
    %471 = arith.muli %c7_i32_205, %c8_i32_206 : i32
    %472 = tpu.assume_multiple %471, 8 : i32
    %473 = arith.index_cast %472 : i32 to index
    %c0_207 = arith.constant 0 : index
    %474 = vector.load %arg37[%473, %c0_207] : memref<64x128xf32, #tpu.memory_space<vmem>>, vector<8x128xf32>
    %475 = arith.truncf %470 : vector<8x32xf32> to vector<8x32xbf16>
    %cst_208 = arith.constant dense<0.000000e+00> : vector<8x128xf32>
    %476 = tpu.matmul %475, %298, %cst_208 {dimension_numbers = #tpu.dot_dimension_numbers<[1], [0], [0], [1], [0, 0, 1, 1], [], []>} : vector<8x32xbf16>, vector<32x128xbf16>, vector<8x128xf32> -> vector<8x128xf32>
    %477 = arith.addf %474, %476 : vector<8x128xf32>
    %cst_209 = arith.constant 5.000000e-01 : f32
    %478 = vector.broadcast %cst_209 : f32 to vector<8x128xf32>
    %479 = arith.mulf %478, %477 : vector<8x128xf32>
    %480 = math.tanh %479 : vector<8x128xf32>
    %cst_210 = arith.constant 5.000000e-01 : f32
    %481 = vector.broadcast %cst_210 : f32 to vector<8x128xf32>
    %482 = arith.mulf %481, %480 : vector<8x128xf32>
    %cst_211 = arith.constant 5.000000e-01 : f32
    %483 = vector.broadcast %cst_211 : f32 to vector<8x128xf32>
    %484 = arith.addf %482, %483 : vector<8x128xf32>
    %485 = math.tanh %477 : vector<8x128xf32>
    %486 = vector.extract_strided_slice %484 {offsets = [0, 0], sizes = [8, 32], strides = [1, 1]} : vector<8x128xf32> to vector<8x32xf32>
    %487 = vector.extract_strided_slice %484 {offsets = [0, 32], sizes = [8, 32], strides = [1, 1]} : vector<8x128xf32> to vector<8x32xf32>
    %488 = vector.extract_strided_slice %484 {offsets = [0, 96], sizes = [8, 32], strides = [1, 1]} : vector<8x128xf32> to vector<8x32xf32>
    %489 = vector.extract_strided_slice %485 {offsets = [0, 64], sizes = [8, 32], strides = [1, 1]} : vector<8x128xf32> to vector<8x32xf32>
    %490 = arith.mulf %487, %468 : vector<8x32xf32>
    %491 = arith.mulf %486, %489 : vector<8x32xf32>
    %492 = arith.addf %490, %491 : vector<8x32xf32>
    %493 = math.tanh %492 : vector<8x32xf32>
    %494 = arith.mulf %488, %493 : vector<8x32xf32>
    %c8_i32_212 = arith.constant 8 : i32
    %c1_213 = arith.constant 1 : index
    %c0_214 = arith.constant 0 : index
    %c0_215 = arith.constant 0 : index
    %495 = vector.load %arg33[%c1_213, %c0_214, %c0_215] : memref<2x8x32xf32, #tpu.memory_space<vmem>>, vector<1x8x32xf32>
    %496 = vector.shape_cast %495 : vector<1x8x32xf32> to vector<8x32xf32>
    %497 = vector.shape_cast %494 : vector<8x32xf32> to vector<1x8x32xf32>
    tpu.vector_store %arg33[%c1_213, %c0_214, %c0_215], %497 {strides = array<i32>} : memref<2x8x32xf32, #tpu.memory_space<vmem>>, vector<1x8x32xf32>,
    %c1_216 = arith.constant 1 : index
    %c0_217 = arith.constant 0 : index
    %c0_218 = arith.constant 0 : index
    %498 = vector.load %arg34[%c1_216, %c0_217, %c0_218] : memref<2x8x32xf32, #tpu.memory_space<vmem>>, vector<1x8x32xf32>
    %499 = vector.shape_cast %498 : vector<1x8x32xf32> to vector<8x32xf32>
    %500 = vector.shape_cast %492 : vector<8x32xf32> to vector<1x8x32xf32>
    tpu.vector_store %arg34[%c1_216, %c0_217, %c0_218], %500 {strides = array<i32>} : memref<2x8x32xf32, #tpu.memory_space<vmem>>, vector<1x8x32xf32>,
    %c0_219 = arith.constant 0 : index
    %c0_220 = arith.constant 0 : index
    %501 = vector.load %arg14[%c0_219, %c0_220] : memref<32x16xf32, #tpu.memory_space<vmem>>, vector<32x16xf32>
    %cst_221 = arith.constant dense<0.000000e+00> : vector<8x16xf32>
    %502 = tpu.matmul %494, %501, %cst_221 {dimension_numbers = #tpu.dot_dimension_numbers<[1], [0], [0], [1], [0, 0, 1, 1], [], []>} : vector<8x32xf32>, vector<32x16xf32>, vector<8x16xf32> -> vector<8x16xf32>
    %c0_222 = arith.constant 0 : index
    %c0_223 = arith.constant 0 : index
    %503 = vector.load %arg15[%c0_222, %c0_223] : memref<1x16xf32, #tpu.memory_space<vmem>>, vector<1x16xf32>
    %504 = vector.broadcast %503 : vector<1x16xf32> to vector<8x16xf32>
    %505 = arith.addf %502, %504 : vector<8x16xf32>
    %cst_224 = arith.constant dense<0.000000e+00> : vector<8xf32>
    %506 = vector.multi_reduction <add>, %505, %cst_224 [1] : vector<8x16xf32> to vector<8xf32>
    %507 = vector.shape_cast %506 : vector<8xf32> to vector<8x1xf32>
    %cst_225 = arith.constant 1.600000e+01 : f32
    %508 = vector.broadcast %cst_225 : f32 to vector<8x1xf32>
    %509 = arith.divf %507, %508 : vector<8x1xf32>
    %510 = vector.broadcast %509 : vector<8x1xf32> to vector<8x16xf32>
    %511 = arith.subf %505, %510 : vector<8x16xf32>
    %512 = arith.mulf %511, %511 : vector<8x16xf32>
    %cst_226 = arith.constant dense<0.000000e+00> : vector<8xf32>
    %513 = vector.multi_reduction <add>, %512, %cst_226 [1] : vector<8x16xf32> to vector<8xf32>
    %514 = vector.shape_cast %513 : vector<8xf32> to vector<8x1xf32>
    %cst_227 = arith.constant 1.600000e+01 : f32
    %515 = vector.broadcast %cst_227 : f32 to vector<8x1xf32>
    %516 = arith.divf %514, %515 : vector<8x1xf32>
    %517 = vector.broadcast %509 : vector<8x1xf32> to vector<8x16xf32>
    %518 = arith.subf %505, %517 : vector<8x16xf32>
    %cst_228 = arith.constant 9.99999974E-6 : f32
    %519 = vector.broadcast %cst_228 : f32 to vector<8x1xf32>
    %520 = arith.addf %516, %519 : vector<8x1xf32>
    %521 = math.rsqrt %520 : vector<8x1xf32>
    %522 = vector.broadcast %521 : vector<8x1xf32> to vector<8x16xf32>
    %523 = arith.mulf %518, %522 : vector<8x16xf32>
    %c0_229 = arith.constant 0 : index
    %c0_230 = arith.constant 0 : index
    %524 = vector.load %arg16[%c0_229, %c0_230] : memref<1x16xf32, #tpu.memory_space<vmem>>, vector<1x16xf32>
    %525 = vector.broadcast %524 : vector<1x16xf32> to vector<8x16xf32>
    %526 = arith.mulf %523, %525 : vector<8x16xf32>
    %c0_231 = arith.constant 0 : index
    %c0_232 = arith.constant 0 : index
    %527 = vector.load %arg17[%c0_231, %c0_232] : memref<1x16xf32, #tpu.memory_space<vmem>>, vector<1x16xf32>
    %528 = vector.broadcast %527 : vector<1x16xf32> to vector<8x16xf32>
    %529 = arith.addf %526, %528 : vector<8x16xf32>
    %cst_233 = arith.constant 0.000000e+00 : f32
    %530 = vector.broadcast %cst_233 : f32 to vector<8x16xf32>
    %531 = arith.cmpf ogt, %529, %530 : vector<8x16xf32>
    %cst_234 = arith.constant 0.00999999977 : f32
    %532 = vector.broadcast %cst_234 : f32 to vector<8x16xf32>
    %533 = arith.mulf %532, %529 : vector<8x16xf32>
    %534 = arith.select %531, %529, %533 : vector<8x16xi1>, vector<8x16xf32>
    %c0_235 = arith.constant 0 : index
    %c0_236 = arith.constant 0 : index
    %535 = vector.load %arg18[%c0_235, %c0_236] : memref<16x8xf32, #tpu.memory_space<vmem>>, vector<16x8xf32>
    %cst_237 = arith.constant dense<0.000000e+00> : vector<8x8xf32>
    %536 = tpu.matmul %534, %535, %cst_237 {dimension_numbers = #tpu.dot_dimension_numbers<[1], [0], [0], [1], [0, 0, 1, 1], [], []>} : vector<8x16xf32>, vector<16x8xf32>, vector<8x8xf32> -> vector<8x8xf32>
    %c0_238 = arith.constant 0 : index
    %c0_239 = arith.constant 0 : index
    %537 = vector.load %arg19[%c0_238, %c0_239] : memref<1x8xf32, #tpu.memory_space<vmem>>, vector<1x8xf32>
    %538 = vector.broadcast %537 : vector<1x8xf32> to vector<8x8xf32>
    %539 = arith.addf %536, %538 : vector<8x8xf32>
    %cst_240 = arith.constant dense<0.000000e+00> : vector<8xf32>
    %540 = vector.multi_reduction <add>, %539, %cst_240 [1] : vector<8x8xf32> to vector<8xf32>
    %541 = vector.shape_cast %540 : vector<8xf32> to vector<8x1xf32>
    %cst_241 = arith.constant 8.000000e+00 : f32
    %542 = vector.broadcast %cst_241 : f32 to vector<8x1xf32>
    %543 = arith.divf %541, %542 : vector<8x1xf32>
    %544 = vector.broadcast %543 : vector<8x1xf32> to vector<8x8xf32>
    %545 = arith.subf %539, %544 : vector<8x8xf32>
    %546 = arith.mulf %545, %545 : vector<8x8xf32>
    %cst_242 = arith.constant dense<0.000000e+00> : vector<8xf32>
    %547 = vector.multi_reduction <add>, %546, %cst_242 [1] : vector<8x8xf32> to vector<8xf32>
    %548 = vector.shape_cast %547 : vector<8xf32> to vector<8x1xf32>
    %cst_243 = arith.constant 8.000000e+00 : f32
    %549 = vector.broadcast %cst_243 : f32 to vector<8x1xf32>
    %550 = arith.divf %548, %549 : vector<8x1xf32>
    %551 = vector.broadcast %543 : vector<8x1xf32> to vector<8x8xf32>
    %552 = arith.subf %539, %551 : vector<8x8xf32>
    %cst_244 = arith.constant 9.99999974E-6 : f32
    %553 = vector.broadcast %cst_244 : f32 to vector<8x1xf32>
    %554 = arith.addf %550, %553 : vector<8x1xf32>
    %555 = math.rsqrt %554 : vector<8x1xf32>
    %556 = vector.broadcast %555 : vector<8x1xf32> to vector<8x8xf32>
    %557 = arith.mulf %552, %556 : vector<8x8xf32>
    %c0_245 = arith.constant 0 : index
    %c0_246 = arith.constant 0 : index
    %558 = vector.load %arg20[%c0_245, %c0_246] : memref<1x8xf32, #tpu.memory_space<vmem>>, vector<1x8xf32>
    %559 = vector.broadcast %558 : vector<1x8xf32> to vector<8x8xf32>
    %560 = arith.mulf %557, %559 : vector<8x8xf32>
    %c0_247 = arith.constant 0 : index
    %c0_248 = arith.constant 0 : index
    %561 = vector.load %arg21[%c0_247, %c0_248] : memref<1x8xf32, #tpu.memory_space<vmem>>, vector<1x8xf32>
    %562 = vector.broadcast %561 : vector<1x8xf32> to vector<8x8xf32>
    %563 = arith.addf %560, %562 : vector<8x8xf32>
    %cst_249 = arith.constant 0.000000e+00 : f32
    %564 = vector.broadcast %cst_249 : f32 to vector<8x8xf32>
    %565 = arith.cmpf ogt, %563, %564 : vector<8x8xf32>
    %cst_250 = arith.constant 0.00999999977 : f32
    %566 = vector.broadcast %cst_250 : f32 to vector<8x8xf32>
    %567 = arith.mulf %566, %563 : vector<8x8xf32>
    %568 = arith.select %565, %563, %567 : vector<8x8xi1>, vector<8x8xf32>
    %c0_251 = arith.constant 0 : index
    %c0_252 = arith.constant 0 : index
    %569 = vector.load %arg22[%c0_251, %c0_252] : memref<8x4xf32, #tpu.memory_space<vmem>>, vector<8x4xf32>
    %cst_253 = arith.constant dense<0.000000e+00> : vector<8x4xf32>
    %570 = tpu.matmul %568, %569, %cst_253 {dimension_numbers = #tpu.dot_dimension_numbers<[1], [0], [0], [1], [0, 0, 1, 1], [], []>} : vector<8x8xf32>, vector<8x4xf32>, vector<8x4xf32> -> vector<8x4xf32>
    %c0_254 = arith.constant 0 : index
    %c0_255 = arith.constant 0 : index
    %571 = vector.load %arg23[%c0_254, %c0_255] : memref<1x4xf32, #tpu.memory_space<vmem>>, vector<1x4xf32>
    %572 = vector.broadcast %571 : vector<1x4xf32> to vector<8x4xf32>
    %573 = arith.addf %570, %572 : vector<8x4xf32>
    %cst_256 = arith.constant dense<0.000000e+00> : vector<8xf32>
    %574 = vector.multi_reduction <add>, %573, %cst_256 [1] : vector<8x4xf32> to vector<8xf32>
    %575 = vector.shape_cast %574 : vector<8xf32> to vector<8x1xf32>
    %cst_257 = arith.constant 4.000000e+00 : f32
    %576 = vector.broadcast %cst_257 : f32 to vector<8x1xf32>
    %577 = arith.divf %575, %576 : vector<8x1xf32>
    %578 = vector.broadcast %577 : vector<8x1xf32> to vector<8x4xf32>
    %579 = arith.subf %573, %578 : vector<8x4xf32>
    %580 = arith.mulf %579, %579 : vector<8x4xf32>
    %cst_258 = arith.constant dense<0.000000e+00> : vector<8xf32>
    %581 = vector.multi_reduction <add>, %580, %cst_258 [1] : vector<8x4xf32> to vector<8xf32>
    %582 = vector.shape_cast %581 : vector<8xf32> to vector<8x1xf32>
    %cst_259 = arith.constant 4.000000e+00 : f32
    %583 = vector.broadcast %cst_259 : f32 to vector<8x1xf32>
    %584 = arith.divf %582, %583 : vector<8x1xf32>
    %585 = vector.broadcast %577 : vector<8x1xf32> to vector<8x4xf32>
    %586 = arith.subf %573, %585 : vector<8x4xf32>
    %cst_260 = arith.constant 9.99999974E-6 : f32
    %587 = vector.broadcast %cst_260 : f32 to vector<8x1xf32>
    %588 = arith.addf %584, %587 : vector<8x1xf32>
    %589 = math.rsqrt %588 : vector<8x1xf32>
    %590 = vector.broadcast %589 : vector<8x1xf32> to vector<8x4xf32>
    %591 = arith.mulf %586, %590 : vector<8x4xf32>
    %c0_261 = arith.constant 0 : index
    %c0_262 = arith.constant 0 : index
    %592 = vector.load %arg24[%c0_261, %c0_262] : memref<1x4xf32, #tpu.memory_space<vmem>>, vector<1x4xf32>
    %593 = vector.broadcast %592 : vector<1x4xf32> to vector<8x4xf32>
    %594 = arith.mulf %591, %593 : vector<8x4xf32>
    %c0_263 = arith.constant 0 : index
    %c0_264 = arith.constant 0 : index
    %595 = vector.load %arg25[%c0_263, %c0_264] : memref<1x4xf32, #tpu.memory_space<vmem>>, vector<1x4xf32>
    %596 = vector.broadcast %595 : vector<1x4xf32> to vector<8x4xf32>
    %597 = arith.addf %594, %596 : vector<8x4xf32>
    %cst_265 = arith.constant 0.000000e+00 : f32
    %598 = vector.broadcast %cst_265 : f32 to vector<8x4xf32>
    %599 = arith.cmpf ogt, %597, %598 : vector<8x4xf32>
    %cst_266 = arith.constant 0.00999999977 : f32
    %600 = vector.broadcast %cst_266 : f32 to vector<8x4xf32>
    %601 = arith.mulf %600, %597 : vector<8x4xf32>
    %602 = arith.select %599, %597, %601 : vector<8x4xi1>, vector<8x4xf32>
    %c0_267 = arith.constant 0 : index
    %c0_268 = arith.constant 0 : index
    %603 = vector.load %arg26[%c0_267, %c0_268] : memref<4x2xf32, #tpu.memory_space<vmem>>, vector<4x2xf32>
    %cst_269 = arith.constant dense<0.000000e+00> : vector<8x2xf32>
    %604 = tpu.matmul %602, %603, %cst_269 {dimension_numbers = #tpu.dot_dimension_numbers<[1], [0], [0], [1], [0, 0, 1, 1], [], []>} : vector<8x4xf32>, vector<4x2xf32>, vector<8x2xf32> -> vector<8x2xf32>
    %c0_270 = arith.constant 0 : index
    %c0_271 = arith.constant 0 : index
    %605 = vector.load %arg27[%c0_270, %c0_271] : memref<1x2xf32, #tpu.memory_space<vmem>>, vector<1x2xf32>
    %606 = vector.broadcast %605 : vector<1x2xf32> to vector<8x2xf32>
    %607 = arith.addf %604, %606 : vector<8x2xf32>
    %cst_272 = arith.constant dense<0.000000e+00> : vector<8xf32>
    %608 = vector.multi_reduction <add>, %607, %cst_272 [1] : vector<8x2xf32> to vector<8xf32>
    %609 = vector.shape_cast %608 : vector<8xf32> to vector<8x1xf32>
    %cst_273 = arith.constant 2.000000e+00 : f32
    %610 = vector.broadcast %cst_273 : f32 to vector<8x1xf32>
    %611 = arith.divf %609, %610 : vector<8x1xf32>
    %612 = vector.broadcast %611 : vector<8x1xf32> to vector<8x2xf32>
    %613 = arith.subf %607, %612 : vector<8x2xf32>
    %614 = arith.mulf %613, %613 : vector<8x2xf32>
    %cst_274 = arith.constant dense<0.000000e+00> : vector<8xf32>
    %615 = vector.multi_reduction <add>, %614, %cst_274 [1] : vector<8x2xf32> to vector<8xf32>
    %616 = vector.shape_cast %615 : vector<8xf32> to vector<8x1xf32>
    %cst_275 = arith.constant 2.000000e+00 : f32
    %617 = vector.broadcast %cst_275 : f32 to vector<8x1xf32>
    %618 = arith.divf %616, %617 : vector<8x1xf32>
    %619 = vector.broadcast %611 : vector<8x1xf32> to vector<8x2xf32>
    %620 = arith.subf %607, %619 : vector<8x2xf32>
    %cst_276 = arith.constant 9.99999974E-6 : f32
    %621 = vector.broadcast %cst_276 : f32 to vector<8x1xf32>
    %622 = arith.addf %618, %621 : vector<8x1xf32>
    %623 = math.rsqrt %622 : vector<8x1xf32>
    %624 = vector.broadcast %623 : vector<8x1xf32> to vector<8x2xf32>
    %625 = arith.mulf %620, %624 : vector<8x2xf32>
    %c0_277 = arith.constant 0 : index
    %c0_278 = arith.constant 0 : index
    %626 = vector.load %arg28[%c0_277, %c0_278] : memref<1x2xf32, #tpu.memory_space<vmem>>, vector<1x2xf32>
    %627 = vector.broadcast %626 : vector<1x2xf32> to vector<8x2xf32>
    %628 = arith.mulf %625, %627 : vector<8x2xf32>
    %c0_279 = arith.constant 0 : index
    %c0_280 = arith.constant 0 : index
    %629 = vector.load %arg29[%c0_279, %c0_280] : memref<1x2xf32, #tpu.memory_space<vmem>>, vector<1x2xf32>
    %630 = vector.broadcast %629 : vector<1x2xf32> to vector<8x2xf32>
    %631 = arith.addf %628, %630 : vector<8x2xf32>
    %cst_281 = arith.constant 0.000000e+00 : f32
    %632 = vector.broadcast %cst_281 : f32 to vector<8x2xf32>
    %633 = arith.cmpf ogt, %631, %632 : vector<8x2xf32>
    %cst_282 = arith.constant 0.00999999977 : f32
    %634 = vector.broadcast %cst_282 : f32 to vector<8x2xf32>
    %635 = arith.mulf %634, %631 : vector<8x2xf32>
    %636 = arith.select %633, %631, %635 : vector<8x2xi1>, vector<8x2xf32>
    %c0_283 = arith.constant 0 : index
    %c0_284 = arith.constant 0 : index
    %637 = vector.load %arg30[%c0_283, %c0_284] : memref<2x3xf32, #tpu.memory_space<vmem>>, vector<2x3xf32>
    %cst_285 = arith.constant dense<0.000000e+00> : vector<8x3xf32>
    %638 = tpu.matmul %636, %637, %cst_285 {dimension_numbers = #tpu.dot_dimension_numbers<[1], [0], [0], [1], [0, 0, 1, 1], [], []>} : vector<8x2xf32>, vector<2x3xf32>, vector<8x3xf32> -> vector<8x3xf32>
    %c0_286 = arith.constant 0 : index
    %c0_287 = arith.constant 0 : index
    %639 = vector.load %arg31[%c0_286, %c0_287] : memref<1x3xf32, #tpu.memory_space<vmem>>, vector<1x3xf32>
    %640 = vector.broadcast %639 : vector<1x3xf32> to vector<8x3xf32>
    %641 = arith.addf %638, %640 : vector<8x3xf32>
    %c0_288 = arith.constant 0 : index
    %c0_289 = arith.constant 0 : index
    %642 = vector.load %arg32[%c0_288, %c0_289] : memref<8x3xf32, #tpu.memory_space<vmem>>, vector<8x3xf32>
    tpu.vector_store %arg32[%c0_288, %c0_289], %641 {strides = array<i32>} : memref<8x3xf32, #tpu.memory_space<vmem>>, vector<8x3xf32>,
    return
  }
}

</mosaic_0001>

<bundles_post_ra>
// kernel: cnn_lstm_forward.1
= control target key start
LH: loop header
LB: loop body
LE: loop exit
PB: predicated region body
PF: predicated region fallthrough
CT: control target
= control target key end

     0   :  { %vm140_vm0 = vcmask 31744   ;;  %s4054_s3 = smov 1   ;;  %v4055_v0 = vmov 0.0   ;;  %vm195_vm1 = vcmask 1043456   ;;  %s4056_s10 = smov 3   ;;  %vm604_vm2 = vcmask 261120   ;;  %s4698_s0 = inlined_call_operand.smem [shape: u32[35], index: -1, kind: input, shape index: {}] }
   0x1   :  { %s4101_s6 = sld [smem:[%s4698_s0 + %s4054_s3]]   ;;  %141 = vst.msk [vmem:[#allocation2] sm:$0xff] %vm140_vm0, %v4055_v0  ;;  %142 = vst.msk [vmem:[#allocation2 + $0x48] sm:$0xff] %vm140_vm0, %v4055_v0  ;;  %s4057_s14 = smov 6   ;;  %vm1198_vm11 = vcmask 1041408   ;;  %vm4062_vm12 = vmmov 0   ;;  %vm1108_vm15 = vcmask 523264  }
   0x2   :  { %s1_s9 = sld [smem:[%s4698_s0]]   ;;  %605 = vst.msk [vmem:[#allocation3] sm:$0xff] %vm604_vm2, %v4055_v0  ;;  %606 = vst.msk [vmem:[#allocation3 + $0x48] sm:$0xff] %vm604_vm2, %v4055_v0  ;;  %s4058_s18 = smov 2  }
   0x3   :  { %s4178_s13 = sld [smem:[%s4698_s0 + %s4056_s10]]   ;;  %s4059_s22 = smov 7  }
   0x4   :  { %s4196_s17 = sld [smem:[%s4698_s0 + %s4057_s14]]   ;;  %s4060_s26 = smov 5  }
   0x5   :  { %s3222_s21 = sld [smem:[%s4698_s0 + %s4058_s18]]   ;;  %s4061_s30 = smov 12  }
   0x6   :  { %s3227_s25 = sld [smem:[%s4698_s0 + %s4059_s22]]   ;;  %s4063_s4 = smov 4  }
   0x7   :  { %v3255_v1 = vld [vmem:[%s4101_s6 + $0x4] sm:$0xf]  ;;  %v167_v3 = vld [vmem:[%s4101_s6] sm:$0xf]  ;;  %v3274_v14 = vld [vmem:[%s4101_s6 + $0x8] sm:$0xf]  ;;  %s3225_s29 = sld [smem:[%s4698_s0 + %s4060_s26]]  }
   0x8   :  { %v4111_v2 = vld [vmem:[%s1_s9] sm:$0xff]  ;;  %3526 = vmatprep.subr.msk.mxu0 %vm195_vm1, %v3255_v1  ;;  %v4117_v4 = vld [vmem:[%s1_s9 + $0x8] sm:$0xff]  ;;  %v4119_v5 = vld [vmem:[%s1_s9 + $0x10] sm:$0xff]  ;;  %s4256_s3 = sld [smem:[%s4698_s0 + %s4061_s30]]   ;;  %s4064_s8 = smov 8  }
   0x9   :  { %151 = vst.msk [vmem:[#allocation2 + $0x8] sm:$0xff] %vm140_vm0, %v4111_v2  ;;  %v4121_v6 = vld [vmem:[%s1_s9 + $0x18] sm:$0xff]  ;;  %3527 = vmatpush3.msk.msra.mxu0 %vm195_vm1, %v3255_v1  ;;  %152 = vst.msk [vmem:[#allocation2 + $0x10] sm:$0xff] %vm140_vm0, %v4117_v4  ;;  %v4130_v7 = vld [vmem:[%s1_s9 + $0x20] sm:$0xff]  ;;  %s3224_s7 = sld [smem:[%s4698_s0 + %s4063_s4]]   ;;  %s4065_s12 = smov 13  }
   0xa   :  { %153 = vst.msk [vmem:[#allocation2 + $0x18] sm:$0xff] %vm140_vm0, %v4119_v5  ;;  %154 = vst.msk [vmem:[#allocation2 + $0x20] sm:$0xff] %vm140_vm0, %v4121_v6  ;;  %v4132_v8 = vld [vmem:[%s1_s9 + $0x28] sm:$0xff]  ;;  %v4134_v9 = vld [vmem:[%s1_s9 + $0x30] sm:$0xff]  ;;  %3540 = vmatprep.subr.msk.mxu0 %vm195_vm1, %v167_v3  ;;  %s3228_s11 = sld [smem:[%s4698_s0 + %s4064_s8]]   ;;  %s4066_s16 = smov 64  }
   0xb   :  { %155 = vst.msk [vmem:[#allocation2 + $0x28] sm:$0xff] %vm140_vm0, %v4130_v7  ;;  %156 = vst.msk [vmem:[#allocation2 + $0x30] sm:$0xff] %vm140_vm0, %v4132_v8  ;;  %v4143_v10 = vld [vmem:[%s1_s9 + $0x38] sm:$0xff]  ;;  %v159_v20 = vld [vmem:[#allocation2] sm:$0xff]  ;;  %s4316_s15 = sld [smem:[%s4698_s0 + %s4065_s12]]   ;;  %s4068_s18 = smov 9  }
   0xc   :  { %157 = vst.msk [vmem:[#allocation2 + $0x38] sm:$0xff] %vm140_vm0, %v4134_v9  ;;  %158 = vst.msk [vmem:[#allocation2 + $0x40] sm:$0xff] %vm140_vm0, %v4143_v10  ;;  %v422_v21 = vld [vmem:[#allocation2 + $0x48] sm:$0xff]  ;;  %v3285_v22 = vld [vmem:[%s4178_s13 + $0x20] sm:$0xff]  ;;  %s4069_s22 = smov 10   ;;  %s4070_s26 = smov 11  }
   0xd   :  { %v3286_v23 = vld [vmem:[%s4178_s13 + $0x28] sm:$0xff]  ;;  %v3287_v25 = vld [vmem:[%s4178_s13 + $0x30] sm:$0xff]  ;;  %v3288_v26 = vld [vmem:[%s4178_s13 + $0x38] sm:$0xff]  ;;  %s4071_s30 = smov 33   ;;  %s4073_s4 = smov 14  }
   0xe   :  { %v3827_v24 = vpack.c.bf16 %v3286_v23, %v3285_v22  ;;  %v3831_v27 = vpack.c.bf16 %v3288_v26, %v3287_v25  ;;  %v623_v28 = vld [vmem:[%s4178_s13] sm:$0xff]  ;;  %v624_v29 = vld [vmem:[%s4178_s13 + $0x8] sm:$0xff]  ;;  %v625_v54 = vld [vmem:[%s4178_s13 + $0x10] sm:$0xff]  ;;  %s4074_s8 = smov 15   ;;  %s4075_s12 = smov 18  }
   0xf   :  { %v4190_v30 = vpack.c.bf16 %v624_v29, %v623_v28  ;;  %v3940_v31 = vld [vmem:[%s4196_s17] sm:$0xff]   ;;  %v626_v55 = vld [vmem:[%s4178_s13 + $0x18] sm:$0xff]  ;;  %v615_v23 = vld [vmem:[#allocation3] sm:$0xff] }
  0x10   :  { %v160_v11 = vld [vmem:[#allocation2 + $0x8] sm:$0xff]  ;;  %v161_v12 = vld [vmem:[#allocation2 + $0x10] sm:$0xff]  ;;  %3828 = vmatprep.subr.bf16.mxu1 %v3827_v24  ;;  %v3284_v32 = vld [vmem:[%s3222_s21] ss:$0 sm:$0xff]  ;;  %v3839_v1 = vpack.c.bf16 %v626_v55, %v625_v54  ;;  %s3229_s21 = sld [smem:[%s4698_s0 + %s4068_s18]]  }
  0x11   :  { %3528 = vmatprep.mubr.msk.f32.mxu0 %vm140_vm0, %v160_v11  ;;  %v162_v13 = vld [vmem:[#allocation2 + $0x18] sm:$0xff]  ;;  %v163_v15 = vld [vmem:[#allocation2 + $0x20] sm:$0xff]  ;;  %3830 = vmatpush3.bf16.msra.mxu1 %v3827_v24  ;;  %v3307_v25 = vld [vmem:[%s4178_s13 + $0x50] sm:$0xff] }
  0x12   :  { %3529 = vmatmul.mubr.msk.f32.vlgmr.msra.gmra.mrb[0].mxu0 %vm140_vm0, %v161_v12  ;;  %v164_v16 = vld [vmem:[#allocation2 + $0x28] sm:$0xff]  ;;  %v165_v17 = vld [vmem:[#allocation2 + $0x30] sm:$0xff]  ;;  %3832 = vmatprep.subr.bf16.mxu1 %v3831_v27  ;;  %v3308_v26 = vld [vmem:[%s4178_s13 + $0x58] sm:$0xff] }
  0x13   :  { %3541 = vmatpush3.msk.msra.mxu0 %vm195_vm1, %v167_v3  ;;  %3531 = vmatprep.mubr.msk.f32.mxu0 %vm140_vm0, %v162_v13  ;;  %v166_v18 = vld [vmem:[#allocation2 + $0x38] sm:$0xff]  ;;  %v168_v19 = vld [vmem:[#allocation2 + $0x40] sm:$0xff]  ;;  %v3941_v29 = vld [vmem:[%s4196_s17 + $0x8] sm:$0xff]  }
  0x14   :  { %3554 = vmatprep.subr.msk.mxu0 %vm195_vm1, %v3274_v14  ;;  %v877_v28 = vld [vmem:[#allocation3 + $0x48] sm:$0xff] }
  0x15   :  { %3834 = vmatpush3.bf16.msra.mxu1 %v3831_v27  ;;  %v3847_v27 = vpack.c.bf16 %v3308_v26, %v3307_v25 }
  0x16   :  { %3532 = vmatmul.mubr.msk.f32.gmra.mrb[2].mxu0 %vm140_vm0, %v163_v15  ;;  %3836 = vmatprep.subr.bf16.mxu1 %v4190_v30 }
  0x17   :  { %3534 = vmatprep.mubr.msk.f32.mxu0 %vm140_vm0, %v164_v16 }
  0x1a   :  { %3535 = vmatmul.mubr.msk.f32.gmra.mrb[4].mxu0 %vm140_vm0, %v165_v17 }
  0x1b   :  { %3537 = vmatprep.mubr.msk.f32.mxu0 %vm140_vm0, %v166_v18 }
  0x1e   :  { %3538 = vmatmul.mubr.msk.f32.gmra.mrb[6].mxu0 %vm140_vm0, %v168_v19 }
  0x1f   :  { %3542 = vmatprep.mubr.msk.f32.mxu0 %vm140_vm0, %v159_v20 }
  0x22   :  { %3543 = vmatmul.mubr.msk.f32.vlgmr.msra.gmra.mrb[0].mxu0 %vm140_vm0, %v160_v11 }
  0x23   :  { %3555 = vmatpush3.msk.msra.mxu0 %vm195_vm1, %v3274_v14  ;;  %3545 = vmatprep.mubr.msk.f32.mxu0 %vm140_vm0, %v161_v12 }
  0x24   :  { %3628 = vmatprep.subr.bf16.mxu0 %v3940_v31 }
  0x26   :  { %3546 = vmatmul.mubr.msk.f32.gmra.mrb[2].mxu0 %vm140_vm0, %v162_v13 }
  0x27   :  { %3548 = vmatprep.mubr.msk.f32.mxu0 %vm140_vm0, %v163_v15 }
  0x2a   :  { %3549 = vmatmul.mubr.msk.f32.gmra.mrb[4].mxu0 %vm140_vm0, %v164_v16 }
  0x2b   :  { %3551 = vmatprep.mubr.msk.f32.mxu0 %vm140_vm0, %v165_v17 }
  0x2e   :  { %3552 = vmatmul.mubr.msk.f32.gmra.mrb[6].mxu0 %vm140_vm0, %v166_v18 }
  0x2f   :  { %3556 = vmatprep.mubr.msk.f32.mxu0 %vm140_vm0, %v161_v12  ;;  %v3305_v12 = vld [vmem:[%s4178_s13 + $0x40] sm:$0xff] }
  0x32   :  { %3557 = vmatmul.mubr.msk.f32.vlgmr.msra.gmra.mrb[0].mxu0 %vm140_vm0, %v162_v13  ;;  %v3306_v13 = vld [vmem:[%s4178_s13 + $0x48] sm:$0xff] }
  0x33   :  { %3559 = vmatprep.mubr.msk.f32.mxu0 %vm140_vm0, %v163_v15  ;;  %3629 = vmatpush3.bf16.msra.mxu0 %v3940_v31  ;;  %v3943_v31 = vld [vmem:[%s4196_s17 + $0x18] sm:$0xff]  }
  0x34   :  { %3630 = vmatprep.subr.bf16.mxu0 %v3941_v29 }
  0x36   :  { %3560 = vmatmul.mubr.msk.f32.gmra.mrb[2].mxu0 %vm140_vm0, %v164_v16 }
  0x37   :  { %3562 = vmatprep.mubr.msk.f32.mxu0 %vm140_vm0, %v165_v17  ;;  %3631 = vmatpush3.bf16.msra.mxu0 %v3941_v29 }
  0x3a   :  { %3563 = vmatmul.mubr.msk.f32.gmra.mrb[4].mxu0 %vm140_vm0, %v166_v18  ;;  %v3843_v18 = vpack.c.bf16 %v3306_v13, %v3305_v12 }
  0x3b   :  { %3565 = vmatprep.mubr.msk.f32.mxu0 %vm140_vm0, %v168_v19 }
  0x3e   :  { %3566 = vmatmul.mubr.msk.f32.gmra.mrb[6].mxu0 %vm140_vm0, %v422_v21 }
 0x105   :  { %v3558_v33 = vpop.f32.mrb[0].mxu0 }
 0x106   :  { %v573_v34 = vadd.f32 %v3558_v33, %v3284_v32  ;;  %v518_v35 = vpop.f32.mrb[1].mxu0  ;;  %v4259_v33 = vld [vmem:[%s3227_s25 + $0x8] sm:$0xff]  }
 0x107   :  { %v572_v36 = vadd.f32 %v3284_v32, %v518_v35  ;;  %v1294_v35 = vld [vmem:[%s4256_s3] sm:$0xff] }
 0x108   :  { %vm581_vm3 = vcmp.gt.f32.partialorder %v573_v34, 0.0  ;;  %v589_v37 = vmul.f32 0.01, %v573_v34 }
 0x109   :  { %vm580_vm4 = vcmp.gt.f32.partialorder %v572_v36, 0.0  ;;  %v588_v38 = vmul.f32 0.01, %v572_v36  ;;  %v3561_v39 = vpop.f32.mrb[2].mxu0 }
 0x10a   :  { %v597_v40 = vsel %vm581_vm3, %v573_v34, %v589_v37  ;;  %v575_v41 = vadd.f32 %v3561_v39, %v3284_v32  ;;  %v528_v42 = vpop.f32.mrb[3].mxu0  ;;  %v1071_v34 = vld [vmem:[%s3225_s29] sm:$0x3]  ;;  %s3231_s29 = sld [smem:[%s4698_s0 + %s4070_s26]]  }
 0x10b   :  { %608 = vst.msk [vmem:[#allocation3 + $0x10] sm:$0xff] %vm604_vm2, %v597_v40  ;;  %v596_v43 = vsel %vm580_vm4, %v572_v36, %v588_v38  ;;  %v574_v44 = vadd.f32 %v3284_v32, %v528_v42  ;;  %v1297_v36 = vpack.c.bf16 %v1294_v35, %v1294_v35  ;;  %v3317_v37 = vld [vmem:[%s3224_s7] ss:$0 sm:$0xff]  ;;  %s3234_s7 = sld [smem:[%s4698_s0 + %s4073_s4]]  }
 0x10c   :  { %607 = vst.msk [vmem:[#allocation3 + $0x8] sm:$0xff] %vm604_vm2, %v596_v43  ;;  %vm583_vm5 = vcmp.gt.f32.partialorder %v575_v41, 0.0  ;;  %v591_v45 = vmul.f32 0.01, %v575_v41 }
 0x10d   :  { %vm582_vm6 = vcmp.gt.f32.partialorder %v574_v44, 0.0  ;;  %v590_v46 = vmul.f32 0.01, %v574_v44  ;;  %v3564_v47 = vpop.f32.mrb[4].mxu0 }
 0x10e   :  { %v599_v48 = vsel %vm583_vm5, %v575_v41, %v591_v45  ;;  %v577_v49 = vadd.f32 %v3564_v47, %v3284_v32  ;;  %v538_v50 = vpop.f32.mrb[5].mxu0 }
 0x10f   :  { %610 = vst.msk [vmem:[#allocation3 + $0x20] sm:$0xff] %vm604_vm2, %v599_v48  ;;  %v598_v51 = vsel %vm582_vm6, %v574_v44, %v590_v46  ;;  %v576_v52 = vadd.f32 %v3284_v32, %v538_v50 }
 0x110   :  { %609 = vst.msk [vmem:[#allocation3 + $0x18] sm:$0xff] %vm604_vm2, %v598_v51  ;;  %vm585_vm7 = vcmp.gt.f32.partialorder %v577_v49, 0.0  ;;  %v593_v53 = vmul.f32 0.01, %v577_v49 }
 0x111   :  { %vm584_vm8 = vcmp.gt.f32.partialorder %v576_v52, 0.0  ;;  %v592_v56 = vmul.f32 0.01, %v576_v52  ;;  %v3567_v57 = vpop.f32.mrb[6].mxu0 }
 0x112   :  { %v601_v58 = vsel %vm585_vm7, %v577_v49, %v593_v53  ;;  %v579_v59 = vadd.f32 %v3567_v57, %v3284_v32  ;;  %v548_v60 = vpop.f32.mrb[7].mxu0  ;;  %v617_v11 = vld [vmem:[#allocation3 + $0x10] sm:$0xff] }
 0x113   :  { %612 = vst.msk [vmem:[#allocation3 + $0x30] sm:$0xff] %vm604_vm2, %v601_v58  ;;  %v600_v61 = vsel %vm584_vm8, %v576_v52, %v592_v56  ;;  %v578_v62 = vadd.f32 %v3284_v32, %v548_v60  ;;  %v616_v63 = vld [vmem:[#allocation3 + $0x8] sm:$0xff]  ;;  %v4251_v32 = vld [vmem:[%s3227_s25] sm:$0xff]   ;;  %s3230_s25 = sld [smem:[%s4698_s0 + %s4069_s22]]  }
 0x114   :  { %611 = vst.msk [vmem:[#allocation3 + $0x28] sm:$0xff] %vm604_vm2, %v600_v61  ;;  %vm587_vm9 = vcmp.gt.f32.partialorder %v579_v59, 0.0  ;;  %v595_v3 = vmul.f32 0.01, %v579_v59  ;;  %3576 = vmatprep.mubr.msk.f32.mxu1 %vm604_vm2, %v616_v63  ;;  %v1200_v61 = vsel %vm1198_vm11, %v1071_v34, 0 }
 0x115   :  { %vm586_vm10 = vcmp.gt.f32.partialorder %v578_v62, 0.0  ;;  %v594_v14 = vmul.f32 0.01, %v578_v62  ;;  %3577 = vmatmul.mubr.msk.f32.vlgmr.msra.gmra.mrb[0].mxu1 %vm604_vm2, %v617_v11 }
 0x116   :  { %v603_v15 = vsel %vm587_vm9, %v579_v59, %v595_v3  ;;  %3838 = vmatpush3.bf16.msra.mxu1 %v4190_v30  ;;  %v619_v19 = vld [vmem:[#allocation3 + $0x20] sm:$0xff]  ;;  %vm2741_vm9 = vcmask 130048  }
 0x117   :  { %614 = vst.msk [vmem:[#allocation3 + $0x40] sm:$0xff] %vm604_vm2, %v603_v15  ;;  %v602_v16 = vsel %vm586_vm10, %v578_v62, %v594_v14  ;;  %v618_v17 = vld [vmem:[#allocation3 + $0x18] sm:$0xff]  ;;  %3840 = vmatprep.subr.bf16.mxu1 %v3839_v1  ;;  %v3942_v30 = vld [vmem:[%s4196_s17 + $0x10] sm:$0xff]   ;;  %s4067_s17 = smov 32  }
 0x118   :  { %613 = vst.msk [vmem:[#allocation3 + $0x38] sm:$0xff] %vm604_vm2, %v602_v16  ;;  %3579 = vmatprep.mubr.msk.f32.mxu1 %vm604_vm2, %v618_v17  ;;  %3632 = vmatprep.subr.bf16.mxu0 %v3942_v30  ;;  %s3252_s26 = sld [smem:[%s4698_s0 + %s4067_s17]]  }
 0x119   :  { %3580 = vmatmul.mubr.msk.f32.gmra.mrb[2].mxu1 %vm604_vm2, %v619_v19  ;;  %3633 = vmatpush3.bf16.msra.mxu0 %v3942_v30 }
 0x11a   :  { %3842 = vmatpush3.bf16.msra.mxu1 %v3839_v1  ;;  %v621_v21 = vld [vmem:[#allocation3 + $0x30] sm:$0xff]  ;;  %3634 = vmatprep.subr.bf16.mxu0 %v3943_v31 }
 0x11b   :  { %v620_v20 = vld [vmem:[#allocation3 + $0x28] sm:$0xff]  ;;  %3844 = vmatprep.subr.bf16.mxu1 %v3843_v18 }
 0x11c   :  { %3582 = vmatprep.mubr.msk.f32.mxu1 %vm604_vm2, %v620_v20 }
 0x11d   :  { %3583 = vmatmul.mubr.msk.f32.gmra.mrb[4].mxu1 %vm604_vm2, %v621_v21  ;;  %3635 = vmatpush3.bf16.msra.mxu0 %v3943_v31 }
 0x11e   :  { %v627_v24 = vld [vmem:[#allocation3 + $0x40] sm:$0xff]  ;;  %3900 = vmatprep.subr.msk.bf16.mxu0 %vm1198_vm11, %v1071_v34 }
 0x11f   :  { %v622_v22 = vld [vmem:[#allocation3 + $0x38] sm:$0xff] }
 0x120   :  { %3585 = vmatprep.mubr.msk.f32.mxu1 %vm604_vm2, %v622_v22 }
 0x121   :  { %3586 = vmatmul.mubr.msk.f32.gmra.mrb[6].mxu1 %vm604_vm2, %v627_v24 }
 0x122   :  { %3596 = vmatprep.mubr.msk.f32.mxu1 %vm604_vm2, %v615_v23 }
 0x125   :  { %3597 = vmatmul.mubr.msk.f32.vlgmr.msra.gmra.mrb[0].mxu1 %vm604_vm2, %v616_v63 }
 0x126   :  { %3846 = vmatpush3.bf16.msra.mxu1 %v3843_v18  ;;  %3599 = vmatprep.mubr.msk.f32.mxu1 %vm604_vm2, %v617_v11 }
 0x127   :  { %3848 = vmatprep.subr.bf16.mxu1 %v3847_v27 }
 0x129   :  { %3600 = vmatmul.mubr.msk.f32.gmra.mrb[2].mxu1 %vm604_vm2, %v618_v17 }
 0x12a   :  { %3602 = vmatprep.mubr.msk.f32.mxu1 %vm604_vm2, %v619_v19  ;;  %3850 = vmatpush3.bf16.msra.mxu1 %v3847_v27 }
 0x12b   :  { %3654 = vmatprep.subr.bf16.mxu1 %v4055_v0 }
 0x12d   :  { %3603 = vmatmul.mubr.msk.f32.gmra.mrb[4].mxu1 %vm604_vm2, %v620_v20 }
 0x12e   :  { %3605 = vmatprep.mubr.msk.f32.mxu1 %vm604_vm2, %v621_v21 }
 0x131   :  { %3606 = vmatmul.mubr.msk.f32.gmra.mrb[6].mxu1 %vm604_vm2, %v622_v22 }
 0x132   :  { %3616 = vmatprep.mubr.msk.f32.mxu1 %vm604_vm2, %v617_v11 }
 0x135   :  { %3617 = vmatmul.mubr.msk.f32.vlgmr.msra.gmra.mrb[0].mxu1 %vm604_vm2, %v618_v17 }
 0x136   :  { %3619 = vmatprep.mubr.msk.f32.mxu1 %vm604_vm2, %v619_v19  ;;  %3655 = vmatpush3.bf16.msra.mxu1 %v4251_v32  ;;  %v1067_v19 = vpack.c.bf16 %v4117_v4, %v4111_v2  ;;  %v1070_v2 = vpack.c.bf16 %v4143_v10, %v4134_v9 }
 0x137   :  { %3656 = vmatprep.subr.bf16.mxu1 %v4055_v0 }
 0x139   :  { %3620 = vmatmul.mubr.msk.f32.gmra.mrb[2].mxu1 %vm604_vm2, %v620_v20 }
 0x13a   :  { %3622 = vmatprep.mubr.msk.f32.mxu1 %vm604_vm2, %v621_v21  ;;  %3657 = vmatpush3.bf16.msra.mxu1 %v4259_v33  ;;  %v1068_v21 = vpack.c.bf16 %v4121_v6, %v4119_v5 }
 0x13b   :  { %3662 = vmatprep.subr.bf16.mxu1 %v4055_v0 }
 0x13d   :  { %3623 = vmatmul.mubr.msk.f32.gmra.mrb[4].mxu1 %vm604_vm2, %v622_v22  ;;  %v1069_v22 = vpack.c.bf16 %v4132_v8, %v4130_v7  ;;  %v3330_v8 = vld [vmem:[%s3228_s11] ss:$0 sm:$0xff]  ;;  %s3235_s11 = sld [smem:[%s4698_s0 + %s4074_s8]]  }
 0x13e   :  { %3625 = vmatprep.mubr.msk.f32.mxu1 %vm604_vm2, %v627_v24 }
 0x141   :  { %3626 = vmatmul.mubr.msk.f32.gmra.mrb[6].mxu1 %vm604_vm2, %v877_v28 }
 0x142   :  { %3658 = vmatprep.mubr.msk.bf16.mxu1 %vm4062_vm12, %v4055_v0 }
 0x145   :  { %3659 = vmatmul.mubr.msk.bf16.vlgmr.msra.gmra.mrb[8].mxu1 %vm604_vm2, %v1297_v36 }
 0x146   :  { %3663 = vmatpush3.bf16.msra.mxu1 %v4251_v32  ;;  %3666 = vmatprep.mubr.msk.bf16.mxu1 %vm4062_vm12, %v4055_v0 }
 0x147   :  { %3664 = vmatprep.subr.bf16.mxu1 %v4055_v0 }
 0x14a   :  { %3665 = vmatpush3.bf16.msra.mxu1 %v4259_v33 }
 0x14b   :  { %3670 = vmatprep.subr.bf16.mxu1 %v4055_v0 }
 0x208   :  { %v3618_v38 = vpop.f32.mrb[0].mxu1 }
 0x209   :  { %v1028_v39 = vadd.f32 %v3618_v38, %v3317_v37  ;;  %v973_v40 = vpop.f32.mrb[1].mxu1 }
 0x20a   :  { %v1027_v41 = vadd.f32 %v3317_v37, %v973_v40 }
 0x20b   :  { %vm1036_vm13 = vcmp.gt.f32.partialorder %v1028_v39, 0.0  ;;  %v1044_v42 = vmul.f32 0.01, %v1028_v39 }
 0x20c   :  { %vm1035_vm14 = vcmp.gt.f32.partialorder %v1027_v41, 0.0  ;;  %v1043_v43 = vmul.f32 0.01, %v1027_v41  ;;  %v3621_v44 = vpop.f32.mrb[2].mxu1 }
 0x20d   :  { %v1052_v45 = vsel %vm1036_vm13, %v1028_v39, %v1044_v42  ;;  %v1030_v46 = vadd.f32 %v3621_v44, %v3317_v37  ;;  %v983_v47 = vpop.f32.mrb[3].mxu1  ;;  %vm2857_vm13 = vcmask 64512  }
 0x20e   :  { %v1051_v48 = vsel %vm1035_vm14, %v1027_v41, %v1043_v43  ;;  %v1029_v49 = vadd.f32 %v3317_v37, %v983_v47  ;;  %v1295_v41 = vld [vmem:[%s4316_s15] sm:$0xff] }
 0x20f   :  { %v1072_v50 = vpack.c.bf16 %v1052_v45, %v1051_v48  ;;  %vm1038_vm3 = vcmp.gt.f32.partialorder %v1030_v46, 0.0  ;;  %v1046_v51 = vmul.f32 0.01, %v1030_v46 }
 0x210   :  { %vm1037_vm4 = vcmp.gt.f32.partialorder %v1029_v49, 0.0  ;;  %v1045_v52 = vmul.f32 0.01, %v1029_v49  ;;  %v3624_v53 = vpop.f32.mrb[4].mxu1 }
 0x211   :  { %v1054_v54 = vsel %vm1038_vm3, %v1030_v46, %v1046_v51  ;;  %v1032_v55 = vadd.f32 %v3624_v53, %v3317_v37  ;;  %v993_v56 = vpop.f32.mrb[5].mxu1  ;;  %3636 = vmatprep.mubr.msk.bf16.mxu0 %vm1108_vm15, %v1072_v50 }
 0x212   :  { %v1053_v57 = vsel %vm1037_vm4, %v1029_v49, %v1045_v52  ;;  %v1031_v58 = vadd.f32 %v3317_v37, %v993_v56 }
 0x213   :  { %v1073_v59 = vpack.c.bf16 %v1054_v54, %v1053_v57  ;;  %vm1040_vm5 = vcmp.gt.f32.partialorder %v1032_v55, 0.0  ;;  %v1048_v60 = vmul.f32 0.01, %v1032_v55 }
 0x214   :  { %vm1039_vm6 = vcmp.gt.f32.partialorder %v1031_v58, 0.0  ;;  %v1047_v62 = vmul.f32 0.01, %v1031_v58  ;;  %v3627_v63 = vpop.f32.mrb[6].mxu1 }
 0x215   :  { %v1056_v1 = vsel %vm1040_vm5, %v1032_v55, %v1048_v60  ;;  %v1034_v3 = vadd.f32 %v3627_v63, %v3317_v37  ;;  %v1003_v11 = vpop.f32.mrb[7].mxu1  ;;  %3637 = vmatmul.mubr.msk.bf16.vlgmr.msra.gmra.mrb[8].mxu0 %vm1108_vm15, %v1073_v59 }
 0x216   :  { %v1055_v12 = vsel %vm1039_vm6, %v1031_v58, %v1047_v62  ;;  %v1033_v13 = vadd.f32 %v3317_v37, %v1003_v11  ;;  %3645 = vmatpush3.bf16.msra.mxu0 %v1200_v61 }
 0x217   :  { %v1074_v14 = vpack.c.bf16 %v1056_v1, %v1055_v12  ;;  %vm1042_vm7 = vcmp.gt.f32.partialorder %v1034_v3, 0.0  ;;  %v1050_v15 = vmul.f32 0.01, %v1034_v3  ;;  %3686 = vmatprep.subr.bf16.mxu0 %v4055_v0 }
 0x218   :  { %vm1041_vm8 = vcmp.gt.f32.partialorder %v1033_v13, 0.0  ;;  %v1049_v16 = vmul.f32 0.01, %v1033_v13  ;;  %v1347_v4 = vpop.f32.mrb[8].mxu1 }
 0x219   :  { %v1058_v17 = vsel %vm1042_vm7, %v1034_v3, %v1050_v15  ;;  %3640 = vmatprep.mubr.msk.bf16.mxu0 %vm1108_vm15, %v1074_v14  ;;  %v3660_v5 = vpop.f32.mrb[9].mxu1 }
 0x21a   :  { %v1057_v18 = vsel %vm1041_vm8, %v1033_v13, %v1049_v16  ;;  %v1350_v6 = vpop.f32.mrb[10].mxu1 }
 0x21b   :  { %v1075_v20 = vpack.c.bf16 %v1058_v17, %v1057_v18  ;;  %v3661_v7 = vpop.f32.mrb[11].mxu1 }
 0x21d   :  { %3641 = vmatmul.mubr.msk.bf16.gmra.mrb[12].mxu0 %vm1108_vm15, %v1075_v20 }
 0x21e   :  { %3646 = vmatprep.mubr.msk.bf16.mxu0 %vm140_vm0, %v1067_v19 }
 0x225   :  { %3647 = vmatmul.mubr.msk.bf16.vlgmr.msra.gmra.mrb[8].mxu0 %vm140_vm0, %v1068_v21 }
 0x226   :  { %3650 = vmatprep.mubr.msk.bf16.mxu0 %vm140_vm0, %v1069_v22  ;;  %3687 = vmatpush3.bf16.msra.mxu0 %v4251_v32 }
 0x227   :  { %3688 = vmatprep.subr.bf16.mxu0 %v4055_v0 }
 0x22a   :  { %3689 = vmatpush3.bf16.msra.mxu0 %v4259_v33 }
 0x22b   :  { %3702 = vmatprep.subr.bf16.mxu0 %v4055_v0 }
 0x22d   :  { %3651 = vmatmul.mubr.msk.bf16.gmra.mrb[12].mxu0 %vm140_vm0, %v1070_v2 }
 0x22e   :  { %3690 = vmatprep.mubr.msk.bf16.mxu0 %vm4062_vm12, %v4055_v0 }
 0x2f8   :  { %v3648_v9 = vpop.f32.mrb[8].mxu0 }
 0x2f9   :  { %v4305_v10 = vadd.f32 %v3648_v9, %v3330_v8  ;;  %v1236_v23 = vpop.f32.mrb[9].mxu0 }
 0x2fa   :  { %v1274_v24 = vadd.f32 %v3330_v8, %v1236_v23  ;;  %v3649_v25 = vpop.f32.mrb[10].mxu0 }
 0x2fb   :  { %v4307_v26 = vadd.f32 %v3649_v25, %v3330_v8  ;;  %v1239_v27 = vpop.f32.mrb[11].mxu0 }
 0x2fc   :  { %v1353_v28 = vadd.f32 %v1347_v4, %v1274_v24  ;;  %v1275_v29 = vadd.f32 %v3330_v8, %v1239_v27 }
 0x2fe   :  { %3950 = vtanh.f32 %v1353_v28  ;;  %v1354_v42 = vmul.f32 0.5, %v1353_v28 }
 0x300   :  { %v3652_v30 = vpop.f32.mrb[12].mxu0  ;;  %3952 = vtanh.f32 %v1354_v42 }
 0x301   :  { %v4309_v31 = vadd.f32 %v3652_v30, %v3330_v8  ;;  %v1252_v34 = vpop.f32.mrb[13].mxu0 }
 0x302   :  { %v4311_v35 = vadd.f32 %v3330_v8, %v1252_v34  ;;  %v3653_v36 = vpop.f32.mrb[14].mxu0 }
 0x303   :  { %v4318_v37 = vadd.f32 %v3653_v36, %v3330_v8  ;;  %v1255_v38 = vpop.f32.mrb[15].mxu0 }
 0x304   :  { %v4320_v39 = vadd.f32 %v3330_v8, %v1255_v38 }
 0x308   :  { %v3951_v40 = vpop.eup %3950 }
 0x309   :  { %1365 = vrot.lane.b32.xlu0 %v3951_v40, %s4066_s16 }
 0x30a   :  { %v3953_v43 = vpop.eup %3952 }
 0x30b   :  { %v1356_v44 = vmul.f32 0.5, %v3953_v43 }
 0x30d   :  { %1360 = vrot.lane.b32.xlu0 %v1295_v41, %s4067_s17  ;;  %v1357_v45 = vadd.f32 0.5, %v1356_v44 }
 0x37b   :  { %v1366_v46 = vpop.permute.xlu0 %1365 }
 0x37c   :  { %v1368_v47 = vmul.f32 %v1366_v46, %v1357_v45 }
 0x37e   :  { %1370 = vrot.lane.b32.xlu1 %v1368_v47, %s4067_s17 }
 0x37f   :  { %v1361_v48 = vpop.permute.xlu0 %1360 }
 0x380   :  { %v1363_v49 = vmul.f32 %v1361_v48, %v1357_v45 }
 0x3f0   :  { %v1371_v50 = vpop.permute.xlu1 %1370 }
 0x3f1   :  { %v1373_v51 = vadd.f32 %v1371_v50, %v1363_v49 }
 0x3f3   :  { %3954 = vtanh.f32 %v1373_v51 }
 0x3fd   :  { %v3955_v52 = vpop.eup %3954 }
 0x3fe   :  { %1376 = vrot.lane.b32.xlu1 %v3955_v52, %s4066_s16 }
 0x470   :  { %v1377_v53 = vpop.permute.xlu1 %1376 }
 0x471   :  { %v4327_v54 = vmul.f32 %v1377_v53, %v1357_v45 }
 0x473   :  { %v1387_v55 = vpack.c.bf16 %v4327_v54, %v4327_v54 }
 0x475   :  { %1389 = vrot.lane.b32.xlu0 %v1387_v55, %s4067_s17 }
 0x4e7   :  { %v1390_v56 = vpop.permute.xlu0 %1389 }
 0x4e8   :  { %3667 = vmatmul.mubr.msk.bf16.vlgmr.msra.gmra.mrb[12].mxu1 %vm604_vm2, %v1390_v56 }
 0x4e9   :  { %3671 = vmatpush3.bf16.msra.mxu1 %v4251_v32  ;;  %3674 = vmatprep.mubr.msk.bf16.mxu1 %vm4062_vm12, %v4055_v0 }
 0x4ea   :  { %3672 = vmatprep.subr.bf16.mxu1 %v4055_v0 }
 0x4ed   :  { %3673 = vmatpush3.bf16.msra.mxu1 %v4259_v33 }
 0x4ee   :  { %3678 = vmatprep.subr.bf16.mxu1 %v4055_v0 }
 0x5bb   :  { %v1428_v57 = vpop.f32.mrb[12].mxu1 }
 0x5bc   :  { %v1434_v58 = vadd.f32 %v1428_v57, %v1275_v29  ;;  %v3668_v59 = vpop.f32.mrb[13].mxu1 }
 0x5bd   :  { %v1431_v60 = vpop.f32.mrb[14].mxu1 }
 0x5be   :  { %3956 = vtanh.f32 %v1434_v58  ;;  %v3669_v61 = vpop.f32.mrb[15].mxu1  ;;  %v1435_v63 = vmul.f32 0.5, %v1434_v58 }
 0x5c0   :  { %3958 = vtanh.f32 %v1435_v63 }
 0x5c8   :  { %v3957_v62 = vpop.eup %3956 }
 0x5c9   :  { %1442 = vrot.lane.b32.xlu1 %v3957_v62, %s4066_s16 }
 0x5ca   :  { %v3959_v1 = vpop.eup %3958 }
 0x5cb   :  { %v1437_v3 = vmul.f32 0.5, %v3959_v1 }
 0x5cd   :  { %v1438_v11 = vadd.f32 0.5, %v1437_v3 }
 0x5cf   :  { %v1440_v14 = vmul.f32 %v1438_v11, %v1373_v51 }
 0x63b   :  { %v1443_v12 = vpop.permute.xlu1 %1442 }
 0x63c   :  { %v1445_v13 = vmul.f32 %v1443_v12, %v1438_v11 }
 0x63e   :  { %1447 = vrot.lane.b32.xlu0 %v1445_v13, %s4067_s17 }
 0x6b0   :  { %v1448_v15 = vpop.permute.xlu0 %1447 }
 0x6b1   :  { %v1450_v16 = vadd.f32 %v1448_v15, %v1440_v14 }
 0x6b3   :  { %3960 = vtanh.f32 %v1450_v16 }
 0x6bd   :  { %v3961_v17 = vpop.eup %3960 }
 0x6be   :  { %1453 = vrot.lane.b32.xlu1 %v3961_v17, %s4066_s16 }
 0x730   :  { %v1454_v18 = vpop.permute.xlu1 %1453 }
 0x731   :  { %v4342_v19 = vmul.f32 %v1454_v18, %v1438_v11 }
 0x733   :  { %v1465_v20 = vpack.c.bf16 %v4342_v19, %v4342_v19 }
 0x735   :  { %1467 = vrot.lane.b32.xlu0 %v1465_v20, %s4067_s17 }
 0x7a7   :  { %v1468_v21 = vpop.permute.xlu0 %1467 }
 0x7a8   :  { %3675 = vmatmul.mubr.msk.bf16.vlgmr.msra.gmra.mrb[16].mxu1 %vm604_vm2, %v1468_v21 }
 0x7a9   :  { %3679 = vmatpush3.bf16.msra.mxu1 %v4251_v32  ;;  %3682 = vmatprep.mubr.msk.bf16.mxu1 %vm4062_vm12, %v4055_v0 }
 0x7aa   :  { %3680 = vmatprep.subr.bf16.mxu1 %v4055_v0 }
 0x7ad   :  { %3681 = vmatpush3.bf16.msra.mxu1 %v4259_v33 }
 0x7ae   :  { %3694 = vmatprep.subr.bf16.mxu1 %v4055_v0 }
 0x87b   :  { %v1506_v22 = vpop.f32.mrb[16].mxu1 }
 0x87c   :  { %v1512_v2 = vadd.f32 %v1506_v22, %v4305_v10  ;;  %v3676_v4 = vpop.f32.mrb[17].mxu1 }
 0x87d   :  { %v1509_v5 = vpop.f32.mrb[18].mxu1 }
 0x87e   :  { %3962 = vtanh.f32 %v1512_v2  ;;  %v3677_v6 = vpop.f32.mrb[19].mxu1  ;;  %v1513_v8 = vmul.f32 0.5, %v1512_v2 }
 0x880   :  { %3964 = vtanh.f32 %v1513_v8 }
 0x888   :  { %v3963_v7 = vpop.eup %3962 }
 0x889   :  { %1520 = vrot.lane.b32.xlu1 %v3963_v7, %s4066_s16 }
 0x88a   :  { %v3965_v9 = vpop.eup %3964 }
 0x88b   :  { %v1515_v23 = vmul.f32 0.5, %v3965_v9 }
 0x88d   :  { %v1516_v24 = vadd.f32 0.5, %v1515_v23 }
 0x88f   :  { %v1518_v28 = vmul.f32 %v1516_v24, %v1450_v16 }
 0x8fb   :  { %v1521_v25 = vpop.permute.xlu1 %1520 }
 0x8fc   :  { %v1523_v27 = vmul.f32 %v1521_v25, %v1516_v24 }
 0x8fe   :  { %1525 = vrot.lane.b32.xlu0 %v1523_v27, %s4067_s17 }
 0x970   :  { %v1526_v29 = vpop.permute.xlu0 %1525 }
 0x971   :  { %v1528_v30 = vadd.f32 %v1526_v29, %v1518_v28 }
 0x973   :  { %3966 = vtanh.f32 %v1528_v30 }
 0x97d   :  { %v3967_v10 = vpop.eup %3966 }
 0x97e   :  { %1531 = vrot.lane.b32.xlu1 %v3967_v10, %s4066_s16 }
 0x9f0   :  { %v1532_v34 = vpop.permute.xlu1 %1531 }
 0x9f1   :  { %v4358_v36 = vmul.f32 %v1532_v34, %v1516_v24 }
 0x9f3   :  { %v1543_v38 = vpack.c.bf16 %v4358_v36, %v4358_v36 }
 0x9f5   :  { %1545 = vrot.lane.b32.xlu0 %v1543_v38, %s4067_s17 }
 0xa67   :  { %v1546_v40 = vpop.permute.xlu0 %1545 }
 0xa68   :  { %3683 = vmatmul.mubr.msk.bf16.vlgmr.msra.gmra.mrb[20].mxu1 %vm604_vm2, %v1546_v40 }
 0xa69   :  { %3695 = vmatpush3.bf16.msra.mxu1 %v4251_v32  ;;  %3698 = vmatprep.mubr.msk.bf16.mxu1 %vm4062_vm12, %v4055_v0 }
 0xa6a   :  { %3696 = vmatprep.subr.bf16.mxu1 %v4055_v0 }
 0xa6d   :  { %3697 = vmatpush3.bf16.msra.mxu1 %v4259_v33 }
 0xa6e   :  { %3710 = vmatprep.subr.bf16.mxu1 %v4055_v0 }
 0xb3b   :  { %v1584_v41 = vpop.f32.mrb[20].mxu1 }
 0xb3c   :  { %v1590_v42 = vadd.f32 %v1584_v41, %v4307_v26  ;;  %v3684_v43 = vpop.f32.mrb[21].mxu1 }
 0xb3d   :  { %v1587_v44 = vpop.f32.mrb[22].mxu1 }
 0xb3e   :  { %3968 = vtanh.f32 %v1590_v42  ;;  %v3685_v45 = vpop.f32.mrb[23].mxu1  ;;  %v1591_v47 = vmul.f32 0.5, %v1590_v42 }
 0xb40   :  { %3970 = vtanh.f32 %v1591_v47 }
 0xb48   :  { %v3969_v46 = vpop.eup %3968 }
 0xb49   :  { %1598 = vrot.lane.b32.xlu1 %v3969_v46, %s4066_s16 }
 0xb4a   :  { %v3971_v48 = vpop.eup %3970 }
 0xb4b   :  { %v1593_v49 = vmul.f32 0.5, %v3971_v48 }
 0xb4d   :  { %v1594_v50 = vadd.f32 0.5, %v1593_v49 }
 0xb4f   :  { %v1596_v53 = vmul.f32 %v1594_v50, %v1528_v30 }
 0xbbb   :  { %v1599_v51 = vpop.permute.xlu1 %1598 }
 0xbbc   :  { %v1601_v52 = vmul.f32 %v1599_v51, %v1594_v50 }
 0xbbe   :  { %1603 = vrot.lane.b32.xlu0 %v1601_v52, %s4067_s17 }
 0xc30   :  { %v1604_v55 = vpop.permute.xlu0 %1603 }
 0xc31   :  { %v1606_v56 = vadd.f32 %v1604_v55, %v1596_v53 }
 0xc33   :  { %3972 = vtanh.f32 %v1606_v56 }
 0xc3d   :  { %v3973_v26 = vpop.eup %3972 }
 0xc3e   :  { %1609 = vrot.lane.b32.xlu1 %v3973_v26, %s4066_s16 }
 0xcb0   :  { %v1610_v57 = vpop.permute.xlu1 %1609 }
 0xcb1   :  { %v4374_v58 = vmul.f32 %v1610_v57, %v1594_v50 }
 0xcb3   :  { %v1621_v59 = vpack.c.bf16 %v4374_v58, %v4374_v58 }
 0xcb5   :  { %1623 = vrot.lane.b32.xlu0 %v1621_v59, %s4067_s17 }
 0xd27   :  { %v1624_v60 = vpop.permute.xlu0 %1623 }
 0xd28   :  { %3691 = vmatmul.mubr.msk.bf16.vlgmr.msra.gmra.mrb[16].mxu0 %vm604_vm2, %v1624_v60  ;;  %v3947_v60 = vld [vmem:[%s3229_s21 + $0x8] sm:$0xff]  }
 0xd29   :  { %3703 = vmatpush3.bf16.msra.mxu0 %v4251_v32  ;;  %3706 = vmatprep.mubr.msk.bf16.mxu0 %vm4062_vm12, %v4055_v0 }
 0xd2a   :  { %3704 = vmatprep.subr.bf16.mxu0 %v4055_v0 }
 0xd2d   :  { %3705 = vmatpush3.bf16.msra.mxu0 %v4259_v33 }
 0xdfb   :  { %v1662_v61 = vpop.f32.mrb[16].mxu0 }
 0xdfc   :  { %v1668_v62 = vadd.f32 %v1662_v61, %v4311_v35  ;;  %v3692_v63 = vpop.f32.mrb[17].mxu0 }
 0xdfd   :  { %v1665_v1 = vpop.f32.mrb[18].mxu0 }
 0xdfe   :  { %3974 = vtanh.f32 %v1668_v62  ;;  %v3693_v3 = vpop.f32.mrb[19].mxu0  ;;  %v1669_v12 = vmul.f32 0.5, %v1668_v62 }
 0xe00   :  { %3976 = vtanh.f32 %v1669_v12 }
 0xe08   :  { %v3975_v11 = vpop.eup %3974 }
 0xe09   :  { %1676 = vrot.lane.b32.xlu1 %v3975_v11, %s4066_s16 }
 0xe0a   :  { %v3977_v13 = vpop.eup %3976 }
 0xe0b   :  { %v1671_v14 = vmul.f32 0.5, %v3977_v13 }
 0xe0d   :  { %v1672_v15 = vadd.f32 0.5, %v1671_v14 }
 0xe0f   :  { %v1674_v18 = vmul.f32 %v1672_v15, %v1606_v56 }
 0xe7b   :  { %v1677_v16 = vpop.permute.xlu1 %1676 }
 0xe7c   :  { %v1679_v17 = vmul.f32 %v1677_v16, %v1672_v15  ;;  %v4448_v16 = vld [vmem:[%s3230_s25 + $0x8] sm:$0xff]  }
 0xe7e   :  { %1681 = vrot.lane.b32.xlu0 %v1679_v17, %s4067_s17  ;;  %v3349_v17 = vld [vmem:[%s4316_s15 + $0x8] sm:$0xff]  ;;  %s3238_s15 = sld [smem:[%s4698_s0 + %s4075_s12]]  }
 0xef0   :  { %v1682_v20 = vpop.permute.xlu0 %1681 }
 0xef1   :  { %v1684_v21 = vadd.f32 %v1682_v20, %v1674_v18  ;;  %v3348_v20 = vld [vmem:[%s4256_s3 + $0x8] sm:$0xff]  ;;  %s4517_s3 = sld [smem:[%s4698_s0 + %s4071_s30]]  }
 0xef3   :  { %3978 = vtanh.f32 %v1684_v21 }
 0xefd   :  { %v3979_v35 = vpop.eup %3978 }
 0xefe   :  { %1687 = vrot.lane.b32.xlu1 %v3979_v35, %s4066_s16 }
 0xf70   :  { %v1688_v22 = vpop.permute.xlu1 %1687 }
 0xf71   :  { %v4389_v2 = vmul.f32 %v1688_v22, %v1672_v15  ;;  %v4443_v15 = vld [vmem:[%s3230_s25] sm:$0xff]   ;;  %s4078_s25 = smov 19  }
 0xf72   :  { %s3239_s28 = sld [smem:[%s4698_s0 + %s4078_s25]]  }
 0xf73   :  { %v1699_v4 = vpack.c.bf16 %v4389_v2, %v4389_v2 }
 0xf75   :  { %1701 = vrot.lane.b32.xlu0 %v1699_v4, %s4067_s17 }
 0xfe7   :  { %v1702_v5 = vpop.permute.xlu0 %1701 }
 0xfe8   :  { %3699 = vmatmul.mubr.msk.bf16.vlgmr.msra.gmra.mrb[24].mxu1 %vm604_vm2, %v1702_v5 }
 0xfe9   :  { %3711 = vmatpush3.bf16.msra.mxu1 %v4251_v32  ;;  %3714 = vmatprep.mubr.msk.bf16.mxu1 %vm4062_vm12, %v4055_v0 }
 0xfea   :  { %3712 = vmatprep.subr.bf16.mxu1 %v4055_v0 }
 0xfed   :  { %3713 = vmatpush3.bf16.msra.mxu1 %v4259_v33 }
 0xfee   :  { %3730 = vmatprep.subr.bf16.mxu1 %v4055_v0 }
0x10bb   :  { %v1740_v6 = vpop.f32.mrb[24].mxu1 }
0x10bc   :  { %v1746_v7 = vadd.f32 %v1740_v6, %v4320_v39  ;;  %v3700_v8 = vpop.f32.mrb[25].mxu1 }
0x10bd   :  { %v1743_v9 = vpop.f32.mrb[26].mxu1 }
0x10be   :  { %3980 = vtanh.f32 %v1746_v7  ;;  %v3701_v23 = vpop.f32.mrb[27].mxu1  ;;  %v1747_v32 = vmul.f32 0.5, %v1746_v7 }
0x10c0   :  { %3982 = vtanh.f32 %v1747_v32 }
0x10c8   :  { %v3981_v24 = vpop.eup %3980 }
0x10c9   :  { %1754 = vrot.lane.b32.xlu1 %v3981_v24, %s4066_s16  ;;  %v4479_v24 = vld [vmem:[%s3231_s29] ss:$0 sm:$0xff]  ;;  %s4079_s29 = smov 22  }
0x10ca   :  { %v3983_v25 = vpop.eup %3982  ;;  %s3242_s2 = sld [smem:[%s4698_s0 + %s4079_s29]]  }
0x10cb   :  { %v1749_v27 = vmul.f32 0.5, %v3983_v25 }
0x10cd   :  { %v1750_v28 = vadd.f32 0.5, %v1749_v27 }
0x10cf   :  { %v1752_v33 = vmul.f32 %v1750_v28, %v1684_v21  ;;  %v2066_v21 = vpack.c.bf16 %v3348_v20, %v3348_v20 }
0x113b   :  { %v1755_v29 = vpop.permute.xlu1 %1754 }
0x113c   :  { %v1757_v30 = vmul.f32 %v1755_v29, %v1750_v28 }
0x113e   :  { %1759 = vrot.lane.b32.xlu0 %v1757_v30, %s4067_s17 }
0x11b0   :  { %v1760_v10 = vpop.permute.xlu0 %1759 }
0x11b1   :  { %v1762_v34 = vadd.f32 %v1760_v10, %v1752_v33 }
0x11b3   :  { %3984 = vtanh.f32 %v1762_v34 }
0x11bd   :  { %v3985_v39 = vpop.eup %3984 }
0x11be   :  { %1765 = vrot.lane.b32.xlu1 %v3985_v39, %s4066_s16 }
0x1230   :  { %v1766_v38 = vpop.permute.xlu1 %1765 }
0x1231   :  { %v4405_v40 = vmul.f32 %v1766_v38, %v1750_v28 }
0x1233   :  { %v1777_v41 = vpack.c.bf16 %v4405_v40, %v4405_v40 }
0x1235   :  { %1779 = vrot.lane.b32.xlu0 %v1777_v41, %s4067_s17 }
0x12a7   :  { %v1780_v42 = vpop.permute.xlu0 %1779 }
0x12a8   :  { %3707 = vmatmul.mubr.msk.bf16.vlgmr.msra.gmra.mrb[20].mxu0 %vm604_vm2, %v1780_v42 }
0x137b   :  { %v1818_v43 = vpop.f32.mrb[20].mxu0 }
0x137c   :  { %v1824_v44 = vadd.f32 %v1818_v43, %v4309_v31  ;;  %v3708_v45 = vpop.f32.mrb[21].mxu0 }
0x137d   :  { %v1821_v46 = vpop.f32.mrb[22].mxu0 }
0x137e   :  { %3986 = vtanh.f32 %v1824_v44  ;;  %v3709_v47 = vpop.f32.mrb[23].mxu0  ;;  %v1825_v49 = vmul.f32 0.5, %v1824_v44 }
0x1380   :  { %3988 = vtanh.f32 %v1825_v49 }
0x1388   :  { %v3987_v48 = vpop.eup %3986 }
0x1389   :  { %1832 = vrot.lane.b32.xlu1 %v3987_v48, %s4066_s16 }
0x138a   :  { %v3989_v50 = vpop.eup %3988 }
0x138b   :  { %v1827_v51 = vmul.f32 0.5, %v3989_v50 }
0x138d   :  { %v1828_v52 = vadd.f32 0.5, %v1827_v51 }
0x138f   :  { %v1830_v31 = vmul.f32 %v1828_v52, %v1762_v34 }
0x13fb   :  { %v1833_v53 = vpop.permute.xlu1 %1832 }
0x13fc   :  { %v1835_v55 = vmul.f32 %v1833_v53, %v1828_v52 }
0x13fe   :  { %1837 = vrot.lane.b32.xlu0 %v1835_v55, %s4067_s17 }
0x1402   :  { %1381 = vrot.lane.b32.xlu0 %v4327_v54, %s4067_s17  ;;  %v3946_v54 = vld [vmem:[%s3229_s21] sm:$0xff]   ;;  %s4077_s21 = smov 17  }
0x1403   :  { %3718 = vmatprep.subr.bf16.mxu0 %v3946_v54  ;;  %s3237_s24 = sld [smem:[%s4698_s0 + %s4077_s21]]  }
0x1404   :  { %3719 = vmatpush3.bf16.msra.mxu0 %v3946_v54 }
0x1405   :  { %3720 = vmatprep.subr.bf16.mxu0 %v3947_v60 }
0x1406   :  { %1536 = vrot.lane.b32.xlu0 %v4358_v36, %s4067_s17 }
0x1408   :  { %3721 = vmatpush3.bf16.msra.mxu0 %v3947_v60 }
0x1409   :  { %3746 = vmatprep.subr.bf16.mxu0 %v4055_v0 }
0x1470   :  { %v1838_v56 = vpop.permute.xlu0 %1837 }
0x1471   :  { %v4418_v26 = vadd.f32 %v1838_v56, %v1830_v31 }
0x1473   :  { %3990 = vtanh.f32 %v4418_v26 }
0x1474   :  { %v1382_v57 = vpop.permute.xlu0 %1381 }
0x1475   :  { %1384 = vst.msk [vmem:[#allocation5] sm:$0xff] %vm604_vm2, %v1382_v57 }
0x1478   :  { %v1537_v59 = vpop.permute.xlu0 %1536 }
0x1479   :  { %1540 = vst.msk [vmem:[#allocation5 + $0x10] sm:$0xff] %vm604_vm2, %v1537_v59 }
0x147d   :  { %v3991_v36 = vpop.eup %3990 }
0x147e   :  { %1843 = vrot.lane.b32.xlu1 %v3991_v36, %s4066_s16 }
0x1480   :  { %v1939_v12 = vld [vmem:[#allocation5 + $0x10] sm:$0xff] }
0x1482   :  { %1458 = vrot.lane.b32.xlu1 %v4342_v19, %s4067_s17 }
0x1486   :  { %1614 = vrot.lane.b32.xlu1 %v4374_v58, %s4067_s17  ;;  %v1937_v58 = vld [vmem:[#allocation5] sm:$0xff] }
0x14f0   :  { %v1844_v61 = vpop.permute.xlu1 %1843 }
0x14f1   :  { %v4435_v62 = vmul.f32 %v1844_v61, %v1828_v52 }
0x14f3   :  { %v1855_v63 = vpack.c.bf16 %v4435_v62, %v4435_v62 }
0x14f4   :  { %v1459_v1 = vpop.permute.xlu1 %1458 }
0x14f5   :  { %1462 = vst.msk [vmem:[#allocation5 + $0x8] sm:$0xff] %vm604_vm2, %v1459_v1  ;;  %1857 = vrot.lane.b32.xlu0 %v1855_v63, %s4067_s17 }
0x14f8   :  { %v1615_v19 = vpop.permute.xlu1 %1614 }
0x14f9   :  { %1618 = vst.msk [vmem:[#allocation5 + $0x18] sm:$0xff] %vm604_vm2, %v1615_v19  ;;  %2129 = vrot.lane.b32.xlu0 %v3349_v17, %s4067_s17 }
0x14fc   :  { %v1938_v3 = vld [vmem:[#allocation5 + $0x8] sm:$0xff] }
0x14fd   :  { %v1945_v11 = vpack.c.bf16 %v1938_v3, %v1937_v58 }
0x14ff   :  { %3722 = vmatprep.mubr.msk.bf16.mxu0 %vm604_vm2, %v1945_v11 }
0x1500   :  { %v1940_v13 = vld [vmem:[#allocation5 + $0x18] sm:$0xff] }
0x1501   :  { %v1946_v14 = vpack.c.bf16 %v1940_v13, %v1939_v12 }
0x1503   :  { %3723 = vmatmul.mubr.msk.bf16.vlgmr.msra.gmra.mrb[24].mxu0 %vm604_vm2, %v1946_v14 }
0x1504   :  { %3747 = vmatpush3.bf16.msra.mxu0 %v4443_v15 }
0x1505   :  { %3748 = vmatprep.subr.bf16.mxu0 %v4055_v0 }
0x1508   :  { %3749 = vmatpush3.bf16.msra.mxu0 %v4448_v16 }
0x1509   :  { %3762 = vmatprep.subr.bf16.mxu0 %v4055_v0 }
0x1567   :  { %v1858_v18 = vpop.permute.xlu0 %1857 }
0x1568   :  { %3715 = vmatmul.mubr.msk.bf16.vlgmr.msra.gmra.mrb[28].mxu1 %vm604_vm2, %v1858_v18 }
0x1569   :  { %3731 = vmatpush3.bf16.msra.mxu1 %v4443_v15  ;;  %3734 = vmatprep.mubr.msk.bf16.mxu1 %vm4062_vm12, %v4055_v0 }
0x156a   :  { %3732 = vmatprep.subr.bf16.mxu1 %v4055_v0 }
0x156b   :  { %v2130_v42 = vpop.permute.xlu0 %2129 }
0x156d   :  { %3733 = vmatpush3.bf16.msra.mxu1 %v4448_v16 }
0x156e   :  { %3738 = vmatprep.subr.bf16.mxu1 %v4055_v0 }
0x1570   :  { %3735 = vmatmul.mubr.msk.bf16.vlgmr.msra.gmra.mrb[32].mxu1 %vm604_vm2, %v2066_v21 }
0x1571   :  { %3739 = vmatpush3.bf16.msra.mxu1 %v4443_v15  ;;  %3742 = vmatprep.mubr.msk.bf16.mxu1 %vm4062_vm12, %v4055_v0 }
0x1572   :  { %3740 = vmatprep.subr.bf16.mxu1 %v4055_v0 }
0x1575   :  { %3741 = vmatpush3.bf16.msra.mxu1 %v4448_v16 }
0x1576   :  { %3754 = vmatprep.subr.bf16.mxu1 %v4055_v0 }
0x15d6   :  { %v4469_v35 = vpop.f32.mrb[24].mxu0 }
0x15d7   :  { %v2018_v22 = vpop.f32.mrb[25].mxu0 }
0x15d8   :  { %v4471_v4 = vpop.f32.mrb[26].mxu0  ;;  %v2019_v32 = vadd.f32 %v4479_v24, %v2018_v22 }
0x15d9   :  { %v4473_v5 = vpop.f32.mrb[27].mxu0 }
0x15da   :  { %v2022_v1 = vadd.f32 %v4479_v24, %v4473_v5 }
0x163b   :  { %v1896_v6 = vpop.f32.mrb[28].mxu1 }
0x163c   :  { %v1902_v7 = vadd.f32 %v1896_v6, %v4318_v37  ;;  %v3716_v8 = vpop.f32.mrb[29].mxu1 }
0x163d   :  { %v1899_v9 = vpop.f32.mrb[30].mxu1 }
0x163e   :  { %v3717_v23 = vpop.f32.mrb[31].mxu1  ;;  %v1903_v48 = vmul.f32 0.5, %v1902_v7 }
0x1643   :  { %v2116_v25 = vpop.f32.mrb[32].mxu1 }
0x1644   :  { %v2122_v27 = vadd.f32 %v2116_v25, %v2019_v32  ;;  %v3736_v28 = vpop.f32.mrb[33].mxu1 }
0x1645   :  { %v2119_v29 = vpop.f32.mrb[34].mxu1 }
0x1646   :  { %3992 = vtanh.f32 %v2122_v27  ;;  %v3737_v30 = vpop.f32.mrb[35].mxu1  ;;  %v2123_v10 = vmul.f32 0.5, %v2122_v27 }
0x1648   :  { %3994 = vtanh.f32 %v2123_v10 }
0x1650   :  { %v3993_v33 = vpop.eup %3992 }
0x1651   :  { %2134 = vrot.lane.b32.xlu1 %v3993_v33, %s4066_s16 }
0x1652   :  { %v3995_v34 = vpop.eup %3994 }
0x1653   :  { %v2125_v37 = vmul.f32 0.5, %v3995_v34 }
0x1655   :  { %v2126_v39 = vadd.f32 0.5, %v2125_v37 }
0x1657   :  { %v2132_v43 = vmul.f32 %v2130_v42, %v2126_v39 }
0x16c3   :  { %v2135_v38 = vpop.permute.xlu1 %2134 }
0x16c4   :  { %v2137_v41 = vmul.f32 %v2135_v38, %v2126_v39 }
0x16c6   :  { %2139 = vrot.lane.b32.xlu1 %v2137_v41, %s4067_s17  ;;  %v2027_v41 = vadd.f32 %v4469_v35, %v4479_v24 }
0x1738   :  { %v2140_v44 = vpop.permute.xlu1 %2139 }
0x1739   :  { %v2142_v45 = vadd.f32 %v2140_v44, %v2132_v43 }
0x173b   :  { %3996 = vtanh.f32 %v2142_v45 }
0x173c   :  { %3998 = vtanh.f32 %v1902_v7 }
0x173d   :  { %4000 = vtanh.f32 %v1903_v48 }
0x1745   :  { %v3997_v46 = vpop.eup %3996 }
0x1746   :  { %2145 = vrot.lane.b32.xlu0 %v3997_v46, %s4066_s16  ;;  %v3999_v47 = vpop.eup %3998 }
0x1747   :  { %v4001_v49 = vpop.eup %4000 }
0x1748   :  { %v1905_v50 = vmul.f32 0.5, %v4001_v49 }
0x174a   :  { %1910 = vrot.lane.b32.xlu0 %v3999_v47, %s4066_s16  ;;  %v1906_v55 = vadd.f32 0.5, %v1905_v50 }
0x174c   :  { %v1908_v59 = vmul.f32 %v1906_v55, %v4418_v26 }
0x17b8   :  { %v2146_v51 = vpop.permute.xlu0 %2145 }
0x17b9   :  { %v2148_v52 = vmul.f32 %v2146_v51, %v2126_v39 }
0x17bb   :  { %v2150_v53 = vpack.c.bf16 %v2148_v52, %v2148_v52 }
0x17bc   :  { %v1911_v31 = vpop.permute.xlu0 %1910 }
0x17bd   :  { %v1913_v56 = vmul.f32 %v1911_v31, %v1906_v55  ;;  %2152 = vrot.lane.b32.xlu1 %v2150_v53, %s4067_s17 }
0x17bf   :  { %1915 = vrot.lane.b32.xlu0 %v1913_v56, %s4067_s17 }
0x182f   :  { %v2153_v57 = vpop.permute.xlu1 %2152 }
0x1830   :  { %3743 = vmatmul.mubr.msk.bf16.vlgmr.msra.gmra.mrb[36].mxu1 %vm604_vm2, %v2153_v57 }
0x1831   :  { %v1916_v54 = vpop.permute.xlu0 %1915  ;;  %3755 = vmatpush3.bf16.msra.mxu1 %v4443_v15  ;;  %3758 = vmatprep.mubr.msk.bf16.mxu1 %vm4062_vm12, %v4055_v0 }
0x1832   :  { %v4493_v60 = vadd.f32 %v1916_v54, %v1908_v59  ;;  %3756 = vmatprep.subr.bf16.mxu1 %v4055_v0 }
0x1834   :  { %4002 = vtanh.f32 %v4493_v60 }
0x1835   :  { %3757 = vmatpush3.bf16.msra.mxu1 %v4448_v16 }
0x1836   :  { %3770 = vmatprep.subr.bf16.mxu1 %v4055_v0 }
0x183e   :  { %v4003_v36 = vpop.eup %4002 }
0x183f   :  { %1921 = vrot.lane.b32.xlu0 %v4003_v36, %s4066_s16 }
0x1843   :  { %1692 = vrot.lane.b32.xlu0 %v4389_v2, %s4067_s17 }
0x1847   :  { %1848 = vrot.lane.b32.xlu0 %v4435_v62, %s4067_s17 }
0x18b1   :  { %v1922_v26 = vpop.permute.xlu0 %1921 }
0x18b2   :  { %v1924_v7 = vmul.f32 %v1922_v26, %v1906_v55  ;;  %v2030_v26 = vadd.f32 %v4471_v4, %v4479_v24 }
0x18b5   :  { %v1693_v61 = vpop.permute.xlu0 %1692 }
0x18b6   :  { %1696 = vst.msk [vmem:[#allocation5 + $0x20] sm:$0xff] %vm604_vm2, %v1693_v61 }
0x18b9   :  { %v1849_v63 = vpop.permute.xlu0 %1848 }
0x18ba   :  { %1852 = vst.msk [vmem:[#allocation5 + $0x30] sm:$0xff] %vm604_vm2, %v1849_v63 }
0x18c1   :  { %v1943_v29 = vld [vmem:[#allocation5 + $0x30] sm:$0xff] }
0x1903   :  { %v2191_v19 = vpop.f32.mrb[36].mxu1 }
0x1904   :  { %v2197_v58 = vadd.f32 %v2191_v19, %v2022_v1  ;;  %v3744_v3 = vpop.f32.mrb[37].mxu1 }
0x1905   :  { %v2194_v11 = vpop.f32.mrb[38].mxu1 }
0x1906   :  { %4004 = vtanh.f32 %v2197_v58  ;;  %v3745_v12 = vpop.f32.mrb[39].mxu1  ;;  %v2198_v62 = vmul.f32 0.5, %v2197_v58 }
0x1908   :  { %4006 = vtanh.f32 %v2198_v62 }
0x1910   :  { %v4005_v2 = vpop.eup %4004 }
0x1911   :  { %2205 = vrot.lane.b32.xlu1 %v4005_v2, %s4066_s16 }
0x1912   :  { %v4007_v13 = vpop.eup %4006 }
0x1913   :  { %v2200_v14 = vmul.f32 0.5, %v4007_v13 }
0x1915   :  { %v2201_v17 = vadd.f32 0.5, %v2200_v14 }
0x1917   :  { %v2203_v21 = vmul.f32 %v2201_v17, %v2142_v45 }
0x1983   :  { %v2206_v18 = vpop.permute.xlu1 %2205 }
0x1984   :  { %v2208_v20 = vmul.f32 %v2206_v18, %v2201_v17 }
0x1986   :  { %2210 = vrot.lane.b32.xlu1 %v2208_v20, %s4067_s17 }
0x19f8   :  { %v2211_v22 = vpop.permute.xlu1 %2210 }
0x19f9   :  { %v2213_v5 = vadd.f32 %v2211_v22, %v2203_v21 }
0x19fb   :  { %4008 = vtanh.f32 %v2213_v5 }
0x1a05   :  { %v4009_v6 = vpop.eup %4008 }
0x1a06   :  { %2216 = vrot.lane.b32.xlu1 %v4009_v6, %s4066_s16 }
0x1a0a   :  { %1770 = vrot.lane.b32.xlu1 %v4405_v40, %s4067_s17  ;;  %v1941_v40 = vld [vmem:[#allocation5 + $0x20] sm:$0xff] }
0x1a0e   :  { %1926 = vrot.lane.b32.xlu1 %v1924_v7, %s4067_s17 }
0x1a78   :  { %v2217_v8 = vpop.permute.xlu1 %2216 }
0x1a79   :  { %v2219_v9 = vmul.f32 %v2217_v8, %v2201_v17 }
0x1a7b   :  { %v2221_v23 = vpack.c.bf16 %v2219_v9, %v2219_v9 }
0x1a7c   :  { %v1771_v32 = vpop.permute.xlu1 %1770 }
0x1a7d   :  { %1774 = vst.msk [vmem:[#allocation5 + $0x28] sm:$0xff] %vm604_vm2, %v1771_v32  ;;  %2223 = vrot.lane.b32.xlu0 %v2221_v23, %s4067_s17 }
0x1a80   :  { %v1927_v25 = vpop.permute.xlu1 %1926 }
0x1a81   :  { %1930 = vst.msk [vmem:[#allocation5 + $0x38] sm:$0xff] %vm604_vm2, %v1927_v25  ;;  %1931 = vst.msk [vmem:[%s4517_s3] sm:$0xff] %vm604_vm2, %v1927_v25 }
0x1a84   :  { %v1942_v27 = vld [vmem:[#allocation5 + $0x28] sm:$0xff] }
0x1a85   :  { %v1947_v28 = vpack.c.bf16 %v1942_v27, %v1941_v40 }
0x1a87   :  { %3726 = vmatprep.mubr.msk.bf16.mxu0 %vm604_vm2, %v1947_v28 }
0x1a88   :  { %v1944_v30 = vld [vmem:[#allocation5 + $0x38] sm:$0xff] }
0x1a89   :  { %v1948_v33 = vpack.c.bf16 %v1944_v30, %v1943_v29 }
0x1a8b   :  { %3727 = vmatmul.mubr.msk.bf16.gmra.mrb[28].mxu0 %vm604_vm2, %v1948_v33 }
0x1a8c   :  { %3750 = vmatprep.mubr.msk.bf16.mxu0 %vm4062_vm12, %v4055_v0 }
0x1aef   :  { %v2224_v10 = vpop.permute.xlu0 %2223 }
0x1af0   :  { %3751 = vmatmul.mubr.msk.bf16.vlgmr.msra.gmra.mrb[32].mxu0 %vm604_vm2, %v2224_v10 }
0x1af1   :  { %3763 = vmatpush3.bf16.msra.mxu0 %v4443_v15  ;;  %3766 = vmatprep.mubr.msk.bf16.mxu0 %vm4062_vm12, %v4055_v0 }
0x1af2   :  { %3764 = vmatprep.subr.bf16.mxu0 %v4055_v0 }
0x1af5   :  { %3765 = vmatpush3.bf16.msra.mxu0 %v4448_v16 }
0x1af6   :  { %3778 = vmatprep.subr.bf16.mxu0 %v4055_v0 }
0x1b5e   :  { %v4535_v34 = vpop.f32.mrb[28].mxu0 }
0x1b5f   :  { %v4537_v37 = vpop.f32.mrb[29].mxu0 }
0x1b60   :  { %v4539_v39 = vpop.f32.mrb[30].mxu0  ;;  %v2035_v7 = vadd.f32 %v4479_v24, %v4537_v37 }
0x1b61   :  { %v4541_v38 = vpop.f32.mrb[31].mxu0 }
0x1bc3   :  { %v2262_v42 = vpop.f32.mrb[32].mxu0 }
0x1bc4   :  { %v2268_v43 = vadd.f32 %v2262_v42, %v2027_v41  ;;  %v3752_v44 = vpop.f32.mrb[33].mxu0 }
0x1bc5   :  { %v2265_v45 = vpop.f32.mrb[34].mxu0 }
0x1bc6   :  { %4010 = vtanh.f32 %v2268_v43  ;;  %v3753_v46 = vpop.f32.mrb[35].mxu0  ;;  %v2269_v48 = vmul.f32 0.5, %v2268_v43 }
0x1bc8   :  { %4012 = vtanh.f32 %v2269_v48  ;;  %v2038_v48 = vadd.f32 %v4479_v24, %v4541_v38 }
0x1bd0   :  { %v4011_v47 = vpop.eup %4010 }
0x1bd1   :  { %2276 = vrot.lane.b32.xlu1 %v4011_v47, %s4066_s16 }
0x1bd2   :  { %v4013_v49 = vpop.eup %4012 }
0x1bd3   :  { %v2271_v50 = vmul.f32 0.5, %v4013_v49 }
0x1bd5   :  { %v2272_v51 = vadd.f32 0.5, %v2271_v50 }
0x1bd7   :  { %v2274_v55 = vmul.f32 %v2272_v51, %v2213_v5 }
0x1c43   :  { %v2277_v52 = vpop.permute.xlu1 %2276 }
0x1c44   :  { %v2279_v53 = vmul.f32 %v2277_v52, %v2272_v51 }
0x1c46   :  { %2281 = vrot.lane.b32.xlu0 %v2279_v53, %s4067_s17 }
0x1cb8   :  { %v2282_v35 = vpop.permute.xlu0 %2281 }
0x1cb9   :  { %v2284_v31 = vadd.f32 %v2282_v35, %v2274_v55 }
0x1cbb   :  { %4014 = vtanh.f32 %v2284_v31 }
0x1cc5   :  { %v4015_v56 = vpop.eup %4014 }
0x1cc6   :  { %2287 = vrot.lane.b32.xlu1 %v4015_v56, %s4066_s16 }
0x1d38   :  { %v2288_v57 = vpop.permute.xlu1 %2287 }
0x1d39   :  { %v2290_v59 = vmul.f32 %v2288_v57, %v2272_v51 }
0x1d3b   :  { %v2292_v54 = vpack.c.bf16 %v2290_v59, %v2290_v59 }
0x1d3d   :  { %2294 = vrot.lane.b32.xlu0 %v2292_v54, %s4067_s17 }
0x1daf   :  { %v2295_v36 = vpop.permute.xlu0 %2294 }
0x1db0   :  { %3759 = vmatmul.mubr.msk.bf16.vlgmr.msra.gmra.mrb[40].mxu1 %vm604_vm2, %v2295_v36 }
0x1db1   :  { %3771 = vmatpush3.bf16.msra.mxu1 %v4443_v15  ;;  %3774 = vmatprep.mubr.msk.bf16.mxu1 %vm4062_vm12, %v4055_v0 }
0x1db2   :  { %3772 = vmatprep.subr.bf16.mxu1 %v4055_v0 }
0x1db5   :  { %3773 = vmatpush3.bf16.msra.mxu1 %v4448_v16 }
0x1db6   :  { %3786 = vmatprep.subr.bf16.mxu1 %v4055_v0 }
0x1e83   :  { %v2333_v61 = vpop.f32.mrb[40].mxu1 }
0x1e84   :  { %v2339_v63 = vadd.f32 %v2333_v61, %v2030_v26  ;;  %v3760_v1 = vpop.f32.mrb[41].mxu1 }
0x1e85   :  { %v2336_v19 = vpop.f32.mrb[42].mxu1 }
0x1e86   :  { %4016 = vtanh.f32 %v2339_v63  ;;  %v3761_v58 = vpop.f32.mrb[43].mxu1  ;;  %v2340_v11 = vmul.f32 0.5, %v2339_v63  ;;  %v2043_v19 = vadd.f32 %v4535_v34, %v4479_v24 }
0x1e88   :  { %4018 = vtanh.f32 %v2340_v11 }
0x1e90   :  { %v4017_v3 = vpop.eup %4016 }
0x1e91   :  { %2347 = vrot.lane.b32.xlu1 %v4017_v3, %s4066_s16 }
0x1e92   :  { %v4019_v12 = vpop.eup %4018 }
0x1e93   :  { %v2342_v2 = vmul.f32 0.5, %v4019_v12 }
0x1e95   :  { %v2343_v62 = vadd.f32 0.5, %v2342_v2 }
0x1e97   :  { %v2345_v17 = vmul.f32 %v2343_v62, %v2284_v31 }
0x1f03   :  { %v2348_v13 = vpop.permute.xlu1 %2347 }
0x1f04   :  { %v2350_v14 = vmul.f32 %v2348_v13, %v2343_v62 }
0x1f06   :  { %2352 = vrot.lane.b32.xlu0 %v2350_v14, %s4067_s17 }
0x1f78   :  { %v2353_v4 = vpop.permute.xlu0 %2352 }
0x1f79   :  { %v2355_v18 = vadd.f32 %v2353_v4, %v2345_v17 }
0x1f7b   :  { %4020 = vtanh.f32 %v2355_v18 }
0x1f85   :  { %v4021_v20 = vpop.eup %4020 }
0x1f86   :  { %2358 = vrot.lane.b32.xlu1 %v4021_v20, %s4066_s16 }
0x1ff8   :  { %v2359_v21 = vpop.permute.xlu1 %2358 }
0x1ff9   :  { %v2361_v22 = vmul.f32 %v2359_v21, %v2343_v62 }
0x1ffb   :  { %v2363_v5 = vpack.c.bf16 %v2361_v22, %v2361_v22 }
0x1ffd   :  { %2365 = vrot.lane.b32.xlu0 %v2363_v5, %s4067_s17 }
0x206f   :  { %v2366_v6 = vpop.permute.xlu0 %2365 }
0x2070   :  { %3767 = vmatmul.mubr.msk.bf16.vlgmr.msra.gmra.mrb[36].mxu0 %vm604_vm2, %v2366_v6 }
0x2071   :  { %3779 = vmatpush3.bf16.msra.mxu0 %v4443_v15  ;;  %3782 = vmatprep.mubr.msk.bf16.mxu0 %vm4062_vm12, %v4055_v0 }
0x2072   :  { %3780 = vmatprep.subr.bf16.mxu0 %v4055_v0 }
0x2075   :  { %3781 = vmatpush3.bf16.msra.mxu0 %v4448_v16 }
0x2143   :  { %v2404_v8 = vpop.f32.mrb[36].mxu0 }
0x2144   :  { %v2410_v9 = vadd.f32 %v2404_v8, %v2035_v7  ;;  %v3768_v23 = vpop.f32.mrb[37].mxu0 }
0x2145   :  { %v2407_v32 = vpop.f32.mrb[38].mxu0  ;;  %v2046_v23 = vadd.f32 %v4539_v39, %v4479_v24 }
0x2146   :  { %4022 = vtanh.f32 %v2410_v9  ;;  %v3769_v25 = vpop.f32.mrb[39].mxu0  ;;  %v2411_v27 = vmul.f32 0.5, %v2410_v9 }
0x2148   :  { %4024 = vtanh.f32 %v2411_v27 }
0x2150   :  { %v4023_v40 = vpop.eup %4022 }
0x2151   :  { %2418 = vrot.lane.b32.xlu1 %v4023_v40, %s4066_s16 }
0x2152   :  { %v4025_v28 = vpop.eup %4024 }
0x2153   :  { %v2413_v29 = vmul.f32 0.5, %v4025_v28 }
0x2155   :  { %v2414_v30 = vadd.f32 0.5, %v2413_v29 }
0x2157   :  { %v2416_v41 = vmul.f32 %v2414_v30, %v2355_v18 }
0x21c3   :  { %v2419_v33 = vpop.permute.xlu1 %2418 }
0x21c4   :  { %v2421_v10 = vmul.f32 %v2419_v33, %v2414_v30 }
0x21c6   :  { %2423 = vrot.lane.b32.xlu0 %v2421_v10, %s4067_s17 }
0x2238   :  { %v2424_v37 = vpop.permute.xlu0 %2423 }
0x2239   :  { %v2426_v42 = vadd.f32 %v2424_v37, %v2416_v41 }
0x223b   :  { %4026 = vtanh.f32 %v2426_v42 }
0x2245   :  { %v4027_v43 = vpop.eup %4026 }
0x2246   :  { %2429 = vrot.lane.b32.xlu1 %v4027_v43, %s4066_s16 }
0x22b8   :  { %v2430_v44 = vpop.permute.xlu1 %2429 }
0x22b9   :  { %v2432_v45 = vmul.f32 %v2430_v44, %v2414_v30  ;;  %v4072_v44 = vmov 0.0|0.0  }
0x22ba   :  { %3851 = vmatprep.subr.bf16.mxu0 %v4072_v44 }
0x22bb   :  { %v2434_v46 = vpack.c.bf16 %v2432_v45, %v2432_v45  ;;  %v2658_v45 = vld [vmem:[%s3234_s7] sm:$0xff] }
0x22bd   :  { %2436 = vrot.lane.b32.xlu0 %v2434_v46, %s4067_s17  ;;  %v2659_v46 = vld [vmem:[%s3234_s7 + $0x8] sm:$0xff] }
0x232f   :  { %v2437_v47 = vpop.permute.xlu0 %2436 }
0x2330   :  { %3775 = vmatmul.mubr.msk.bf16.vlgmr.msra.gmra.mrb[44].mxu1 %vm604_vm2, %v2437_v47  ;;  %v2660_v47 = vld [vmem:[%s3234_s7 + $0x10] sm:$0xff] }
0x2331   :  { %3787 = vmatpush3.bf16.msra.mxu1 %v4443_v15  ;;  %3790 = vmatprep.mubr.msk.bf16.mxu1 %vm4062_vm12, %v4055_v0 }
0x2332   :  { %3788 = vmatprep.subr.bf16.mxu1 %v4055_v0 }
0x2335   :  { %3789 = vmatpush3.bf16.msra.mxu1 %v4448_v16 }
0x2336   :  { %3812 = vmatprep.subr.mxu1 %v4055_v0 }
0x2403   :  { %v2475_v49 = vpop.f32.mrb[44].mxu1 }
0x2404   :  { %v2481_v50 = vadd.f32 %v2475_v49, %v2038_v48  ;;  %v3776_v51 = vpop.f32.mrb[45].mxu1  ;;  %v3852_v48 = vpack.c.bf16 %v2659_v46, %v2658_v45  ;;  %v2661_v49 = vld [vmem:[%s3234_s7 + $0x18] sm:$0xff]  ;;  %s4081_s7 = smov 21  }
0x2405   :  { %v2478_v52 = vpop.f32.mrb[46].mxu1  ;;  %v3855_v51 = vpack.c.bf16 %v2661_v49, %v2660_v47  ;;  %s3241_s10 = sld [smem:[%s4698_s0 + %s4081_s7]]   ;;  %s4089_s7 = smov 30  }
0x2406   :  { %4028 = vtanh.f32 %v2481_v50  ;;  %v3777_v53 = vpop.f32.mrb[47].mxu1  ;;  %v2482_v15 = vmul.f32 0.5, %v2481_v50 }
0x2408   :  { %4030 = vtanh.f32 %v2482_v15  ;;  %v3362_v15 = vld [vmem:[%s3235_s11] ss:$0 sm:$0xff]  ;;  %s4082_s11 = smov 23  }
0x2409   :  { %s3243_s14 = sld [smem:[%s4698_s0 + %s4082_s11]]   ;;  %s4090_s11 = smov 28  }
0x2410   :  { %v4029_v55 = vpop.eup %4028 }
0x2411   :  { %2489 = vrot.lane.b32.xlu1 %v4029_v55, %s4066_s16 }
0x2412   :  { %v4031_v35 = vpop.eup %4030 }
0x2413   :  { %v2484_v31 = vmul.f32 0.5, %v4031_v35 }
0x2415   :  { %v2485_v56 = vadd.f32 0.5, %v2484_v31 }
0x2417   :  { %v2487_v59 = vmul.f32 %v2485_v56, %v2426_v42 }
0x2483   :  { %v2490_v16 = vpop.permute.xlu1 %2489 }
0x2484   :  { %v2492_v57 = vmul.f32 %v2490_v16, %v2485_v56 }
0x2486   :  { %2494 = vrot.lane.b32.xlu0 %v2492_v57, %s4067_s17 }
0x24f8   :  { %v2495_v38 = vpop.permute.xlu0 %2494 }
0x24f9   :  { %v2497_v54 = vadd.f32 %v2495_v38, %v2487_v59 }
0x24fb   :  { %4032 = vtanh.f32 %v2497_v54 }
0x2505   :  { %v4033_v36 = vpop.eup %4032 }
0x2506   :  { %2500 = vrot.lane.b32.xlu1 %v4033_v36, %s4066_s16 }
0x2578   :  { %v2501_v26 = vpop.permute.xlu1 %2500 }
0x2579   :  { %v2503_v61 = vmul.f32 %v2501_v26, %v2485_v56  ;;  %v2775_v26 = vld [vmem:[%s3238_s15] sm:$0xff] }
0x257b   :  { %v2505_v63 = vpack.c.bf16 %v2503_v61, %v2503_v61  ;;  %v2776_v61 = vld [vmem:[%s3238_s15 + $0x8] sm:$0xff]  ;;  %s4083_s15 = smov 26  }
0x257c   :  { %s3246_s19 = sld [smem:[%s4698_s0 + %s4083_s15]]   ;;  %s4091_s15 = smov 29  }
0x257d   :  { %2507 = vrot.lane.b32.xlu0 %v2505_v63, %s4067_s17  ;;  %v3858_v63 = vpack.c.bf16 %v2776_v61, %v2775_v26 }
0x25ef   :  { %v2508_v1 = vpop.permute.xlu0 %2507 }
0x25f0   :  { %3783 = vmatmul.mubr.msk.bf16.vlgmr.msra.gmra.mrb[40].mxu0 %vm604_vm2, %v2508_v1 }
0x25f1   :  { %3802 = vmatprep.mubr.msk.f32.mxu0 %vm4062_vm12, %v4055_v0  ;;  %3853 = vmatpush3.bf16.msra.mxu0 %v3852_v48 }
0x25f2   :  { %3854 = vmatprep.subr.bf16.mxu0 %v4072_v44 }
0x25f5   :  { %3856 = vmatpush3.bf16.msra.mxu0 %v3855_v51 }
0x25f6   :  { %3857 = vmatprep.subr.bf16.mxu0 %v4072_v44 }
0x26c3   :  { %v2546_v58 = vpop.f32.mrb[40].mxu0 }
0x26c4   :  { %v2552_v3 = vadd.f32 %v2546_v58, %v2043_v19  ;;  %v3784_v11 = vpop.f32.mrb[41].mxu0 }
0x26c5   :  { %v2549_v12 = vpop.f32.mrb[42].mxu0 }
0x26c6   :  { %4034 = vtanh.f32 %v2552_v3  ;;  %v3785_v2 = vpop.f32.mrb[43].mxu0  ;;  %v2553_v13 = vmul.f32 0.5, %v2552_v3 }
0x26c7   :  { %v3365_v2 = vld [vmem:[%s3237_s24] ss:$0 sm:$0xff]  ;;  %s4085_s24 = smov 25  }
0x26c8   :  { %4036 = vtanh.f32 %v2553_v13  ;;  %s3245_s27 = sld [smem:[%s4698_s0 + %s4085_s24]]  }
0x26d0   :  { %v4035_v62 = vpop.eup %4034 }
0x26d1   :  { %2560 = vrot.lane.b32.xlu1 %v4035_v62, %s4066_s16 }
0x26d2   :  { %v4037_v14 = vpop.eup %4036 }
0x26d3   :  { %v2555_v17 = vmul.f32 0.5, %v4037_v14 }
0x26d5   :  { %v2556_v4 = vadd.f32 0.5, %v2555_v17 }
0x26d7   :  { %v2558_v21 = vmul.f32 %v2556_v4, %v2497_v54 }
0x2743   :  { %v2561_v18 = vpop.permute.xlu1 %2560 }
0x2744   :  { %v2563_v20 = vmul.f32 %v2561_v18, %v2556_v4 }
0x2746   :  { %2565 = vrot.lane.b32.xlu0 %v2563_v20, %s4067_s17 }
0x27b8   :  { %v2566_v34 = vpop.permute.xlu0 %2565 }
0x27b9   :  { %v2568_v22 = vadd.f32 %v2566_v34, %v2558_v21 }
0x27bb   :  { %4038 = vtanh.f32 %v2568_v22 }
0x27c5   :  { %v4039_v5 = vpop.eup %4038 }
0x27c6   :  { %2571 = vrot.lane.b32.xlu1 %v4039_v5, %s4066_s16 }
0x2838   :  { %v2572_v6 = vpop.permute.xlu1 %2571 }
0x2839   :  { %v2574_v7 = vmul.f32 %v2572_v6, %v2556_v4  ;;  %v3366_v4 = vld [vmem:[%s3239_s28] ss:$0 sm:$0xff]  ;;  %s4086_s28 = smov 27  }
0x283a   :  { %s3247_s1 = sld [smem:[%s4698_s0 + %s4086_s28]]  }
0x283b   :  { %v2576_v8 = vpack.c.bf16 %v2574_v7, %v2574_v7 }
0x283d   :  { %2578 = vrot.lane.b32.xlu0 %v2576_v8, %s4067_s17 }
0x28af   :  { %v2579_v9 = vpop.permute.xlu0 %2578 }
0x28b0   :  { %3791 = vmatmul.mubr.msk.bf16.vlgmr.msra.gmra.mrb[48].mxu1 %vm604_vm2, %v2579_v9  ;;  %v2891_v9 = vld [vmem:[%s3242_s2] sm:$0xff]  ;;  %s4087_s2 = smov 96  }
0x28b1   :  { %3814 = vmatprep.mubr.msk.f32.mxu1 %vm4062_vm12, %v4055_v0  ;;  %3813 = vmatpush3.msra.mxu1 %v2891_v9 }
0x28b2   :  { %3822 = vmatprep.subr.mxu1 %v4055_v0 }
0x2983   :  { %v2617_v32 = vpop.f32.mrb[48].mxu1 }
0x2984   :  { %v2623_v25 = vadd.f32 %v2617_v32, %v2046_v23  ;;  %v3792_v40 = vpop.f32.mrb[49].mxu1 }
0x2985   :  { %v2620_v27 = vpop.f32.mrb[50].mxu1 }
0x2986   :  { %4040 = vtanh.f32 %v2623_v25  ;;  %v3793_v28 = vpop.f32.mrb[51].mxu1  ;;  %v2624_v30 = vmul.f32 0.5, %v2623_v25 }
0x2988   :  { %4042 = vtanh.f32 %v2624_v30 }
0x2990   :  { %v4041_v29 = vpop.eup %4040 }
0x2991   :  { %2631 = vrot.lane.b32.xlu1 %v4041_v29, %s4066_s16  ;;  %v3369_v29 = vld [vmem:[%s3241_s10] ss:$0 sm:$0xff]  ;;  %s3250_s10 = sld [smem:[%s4698_s0 + %s4089_s7]]  }
0x2992   :  { %v4043_v33 = vpop.eup %4042 }
0x2993   :  { %v2626_v10 = vmul.f32 0.5, %v4043_v33 }
0x2995   :  { %v2627_v41 = vadd.f32 0.5, %v2626_v10 }
0x2997   :  { %v2629_v43 = vmul.f32 %v2627_v41, %v2568_v22 }
0x2a03   :  { %v2632_v37 = vpop.permute.xlu1 %2631 }
0x2a04   :  { %v2634_v42 = vmul.f32 %v2632_v37, %v2627_v41  ;;  %v3370_v37 = vld [vmem:[%s3243_s14] ss:$0 sm:$0xff]  ;;  %s3248_s14 = sld [smem:[%s4698_s0 + %s4090_s11]]  }
0x2a06   :  { %2636 = vrot.lane.b32.xlu0 %v2634_v42, %s4067_s17 }
0x2a78   :  { %v2637_v24 = vpop.permute.xlu0 %2636 }
0x2a79   :  { %v4603_v39 = vadd.f32 %v2637_v24, %v2629_v43 }
0x2a7b   :  { %4044 = vtanh.f32 %v4603_v39 }
0x2a85   :  { %v4045_v50 = vpop.eup %4044 }
0x2a86   :  { %2642 = vrot.lane.b32.xlu1 %v4045_v50, %s4066_s16  ;;  %s4076_s16 = smov 16  }
0x2a87   :  { %s3236_s20 = sld [smem:[%s4698_s0 + %s4076_s16]]  }
0x2a8d   :  { %v3364_v11 = vld [vmem:[%s3236_s20] ss:$0 sm:$0xff]  ;;  %s4084_s20 = smov 24  }
0x2a8e   :  { %s3244_s23 = sld [smem:[%s4698_s0 + %s4084_s20]]   ;;  %s4092_s20 = smov 31  }
0x2af8   :  { %v2643_v52 = vpop.permute.xlu1 %2642 }
0x2af9   :  { %v2645_v53 = vmul.f32 %v2643_v52, %v2627_v41 }
0x2afb   :  { %2647 = vrot.lane.b32.xlu0 %v2645_v53, %s4067_s17 }
0x2b6d   :  { %v2648_v55 = vpop.permute.xlu0 %2647 }
0x2b6e   :  { %3360 = vst.msk [vmem:[%s4517_s3 + $0x8] sm:$0xff] %vm604_vm2, %v2648_v55  ;;  %3803 = vmatmul.mubr.msk.f32.vlgmr.msra.gmra.mrb[44].mxu0 %vm604_vm2, %v2648_v55  ;;  %s4080_s3 = smov 20   ;;  %v3372_v55 = vld [vmem:[%s3244_s23] ss:$0 sm:$0xff]  ;;  %s3251_s23 = sld [smem:[%s4698_s0 + %s4092_s20]]  }
0x2b6f   :  { %3809 = vmatprep.mubr.msk.f32.mxu0 %vm4062_vm12, %v4055_v0  ;;  %3859 = vmatpush3.bf16.msra.mxu0 %v3858_v63  ;;  %s3240_s6 = sld [smem:[%s4698_s0 + %s4080_s3]]   ;;  %s4088_s3 = smov 34  }
0x2b70   :  { %3817 = vmatprep.subr.mxu0 %v4055_v0 }
0x2b75   :  { %v3368_v27 = vld [vmem:[%s3240_s6] ss:$0 sm:$0xff]  ;;  %s3254_s6 = sld [smem:[%s4698_s0 + %s4088_s3]]  }
0x2c41   :  { %v2737_v35 = vpop.f32.mrb[44].mxu0 }
0x2c42   :  { %v2738_v31 = vadd.f32 %v3362_v15, %v2737_v35  ;;  %v3804_v56 = vpop.f32.mrb[45].mxu0  ;;  %v3373_v35 = vld [vmem:[%s3245_s27] ss:$0 sm:$0xff] }
0x2c44   :  { %v2742_v16 = vsel %vm2741_vm9, %v2738_v31, 0.0 }
0x2c45   :  { %2743 = vadd.xlane.f32.xlu1 %v2742_v16 }
0x2cd2   :  { %v2744_v57 = vpop.xlane.xlu1 %2743 }
0x2cd3   :  { %v2746_v59 = vmul.f32 0.0625, %v2744_v57 }
0x2cd5   :  { %v2747_v38 = vsub.f32 %v2738_v31, %v2746_v59  ;;  %v3374_v59 = vld [vmem:[%s3247_s1] ss:$0 sm:$0xff] }
0x2cd7   :  { %v2748_v54 = vmul.f32 %v2747_v38, %v2747_v38 }
0x2cd9   :  { %v2749_v36 = vsel %vm2741_vm9, %v2748_v54, 0.0 }
0x2cda   :  { %2750 = vadd.xlane.f32.xlu0 %v2749_v36 }
0x2d67   :  { %v2751_v1 = vpop.xlane.xlu0 %2750 }
0x2d68   :  { %v2752_v19 = vmul.f32 0.0625, %v2751_v1 }
0x2d6a   :  { %v2753_v58 = vadd.f32 1e-05, %v2752_v19 }
0x2d6c   :  { %4046 = vrsqrt.f32 %v2753_v58 }
0x2d76   :  { %v4047_v3 = vpop.eup %4046 }
0x2d77   :  { %v2755_v12 = vmul.f32 %v4047_v3, %v2747_v38 }
0x2d79   :  { %v2763_v62 = vmul.f32 %v3364_v11, %v2755_v12 }
0x2d7b   :  { %v2771_v13 = vadd.f32 %v3365_v2, %v2763_v62 }
0x2d7d   :  { %vm2772_vm10 = vcmp.gt.f32.partialorder %v2771_v13, 0.0  ;;  %v2773_v14 = vmul.f32 0.01, %v2771_v13 }
0x2d7f   :  { %v2774_v17 = vsel %vm2772_vm10, %v2771_v13, %v2773_v14  ;;  %v3377_v13 = vld [vmem:[%s3248_s14] ss:$0 sm:$0xff] }
0x2d80   :  { %3810 = vmatmul.mubr.msk.f32.vlgmr.msra.gmra.mrb[46].mxu0 %vm2741_vm9, %v2774_v17 }
0x2d81   :  { %3819 = vmatprep.mubr.msk.f32.mxu0 %vm4062_vm12, %v4055_v0 }
0x2e53   :  { %v2853_v18 = vpop.f32.mrb[46].mxu0 }
0x2e54   :  { %v2854_v20 = vadd.f32 %v3366_v4, %v2853_v18  ;;  %v3811_v21 = vpop.f32.mrb[47].mxu0 }
0x2e56   :  { %v2858_v34 = vsel %vm2857_vm13, %v2854_v20, 0.0 }
0x2e57   :  { %2859 = vadd.xlane.f32.xlu0 %v2858_v34  ;;  %v3379_v34 = vld [vmem:[%s3251_s23] ss:$0 sm:$0xff] }
0x2ee4   :  { %v2860_v22 = vpop.xlane.xlu0 %2859 }
0x2ee5   :  { %v2862_v5 = vmul.f32 0.125, %v2860_v22 }
0x2ee7   :  { %v2863_v6 = vsub.f32 %v2854_v20, %v2862_v5 }
0x2ee9   :  { %v2864_v7 = vmul.f32 %v2863_v6, %v2863_v6 }
0x2eeb   :  { %v2865_v8 = vsel %vm2857_vm13, %v2864_v7, 0.0 }
0x2eec   :  { %2866 = vadd.xlane.f32.xlu1 %v2865_v8 }
0x2f79   :  { %v2867_v23 = vpop.xlane.xlu1 %2866 }
0x2f7a   :  { %v2868_v32 = vmul.f32 0.125, %v2867_v23 }
0x2f7c   :  { %v2869_v25 = vadd.f32 1e-05, %v2868_v32 }
0x2f7e   :  { %4048 = vrsqrt.f32 %v2869_v25 }
0x2f88   :  { %v4049_v40 = vpop.eup %4048 }
0x2f89   :  { %v2871_v28 = vmul.f32 %v4049_v40, %v2863_v6 }
0x2f8b   :  { %v2879_v30 = vmul.f32 %v3368_v27, %v2871_v28 }
0x2f8d   :  { %v2887_v33 = vadd.f32 %v3369_v29, %v2879_v30 }
0x2f8f   :  { %vm2888_vm14 = vcmp.gt.f32.partialorder %v2887_v33, 0.0  ;;  %v2889_v10 = vmul.f32 0.01, %v2887_v33 }
0x2f91   :  { %v2890_v41 = vsel %vm2888_vm14, %v2887_v33, %v2889_v10 }
0x2f92   :  { %3815 = vmatmul.mubr.msk.f32.vlgmr.msra.gmra.mrb[52].mxu1 %vm2857_vm13, %v2890_v41 }
0x2f93   :  { %3824 = vmatprep.mubr.msk.f32.mxu1 %vm4062_vm12, %v4055_v0  ;;  %v3005_v0 = vld [vmem:[%s3246_s19] sm:$0xf]  ;;  %vm3089_vm12 = vcmask 15360   ;;  %s3249_s19 = sld [smem:[%s4698_s0 + %s4091_s15]]  }
0x2f94   :  { %3818 = vmatpush3.msk.msra.mxu0 %vm195_vm1, %v3005_v0 }
0x2f99   :  { %v3378_v17 = vld [vmem:[%s3249_s19] ss:$0 sm:$0xff] }
0x3065   :  { %v2968_v42 = vpop.f32.mrb[52].mxu1 }
0x3066   :  { %v2969_v43 = vadd.f32 %v3370_v37, %v2968_v42  ;;  %v3816_v24 = vpop.f32.mrb[53].mxu1 }
0x3068   :  { %v2972_v44 = vsel %vm140_vm0, %v2969_v43, 0.0 }
0x3069   :  { %2973 = vadd.xlane.f32.xlu0 %v2972_v44 }
0x30f6   :  { %v2974_v45 = vpop.xlane.xlu0 %2973 }
0x30f7   :  { %v2976_v46 = vmul.f32 0.25, %v2974_v45 }
0x30f9   :  { %v2977_v47 = vsub.f32 %v2969_v43, %v2976_v46 }
0x30fb   :  { %v2978_v48 = vmul.f32 %v2977_v47, %v2977_v47 }
0x30fd   :  { %v2979_v49 = vsel %vm140_vm0, %v2978_v48, 0.0 }
0x30fe   :  { %2980 = vadd.xlane.f32.xlu1 %v2979_v49 }
0x318b   :  { %v2981_v50 = vpop.xlane.xlu1 %2980 }
0x318c   :  { %v2982_v51 = vmul.f32 0.25, %v2981_v50 }
0x318e   :  { %v2983_v52 = vadd.f32 1e-05, %v2982_v51 }
0x3190   :  { %4050 = vrsqrt.f32 %v2983_v52 }
0x319a   :  { %v4051_v53 = vpop.eup %4050 }
0x319b   :  { %v2985_v15 = vmul.f32 %v4051_v53, %v2977_v47 }
0x319d   :  { %v2993_v31 = vmul.f32 %v3372_v55, %v2985_v15 }
0x319f   :  { %v3001_v56 = vadd.f32 %v3373_v35, %v2993_v31 }
0x31a1   :  { %vm3002_vm1 = vcmp.gt.f32.partialorder %v3001_v56, 0.0  ;;  %v3003_v16 = vmul.f32 0.01, %v3001_v56 }
0x31a3   :  { %v3004_v57 = vsel %vm3002_vm1, %v3001_v56, %v3003_v16 }
0x31a4   :  { %3820 = vmatmul.mubr.msk.f32.vlgmr.msra.gmra.mrb[48].mxu0 %vm140_vm0, %v3004_v57 }
0x3277   :  { %v3085_v38 = vpop.f32.mrb[48].mxu0 }
0x3278   :  { %v3086_v54 = vadd.f32 %v3374_v59, %v3085_v38  ;;  %v3821_v36 = vpop.f32.mrb[49].mxu0 }
0x327a   :  { %v3090_v26 = vsel %vm3089_vm12, %v3086_v54, 0.0 }
0x327b   :  { %3091 = vadd.xlane.f32.xlu0 %v3090_v26 }
0x3291   :  { %1933 = vrot.lane.b32.xlu0 %v4493_v60, %s4087_s2  ;;  %v3123_v60 = vld [vmem:[%s3250_s10] sm:$0x3] }
0x3292   :  { %3823 = vmatpush3.msk.msra.mxu1 %vm1198_vm11, %v3123_v60 }
0x3308   :  { %v3092_v61 = vpop.xlane.xlu0 %3091 }
0x3309   :  { %v3094_v63 = vmul.f32 0.5, %v3092_v61 }
0x330b   :  { %v3095_v1 = vsub.f32 %v3086_v54, %v3094_v63 }
0x330c   :  { %v1934_v19 = vpop.permute.xlu0 %1933 }
0x330d   :  { %1936 = vst.msk [vmem:[%s3254_s6] sm:$0xff] %vm604_vm2, %v1934_v19  ;;  %v3096_v58 = vmul.f32 %v3095_v1, %v3095_v1 }
0x330f   :  { %v3097_v3 = vsel %vm3089_vm12, %v3096_v58, 0.0 }
0x3310   :  { %3098 = vadd.xlane.f32.xlu1 %v3097_v3 }
0x3321   :  { %2653 = vrot.lane.b32.xlu1 %v4603_v39, %s4087_s2 }
0x339d   :  { %v3099_v11 = vpop.xlane.xlu1 %3098 }
0x339e   :  { %v3100_v12 = vmul.f32 0.5, %v3099_v11 }
0x33a0   :  { %v3101_v2 = vadd.f32 1e-05, %v3100_v12 }
0x33a1   :  { %v2654_v62 = vpop.permute.xlu1 %2653 }
0x33a2   :  { %4052 = vrsqrt.f32 %v3101_v2  ;;  %3361 = vst.msk [vmem:[%s3254_s6 + $0x8] sm:$0xff] %vm604_vm2, %v2654_v62  ;;  %vm3207_vm2 = vcmask 23552  }
0x33ac   :  { %v4053_v39 = vpop.eup %4052 }
0x33ad   :  { %v3103_v14 = vmul.f32 %v4053_v39, %v3095_v1 }
0x33af   :  { %v3111_v4 = vmul.f32 %v3377_v13, %v3103_v14 }
0x33b1   :  { %v3119_v18 = vadd.f32 %v3378_v17, %v3111_v4 }
0x33b3   :  { %vm3120_vm0 = vcmp.gt.f32.partialorder %v3119_v18, 0.0  ;;  %v3121_v20 = vmul.f32 0.01, %v3119_v18 }
0x33b5   :  { %v3122_v21 = vsel %vm3120_vm0, %v3119_v18, %v3121_v20 }
0x33b6   :  { %3825 = vmatmul.mubr.msk.f32.vlgmr.msra.gmra.mrb[54].mxu1 %vm3089_vm12, %v3122_v21 }
0x3489   :  { %v3203_v22 = vpop.f32.mrb[54].mxu1 }
0x348a   :  { %v3204_v5 = vadd.f32 %v3379_v34, %v3203_v22  ;;  %v3826_v6 = vpop.f32.mrb[55].mxu1 }
0x348c   :  { %3208 = vst.msk [vmem:[%s3252_s26] sm:$0xff] %vm3207_vm2, %v3204_v5 }

</bundles_post_ra>
